<compile_context>
chip_gen: v7x
topology: tpu7x:2x2x1
jax: 0.10.0
libtpu: 0.0.40
codegen_flags: <defaults>
</compile_context>

<pallas_src>
import numpy as np
import jax
import jax.numpy as jnp
from jax import lax
from jax.experimental import pallas as pl
from jax.experimental.pallas import tpu as pltpu

# ----- module config (mirrors ChannelDirectionalFeatureComputer.__init__) -----
N_FFT = 64
WIN_LENGTH = 64
HOP_LENGTH = 32
INPUT_FEATURES = ("LPS", "IPD")
MIC_PAIRS = ((0, 1), (0, 2), (0, 3), (1, 2), (1, 3), (2, 3))
LPS_CHANNEL = 0
USE_COS_IPD = True
USE_SIN_IPD = False
EPS = 1e-8

NUM_FREQS = N_FFT // 2 + 1          # 33
NUM_PAIRS = len(MIC_PAIRS)          # 6
DIR_DIM = (1 if "LPS" in INPUT_FEATURES else 0) + (
    NUM_PAIRS * (1 + int(USE_SIN_IPD)) if "IPD" in INPUT_FEATURES else 0
)

# Fused basis layout: cos rows at [0, F), sin rows at [SIN_OFF, SIN_OFF + F)
# (SIN_OFF is a multiple of 8 so the imag slice is sublane-tile aligned).
COS_OFF = 0
SIN_OFF = ((NUM_FREQS + 7) // 8) * 8                 # 40
BASIS_ROWS = ((SIN_OFF + NUM_FREQS + 7) // 8) * 8    # 80

# Frame-tile cap: keeps (frames + 5 output blocks) * 2 buffers small enough for
# v7x's 64 MiB VMEM on long clips and gives multiple grid steps per batch.
MAX_K_TILE = 512


def _fused_basis():
    """Deterministic conv-STFT kernel (sqrt-hann windowed rfft basis), fused.

    basis[COS_OFF + f, n] =  w[n] * cos(2*pi*n*f / N_FFT)
    basis[SIN_OFF + f, n] = -w[n] * sin(2*pi*n*f / N_FFT)
    so that  res = basis @ framesT  gives real = res[:F], imag = res[SIN_OFF:SIN_OFF+F],
    equivalent to F.conv1d(y, K, stride=hop) with K = rfft(eye(N))[:L] * window
    (weights generated in-script, as in CustomSTFT).
    """
    n = np.arange(WIN_LENGTH)[:, None]
    f = np.arange(NUM_FREQS)[None, :]
    window = np.sqrt(np.hanning(WIN_LENGTH))[:, None]
    ang = 2.0 * np.pi * n * f / N_FFT
    cos_b = (window * np.cos(ang)).astype(np.float32)    # (L, F)
    sin_b = (-window * np.sin(ang)).astype(np.float32)   # (L, F)
    basis = np.zeros((BASIS_ROWS, WIN_LENGTH), np.float32)
    basis[COS_OFF:COS_OFF + NUM_FREQS] = cos_b.T
    basis[SIN_OFF:SIN_OFF + NUM_FREQS] = sin_b.T
    return jnp.asarray(basis)


def _make_kernel(num_channels):
    F = NUM_FREQS

    def kernel(frames_ref, basis_ref,
               dir_ref, mag_ref, phase_ref, real_ref, imag_ref):
        basis = basis_ref[...]                                # (BASIS_ROWS, L)
        powers, rns, ins = [], [], []
        for m in range(num_channels):                         # M is small & static
            fm = frames_ref[0, m]                             # (L, KT), frames on lanes
            # one fused MXU matmul per channel -> real & imag together, K lane-dense
            res = jnp.dot(basis, fm, preferred_element_type=jnp.float32)  # (BASIS_ROWS, KT)
            r = res[COS_OFF:COS_OFF + F]                      # (F, KT)
            i = res[SIN_OFF:SIN_OFF + F]                      # (F, KT)
            p = r * r + i * i                                 # power (VPU)
            inv = lax.rsqrt(p + EPS)                          # EUP rsqrt (for IPD normalization)

            real_ref[0, m] = r
            imag_ref[0, m] = i
            mag_ref[0, m] = jnp.sqrt(p)
            phase_ref[0, m] = jnp.arctan2(i, r)               # only needed for the phase output

            powers.append(p)
            rns.append(r * inv)                               # cos(phase_m)
            ins.append(i * inv)                               # sin(phase_m)

        c = 0
        if "LPS" in INPUT_FEATURES:
            # log(mag**2 + eps) == log(r*r + i*i + eps) up to rounding
            dir_ref[0, 0] = jnp.log(powers[LPS_CHANNEL] + EPS)
            c = 1
        if "IPD" in INPUT_FEATURES:
            for pidx, (lft, rgt) in enumerate(MIC_PAIRS):
                # cos(ph_l - ph_r) via the normalized cross-spectrum (no cos / arctan2)
                dir_ref[0, c + pidx] = rns[lft] * rns[rgt] + ins[lft] * ins[rgt]
            if USE_SIN_IPD:
                for pidx, (lft, rgt) in enumerate(MIC_PAIRS):
                    dir_ref[0, c + NUM_PAIRS + pidx] = (
                        ins[lft] * rns[rgt] - rns[lft] * ins[rgt])

    return kernel


@jax.jit
def channel_directional_features(y):
    """y: [B, M, T] float32 waveform -> (directional, magnitude, phase, real, imag),
    all in the PyTorch [B, *, F, K] layout."""
    B, M, T = y.shape
    L, hop, F = WIN_LENGTH, HOP_LENGTH, NUM_FREQS
    K = (T - L) // hop + 1

    # framing, built directly in the transposed (matmul-ready) layout:
    # framesT[b, m, l, k] = y[b, m, k*hop + l]   -> frame index k on the lane axis
    idxT = jnp.arange(L)[:, None] + (jnp.arange(K) * hop)[None, :]
    framesT = y[:, :, idxT].astype(jnp.float32)               # (B, M, L, K)

    # frame tiling (static): single tile for short clips, 512-frame tiles otherwise
    KT = K if K <= MAX_K_TILE else MAX_K_TILE
    nkt = pl.cdiv(K, KT)
    Kp = nkt * KT
    if Kp != K:
        framesT = jnp.pad(framesT, ((0, 0), (0, 0), (0, 0), (0, Kp - K)))

    basis = _fused_basis()

    out_shapes = (
        jax.ShapeDtypeStruct((B, DIR_DIM, F, Kp), jnp.float32),  # directional
        jax.ShapeDtypeStruct((B, M, F, Kp), jnp.float32),        # magnitude
        jax.ShapeDtypeStruct((B, M, F, Kp), jnp.float32),        # phase
        jax.ShapeDtypeStruct((B, M, F, Kp), jnp.float32),        # real
        jax.ShapeDtypeStruct((B, M, F, Kp), jnp.float32),        # imag
    )
    spec_bmfk = pl.BlockSpec((1, M, F, KT), lambda b, kt: (b, 0, 0, kt))
    spec_dir = pl.BlockSpec((1, DIR_DIM, F, KT), lambda b, kt: (b, 0, 0, kt))

    directional, mag, phase, real, imag = pl.pallas_call(
        _make_kernel(M),
        out_shape=out_shapes,
        grid=(B, nkt),
        in_specs=[
            pl.BlockSpec((1, M, L, KT), lambda b, kt: (b, 0, 0, kt)),
            pl.BlockSpec((BASIS_ROWS, L), lambda b, kt: (0, 0)),   # resident constant
        ],
        out_specs=(spec_dir, spec_bmfk, spec_bmfk, spec_bmfk, spec_bmfk),
        compiler_params=pltpu.CompilerParams(
            dimension_semantics=("parallel", "parallel")),
    )(framesT, basis)

    if Kp != K:
        directional = directional[..., :K]
        mag = mag[..., :K]
        phase = phase[..., :K]
        real = real[..., :K]
        imag = imag[..., :K]
    return directional, mag, phase, real, imag


if __name__ == "__main__":
    B, M, T = 2, 4, 512
    key = jax.random.PRNGKey(0)
    y = jax.random.normal(key, (B, M, T), dtype=jnp.float32)

    outs = jax.block_until_ready(channel_directional_features(y))
    directional, mag, phase, real, imag = outs

    K = (T - WIN_LENGTH) // HOP_LENGTH + 1
    assert directional.shape == (B, DIR_DIM, NUM_FREQS, K), directional.shape
    assert mag.shape == (B, M, NUM_FREQS, K), mag.shape
    assert phase.shape == (B, M, NUM_FREQS, K)
    assert real.shape == (B, M, NUM_FREQS, K)
    assert imag.shape == (B, M, NUM_FREQS, K)
    for o in outs:
        assert bool(jnp.all(jnp.isfinite(o)))

    # ----- pure-JAX reference check -----
    n = np.arange(WIN_LENGTH)[:, None]
    f = np.arange(NUM_FREQS)[None, :]
    window = np.sqrt(np.hanning(WIN_LENGTH))[:, None]
    ang = 2.0 * np.pi * n * f / N_FFT
    cos_b = jnp.asarray((window * np.cos(ang)).astype(np.float32))
    sin_b = jnp.asarray((-window * np.sin(ang)).astype(np.float32))

    idx = (jnp.arange(K) * HOP_LENGTH)[:, None] + jnp.arange(WIN_LENGTH)[None, :]
    frames = y[:, :, idx]                                    # (B, M, K, L)
    real_r = jnp.einsum("bmkl,lf->bmfk", frames, cos_b)
    imag_r = jnp.einsum("bmkl,lf->bmfk", frames, sin_b)
    mag_r = jnp.sqrt(real_r ** 2 + imag_r ** 2)
    phase_r = jnp.arctan2(imag_r, real_r)
    lps_r = jnp.log(mag_r[:, LPS_CHANNEL] ** 2 + EPS)[:, None]
    left = [p[0] for p in MIC_PAIRS]
    right = [p[1] for p in MIC_PAIRS]
    cos_ipd_r = jnp.cos(phase_r[:, left] - phase_r[:, right])
    dir_r = jnp.concatenate([lps_r, cos_ipd_r], axis=1)

    np.testing.assert_allclose(np.asarray(real), np.asarray(real_r), rtol=5e-2, atol=5e-2)
    np.testing.assert_allclose(np.asarray(imag), np.asarray(imag_r), rtol=5e-2, atol=5e-2)
    np.testing.assert_allclose(np.asarray(mag), np.asarray(mag_r), rtol=5e-2, atol=5e-2)
    # phase compared via cos of the difference (insensitive to |X|~0 branch noise)
    np.testing.assert_allclose(
        np.cos(np.asarray(phase) - np.asarray(phase_r)), 1.0, atol=1e-2)
    np.testing.assert_allclose(
        np.asarray(directional), np.asarray(dir_r), rtol=5e-2, atol=5e-2)

    print("KERNEL_OK")
</pallas_src>

<mosaic_0001>
module attributes {stable_mosaic.version = 11 : i64} {
  func.func @kernel(%arg0: i32, %arg1: i32, %arg2: memref<1x4x64x15xf32, #tpu.memory_space<vmem>>, %arg3: memref<80x64xf32, #tpu.memory_space<vmem>>, %arg4: memref<1x7x33x15xf32, #tpu.memory_space<vmem>>, %arg5: memref<1x4x33x15xf32, #tpu.memory_space<vmem>>, %arg6: memref<1x4x33x15xf32, #tpu.memory_space<vmem>>, %arg7: memref<1x4x33x15xf32, #tpu.memory_space<vmem>>, %arg8: memref<1x4x33x15xf32, #tpu.memory_space<vmem>>) attributes {dimension_semantics = [#tpu.dimension_semantics<parallel>, #tpu.dimension_semantics<parallel>], iteration_bounds = array<i64: 2, 1>, scalar_prefetch = 0 : i64, scratch_operands = 0 : i64, tpu.core_type = #tpu.core_type<tc>, window_params = [{transform_indices = @transform_0, window_bounds = array<i64: 1, 4, 64, 15>}, {pipeline_mode = #tpu.pipeline_mode<synchronous>, transform_indices = @transform_1, window_bounds = array<i64: 80, 64>}, {transform_indices = @transform_2, window_bounds = array<i64: 1, 7, 33, 15>}, {transform_indices = @transform_3, window_bounds = array<i64: 1, 4, 33, 15>}, {transform_indices = @transform_4, window_bounds = array<i64: 1, 4, 33, 15>}, {transform_indices = @transform_5, window_bounds = array<i64: 1, 4, 33, 15>}, {transform_indices = @transform_6, window_bounds = array<i64: 1, 4, 33, 15>}]} {
    %c0 = arith.constant 0 : index
    %c0_0 = arith.constant 0 : index
    %0 = vector.load %arg3[%c0, %c0_0] : memref<80x64xf32, #tpu.memory_space<vmem>>, vector<80x64xf32>
    %c0_1 = arith.constant 0 : index
    %c0_2 = arith.constant 0 : index
    %c0_3 = arith.constant 0 : index
    %c0_4 = arith.constant 0 : index
    %1 = vector.load %arg2[%c0_1, %c0_2, %c0_3, %c0_4] : memref<1x4x64x15xf32, #tpu.memory_space<vmem>>, vector<1x1x64x15xf32>
    %2 = vector.shape_cast %1 : vector<1x1x64x15xf32> to vector<64x15xf32>
    %cst = arith.constant dense<0.000000e+00> : vector<80x15xf32>
    %3 = tpu.matmul %0, %2, %cst {dimension_numbers = #tpu.dot_dimension_numbers<[1], [0], [0], [1], [0, 0, 1, 1], [], []>} : vector<80x64xf32>, vector<64x15xf32>, vector<80x15xf32> -> vector<80x15xf32>
    %4 = vector.extract_strided_slice %3 {offsets = [0, 0], sizes = [33, 15], strides = [1, 1]} : vector<80x15xf32> to vector<33x15xf32>
    %5 = vector.extract_strided_slice %3 {offsets = [40, 0], sizes = [33, 15], strides = [1, 1]} : vector<80x15xf32> to vector<33x15xf32>
    %6 = arith.mulf %4, %4 : vector<33x15xf32>
    %7 = arith.mulf %5, %5 : vector<33x15xf32>
    %8 = arith.addf %6, %7 : vector<33x15xf32>
    %cst_5 = arith.constant 9.99999993E-9 : f32
    %9 = vector.broadcast %cst_5 : f32 to vector<33x15xf32>
    %10 = arith.addf %8, %9 : vector<33x15xf32>
    %11 = math.rsqrt %10 : vector<33x15xf32>
    %c0_6 = arith.constant 0 : index
    %c0_7 = arith.constant 0 : index
    %c0_8 = arith.constant 0 : index
    %c0_9 = arith.constant 0 : index
    %12 = vector.load %arg7[%c0_6, %c0_7, %c0_8, %c0_9] : memref<1x4x33x15xf32, #tpu.memory_space<vmem>>, vector<1x1x33x15xf32>
    %13 = vector.shape_cast %12 : vector<1x1x33x15xf32> to vector<33x15xf32>
    %14 = vector.shape_cast %4 : vector<33x15xf32> to vector<1x1x33x15xf32>
    tpu.vector_store %arg7[%c0_6, %c0_7, %c0_8, %c0_9], %14 {strides = array<i32>} : memref<1x4x33x15xf32, #tpu.memory_space<vmem>>, vector<1x1x33x15xf32>,
    %c0_10 = arith.constant 0 : index
    %c0_11 = arith.constant 0 : index
    %c0_12 = arith.constant 0 : index
    %c0_13 = arith.constant 0 : index
    %15 = vector.load %arg8[%c0_10, %c0_11, %c0_12, %c0_13] : memref<1x4x33x15xf32, #tpu.memory_space<vmem>>, vector<1x1x33x15xf32>
    %16 = vector.shape_cast %15 : vector<1x1x33x15xf32> to vector<33x15xf32>
    %17 = vector.shape_cast %5 : vector<33x15xf32> to vector<1x1x33x15xf32>
    tpu.vector_store %arg8[%c0_10, %c0_11, %c0_12, %c0_13], %17 {strides = array<i32>} : memref<1x4x33x15xf32, #tpu.memory_space<vmem>>, vector<1x1x33x15xf32>,
    %18 = math.sqrt %8 : vector<33x15xf32>
    %c0_14 = arith.constant 0 : index
    %c0_15 = arith.constant 0 : index
    %c0_16 = arith.constant 0 : index
    %c0_17 = arith.constant 0 : index
    %19 = vector.load %arg5[%c0_14, %c0_15, %c0_16, %c0_17] : memref<1x4x33x15xf32, #tpu.memory_space<vmem>>, vector<1x1x33x15xf32>
    %20 = vector.shape_cast %19 : vector<1x1x33x15xf32> to vector<33x15xf32>
    %21 = vector.shape_cast %18 : vector<33x15xf32> to vector<1x1x33x15xf32>
    tpu.vector_store %arg5[%c0_14, %c0_15, %c0_16, %c0_17], %21 {strides = array<i32>} : memref<1x4x33x15xf32, #tpu.memory_space<vmem>>, vector<1x1x33x15xf32>,
    %22 = math.atan2 %5, %4 : vector<33x15xf32>
    %c0_18 = arith.constant 0 : index
    %c0_19 = arith.constant 0 : index
    %c0_20 = arith.constant 0 : index
    %c0_21 = arith.constant 0 : index
    %23 = vector.load %arg6[%c0_18, %c0_19, %c0_20, %c0_21] : memref<1x4x33x15xf32, #tpu.memory_space<vmem>>, vector<1x1x33x15xf32>
    %24 = vector.shape_cast %23 : vector<1x1x33x15xf32> to vector<33x15xf32>
    %25 = vector.shape_cast %22 : vector<33x15xf32> to vector<1x1x33x15xf32>
    tpu.vector_store %arg6[%c0_18, %c0_19, %c0_20, %c0_21], %25 {strides = array<i32>} : memref<1x4x33x15xf32, #tpu.memory_space<vmem>>, vector<1x1x33x15xf32>,
    %26 = arith.mulf %4, %11 : vector<33x15xf32>
    %27 = arith.mulf %5, %11 : vector<33x15xf32>
    %c0_22 = arith.constant 0 : index
    %c1 = arith.constant 1 : index
    %c0_23 = arith.constant 0 : index
    %c0_24 = arith.constant 0 : index
    %28 = vector.load %arg2[%c0_22, %c1, %c0_23, %c0_24] : memref<1x4x64x15xf32, #tpu.memory_space<vmem>>, vector<1x1x64x15xf32>
    %29 = vector.shape_cast %28 : vector<1x1x64x15xf32> to vector<64x15xf32>
    %cst_25 = arith.constant dense<0.000000e+00> : vector<80x15xf32>
    %30 = tpu.matmul %0, %29, %cst_25 {dimension_numbers = #tpu.dot_dimension_numbers<[1], [0], [0], [1], [0, 0, 1, 1], [], []>} : vector<80x64xf32>, vector<64x15xf32>, vector<80x15xf32> -> vector<80x15xf32>
    %31 = vector.extract_strided_slice %30 {offsets = [0, 0], sizes = [33, 15], strides = [1, 1]} : vector<80x15xf32> to vector<33x15xf32>
    %32 = vector.extract_strided_slice %30 {offsets = [40, 0], sizes = [33, 15], strides = [1, 1]} : vector<80x15xf32> to vector<33x15xf32>
    %33 = arith.mulf %31, %31 : vector<33x15xf32>
    %34 = arith.mulf %32, %32 : vector<33x15xf32>
    %35 = arith.addf %33, %34 : vector<33x15xf32>
    %cst_26 = arith.constant 9.99999993E-9 : f32
    %36 = vector.broadcast %cst_26 : f32 to vector<33x15xf32>
    %37 = arith.addf %35, %36 : vector<33x15xf32>
    %38 = math.rsqrt %37 : vector<33x15xf32>
    %c0_27 = arith.constant 0 : index
    %c1_28 = arith.constant 1 : index
    %c0_29 = arith.constant 0 : index
    %c0_30 = arith.constant 0 : index
    %39 = vector.load %arg7[%c0_27, %c1_28, %c0_29, %c0_30] : memref<1x4x33x15xf32, #tpu.memory_space<vmem>>, vector<1x1x33x15xf32>
    %40 = vector.shape_cast %39 : vector<1x1x33x15xf32> to vector<33x15xf32>
    %41 = vector.shape_cast %31 : vector<33x15xf32> to vector<1x1x33x15xf32>
    tpu.vector_store %arg7[%c0_27, %c1_28, %c0_29, %c0_30], %41 {strides = array<i32>} : memref<1x4x33x15xf32, #tpu.memory_space<vmem>>, vector<1x1x33x15xf32>,
    %c0_31 = arith.constant 0 : index
    %c1_32 = arith.constant 1 : index
    %c0_33 = arith.constant 0 : index
    %c0_34 = arith.constant 0 : index
    %42 = vector.load %arg8[%c0_31, %c1_32, %c0_33, %c0_34] : memref<1x4x33x15xf32, #tpu.memory_space<vmem>>, vector<1x1x33x15xf32>
    %43 = vector.shape_cast %42 : vector<1x1x33x15xf32> to vector<33x15xf32>
    %44 = vector.shape_cast %32 : vector<33x15xf32> to vector<1x1x33x15xf32>
    tpu.vector_store %arg8[%c0_31, %c1_32, %c0_33, %c0_34], %44 {strides = array<i32>} : memref<1x4x33x15xf32, #tpu.memory_space<vmem>>, vector<1x1x33x15xf32>,
    %45 = math.sqrt %35 : vector<33x15xf32>
    %c0_35 = arith.constant 0 : index
    %c1_36 = arith.constant 1 : index
    %c0_37 = arith.constant 0 : index
    %c0_38 = arith.constant 0 : index
    %46 = vector.load %arg5[%c0_35, %c1_36, %c0_37, %c0_38] : memref<1x4x33x15xf32, #tpu.memory_space<vmem>>, vector<1x1x33x15xf32>
    %47 = vector.shape_cast %46 : vector<1x1x33x15xf32> to vector<33x15xf32>
    %48 = vector.shape_cast %45 : vector<33x15xf32> to vector<1x1x33x15xf32>
    tpu.vector_store %arg5[%c0_35, %c1_36, %c0_37, %c0_38], %48 {strides = array<i32>} : memref<1x4x33x15xf32, #tpu.memory_space<vmem>>, vector<1x1x33x15xf32>,
    %49 = math.atan2 %32, %31 : vector<33x15xf32>
    %c0_39 = arith.constant 0 : index
    %c1_40 = arith.constant 1 : index
    %c0_41 = arith.constant 0 : index
    %c0_42 = arith.constant 0 : index
    %50 = vector.load %arg6[%c0_39, %c1_40, %c0_41, %c0_42] : memref<1x4x33x15xf32, #tpu.memory_space<vmem>>, vector<1x1x33x15xf32>
    %51 = vector.shape_cast %50 : vector<1x1x33x15xf32> to vector<33x15xf32>
    %52 = vector.shape_cast %49 : vector<33x15xf32> to vector<1x1x33x15xf32>
    tpu.vector_store %arg6[%c0_39, %c1_40, %c0_41, %c0_42], %52 {strides = array<i32>} : memref<1x4x33x15xf32, #tpu.memory_space<vmem>>, vector<1x1x33x15xf32>,
    %53 = arith.mulf %31, %38 : vector<33x15xf32>
    %54 = arith.mulf %32, %38 : vector<33x15xf32>
    %c0_43 = arith.constant 0 : index
    %c2 = arith.constant 2 : index
    %c0_44 = arith.constant 0 : index
    %c0_45 = arith.constant 0 : index
    %55 = vector.load %arg2[%c0_43, %c2, %c0_44, %c0_45] : memref<1x4x64x15xf32, #tpu.memory_space<vmem>>, vector<1x1x64x15xf32>
    %56 = vector.shape_cast %55 : vector<1x1x64x15xf32> to vector<64x15xf32>
    %cst_46 = arith.constant dense<0.000000e+00> : vector<80x15xf32>
    %57 = tpu.matmul %0, %56, %cst_46 {dimension_numbers = #tpu.dot_dimension_numbers<[1], [0], [0], [1], [0, 0, 1, 1], [], []>} : vector<80x64xf32>, vector<64x15xf32>, vector<80x15xf32> -> vector<80x15xf32>
    %58 = vector.extract_strided_slice %57 {offsets = [0, 0], sizes = [33, 15], strides = [1, 1]} : vector<80x15xf32> to vector<33x15xf32>
    %59 = vector.extract_strided_slice %57 {offsets = [40, 0], sizes = [33, 15], strides = [1, 1]} : vector<80x15xf32> to vector<33x15xf32>
    %60 = arith.mulf %58, %58 : vector<33x15xf32>
    %61 = arith.mulf %59, %59 : vector<33x15xf32>
    %62 = arith.addf %60, %61 : vector<33x15xf32>
    %cst_47 = arith.constant 9.99999993E-9 : f32
    %63 = vector.broadcast %cst_47 : f32 to vector<33x15xf32>
    %64 = arith.addf %62, %63 : vector<33x15xf32>
    %65 = math.rsqrt %64 : vector<33x15xf32>
    %c0_48 = arith.constant 0 : index
    %c2_49 = arith.constant 2 : index
    %c0_50 = arith.constant 0 : index
    %c0_51 = arith.constant 0 : index
    %66 = vector.load %arg7[%c0_48, %c2_49, %c0_50, %c0_51] : memref<1x4x33x15xf32, #tpu.memory_space<vmem>>, vector<1x1x33x15xf32>
    %67 = vector.shape_cast %66 : vector<1x1x33x15xf32> to vector<33x15xf32>
    %68 = vector.shape_cast %58 : vector<33x15xf32> to vector<1x1x33x15xf32>
    tpu.vector_store %arg7[%c0_48, %c2_49, %c0_50, %c0_51], %68 {strides = array<i32>} : memref<1x4x33x15xf32, #tpu.memory_space<vmem>>, vector<1x1x33x15xf32>,
    %c0_52 = arith.constant 0 : index
    %c2_53 = arith.constant 2 : index
    %c0_54 = arith.constant 0 : index
    %c0_55 = arith.constant 0 : index
    %69 = vector.load %arg8[%c0_52, %c2_53, %c0_54, %c0_55] : memref<1x4x33x15xf32, #tpu.memory_space<vmem>>, vector<1x1x33x15xf32>
    %70 = vector.shape_cast %69 : vector<1x1x33x15xf32> to vector<33x15xf32>
    %71 = vector.shape_cast %59 : vector<33x15xf32> to vector<1x1x33x15xf32>
    tpu.vector_store %arg8[%c0_52, %c2_53, %c0_54, %c0_55], %71 {strides = array<i32>} : memref<1x4x33x15xf32, #tpu.memory_space<vmem>>, vector<1x1x33x15xf32>,
    %72 = math.sqrt %62 : vector<33x15xf32>
    %c0_56 = arith.constant 0 : index
    %c2_57 = arith.constant 2 : index
    %c0_58 = arith.constant 0 : index
    %c0_59 = arith.constant 0 : index
    %73 = vector.load %arg5[%c0_56, %c2_57, %c0_58, %c0_59] : memref<1x4x33x15xf32, #tpu.memory_space<vmem>>, vector<1x1x33x15xf32>
    %74 = vector.shape_cast %73 : vector<1x1x33x15xf32> to vector<33x15xf32>
    %75 = vector.shape_cast %72 : vector<33x15xf32> to vector<1x1x33x15xf32>
    tpu.vector_store %arg5[%c0_56, %c2_57, %c0_58, %c0_59], %75 {strides = array<i32>} : memref<1x4x33x15xf32, #tpu.memory_space<vmem>>, vector<1x1x33x15xf32>,
    %76 = math.atan2 %59, %58 : vector<33x15xf32>
    %c0_60 = arith.constant 0 : index
    %c2_61 = arith.constant 2 : index
    %c0_62 = arith.constant 0 : index
    %c0_63 = arith.constant 0 : index
    %77 = vector.load %arg6[%c0_60, %c2_61, %c0_62, %c0_63] : memref<1x4x33x15xf32, #tpu.memory_space<vmem>>, vector<1x1x33x15xf32>
    %78 = vector.shape_cast %77 : vector<1x1x33x15xf32> to vector<33x15xf32>
    %79 = vector.shape_cast %76 : vector<33x15xf32> to vector<1x1x33x15xf32>
    tpu.vector_store %arg6[%c0_60, %c2_61, %c0_62, %c0_63], %79 {strides = array<i32>} : memref<1x4x33x15xf32, #tpu.memory_space<vmem>>, vector<1x1x33x15xf32>,
    %80 = arith.mulf %58, %65 : vector<33x15xf32>
    %81 = arith.mulf %59, %65 : vector<33x15xf32>
    %c0_64 = arith.constant 0 : index
    %c3 = arith.constant 3 : index
    %c0_65 = arith.constant 0 : index
    %c0_66 = arith.constant 0 : index
    %82 = vector.load %arg2[%c0_64, %c3, %c0_65, %c0_66] : memref<1x4x64x15xf32, #tpu.memory_space<vmem>>, vector<1x1x64x15xf32>
    %83 = vector.shape_cast %82 : vector<1x1x64x15xf32> to vector<64x15xf32>
    %cst_67 = arith.constant dense<0.000000e+00> : vector<80x15xf32>
    %84 = tpu.matmul %0, %83, %cst_67 {dimension_numbers = #tpu.dot_dimension_numbers<[1], [0], [0], [1], [0, 0, 1, 1], [], []>} : vector<80x64xf32>, vector<64x15xf32>, vector<80x15xf32> -> vector<80x15xf32>
    %85 = vector.extract_strided_slice %84 {offsets = [0, 0], sizes = [33, 15], strides = [1, 1]} : vector<80x15xf32> to vector<33x15xf32>
    %86 = vector.extract_strided_slice %84 {offsets = [40, 0], sizes = [33, 15], strides = [1, 1]} : vector<80x15xf32> to vector<33x15xf32>
    %87 = arith.mulf %85, %85 : vector<33x15xf32>
    %88 = arith.mulf %86, %86 : vector<33x15xf32>
    %89 = arith.addf %87, %88 : vector<33x15xf32>
    %cst_68 = arith.constant 9.99999993E-9 : f32
    %90 = vector.broadcast %cst_68 : f32 to vector<33x15xf32>
    %91 = arith.addf %89, %90 : vector<33x15xf32>
    %92 = math.rsqrt %91 : vector<33x15xf32>
    %c0_69 = arith.constant 0 : index
    %c3_70 = arith.constant 3 : index
    %c0_71 = arith.constant 0 : index
    %c0_72 = arith.constant 0 : index
    %93 = vector.load %arg7[%c0_69, %c3_70, %c0_71, %c0_72] : memref<1x4x33x15xf32, #tpu.memory_space<vmem>>, vector<1x1x33x15xf32>
    %94 = vector.shape_cast %93 : vector<1x1x33x15xf32> to vector<33x15xf32>
    %95 = vector.shape_cast %85 : vector<33x15xf32> to vector<1x1x33x15xf32>
    tpu.vector_store %arg7[%c0_69, %c3_70, %c0_71, %c0_72], %95 {strides = array<i32>} : memref<1x4x33x15xf32, #tpu.memory_space<vmem>>, vector<1x1x33x15xf32>,
    %c0_73 = arith.constant 0 : index
    %c3_74 = arith.constant 3 : index
    %c0_75 = arith.constant 0 : index
    %c0_76 = arith.constant 0 : index
    %96 = vector.load %arg8[%c0_73, %c3_74, %c0_75, %c0_76] : memref<1x4x33x15xf32, #tpu.memory_space<vmem>>, vector<1x1x33x15xf32>
    %97 = vector.shape_cast %96 : vector<1x1x33x15xf32> to vector<33x15xf32>
    %98 = vector.shape_cast %86 : vector<33x15xf32> to vector<1x1x33x15xf32>
    tpu.vector_store %arg8[%c0_73, %c3_74, %c0_75, %c0_76], %98 {strides = array<i32>} : memref<1x4x33x15xf32, #tpu.memory_space<vmem>>, vector<1x1x33x15xf32>,
    %99 = math.sqrt %89 : vector<33x15xf32>
    %c0_77 = arith.constant 0 : index
    %c3_78 = arith.constant 3 : index
    %c0_79 = arith.constant 0 : index
    %c0_80 = arith.constant 0 : index
    %100 = vector.load %arg5[%c0_77, %c3_78, %c0_79, %c0_80] : memref<1x4x33x15xf32, #tpu.memory_space<vmem>>, vector<1x1x33x15xf32>
    %101 = vector.shape_cast %100 : vector<1x1x33x15xf32> to vector<33x15xf32>
    %102 = vector.shape_cast %99 : vector<33x15xf32> to vector<1x1x33x15xf32>
    tpu.vector_store %arg5[%c0_77, %c3_78, %c0_79, %c0_80], %102 {strides = array<i32>} : memref<1x4x33x15xf32, #tpu.memory_space<vmem>>, vector<1x1x33x15xf32>,
    %103 = math.atan2 %86, %85 : vector<33x15xf32>
    %c0_81 = arith.constant 0 : index
    %c3_82 = arith.constant 3 : index
    %c0_83 = arith.constant 0 : index
    %c0_84 = arith.constant 0 : index
    %104 = vector.load %arg6[%c0_81, %c3_82, %c0_83, %c0_84] : memref<1x4x33x15xf32, #tpu.memory_space<vmem>>, vector<1x1x33x15xf32>
    %105 = vector.shape_cast %104 : vector<1x1x33x15xf32> to vector<33x15xf32>
    %106 = vector.shape_cast %103 : vector<33x15xf32> to vector<1x1x33x15xf32>
    tpu.vector_store %arg6[%c0_81, %c3_82, %c0_83, %c0_84], %106 {strides = array<i32>} : memref<1x4x33x15xf32, #tpu.memory_space<vmem>>, vector<1x1x33x15xf32>,
    %107 = arith.mulf %85, %92 : vector<33x15xf32>
    %108 = arith.mulf %86, %92 : vector<33x15xf32>
    %cst_85 = arith.constant 9.99999993E-9 : f32
    %109 = vector.broadcast %cst_85 : f32 to vector<33x15xf32>
    %110 = arith.addf %8, %109 : vector<33x15xf32>
    %111 = math.log %110 : vector<33x15xf32>
    %c0_86 = arith.constant 0 : index
    %c0_87 = arith.constant 0 : index
    %c0_88 = arith.constant 0 : index
    %c0_89 = arith.constant 0 : index
    %112 = vector.load %arg4[%c0_86, %c0_87, %c0_88, %c0_89] : memref<1x7x33x15xf32, #tpu.memory_space<vmem>>, vector<1x1x33x15xf32>
    %113 = vector.shape_cast %112 : vector<1x1x33x15xf32> to vector<33x15xf32>
    %114 = vector.shape_cast %111 : vector<33x15xf32> to vector<1x1x33x15xf32>
    tpu.vector_store %arg4[%c0_86, %c0_87, %c0_88, %c0_89], %114 {strides = array<i32>} : memref<1x7x33x15xf32, #tpu.memory_space<vmem>>, vector<1x1x33x15xf32>,
    %115 = arith.mulf %26, %53 : vector<33x15xf32>
    %116 = arith.mulf %27, %54 : vector<33x15xf32>
    %117 = arith.addf %115, %116 : vector<33x15xf32>
    %c0_90 = arith.constant 0 : index
    %c1_91 = arith.constant 1 : index
    %c0_92 = arith.constant 0 : index
    %c0_93 = arith.constant 0 : index
    %118 = vector.load %arg4[%c0_90, %c1_91, %c0_92, %c0_93] : memref<1x7x33x15xf32, #tpu.memory_space<vmem>>, vector<1x1x33x15xf32>
    %119 = vector.shape_cast %118 : vector<1x1x33x15xf32> to vector<33x15xf32>
    %120 = vector.shape_cast %117 : vector<33x15xf32> to vector<1x1x33x15xf32>
    tpu.vector_store %arg4[%c0_90, %c1_91, %c0_92, %c0_93], %120 {strides = array<i32>} : memref<1x7x33x15xf32, #tpu.memory_space<vmem>>, vector<1x1x33x15xf32>,
    %121 = arith.mulf %26, %80 : vector<33x15xf32>
    %122 = arith.mulf %27, %81 : vector<33x15xf32>
    %123 = arith.addf %121, %122 : vector<33x15xf32>
    %c0_94 = arith.constant 0 : index
    %c2_95 = arith.constant 2 : index
    %c0_96 = arith.constant 0 : index
    %c0_97 = arith.constant 0 : index
    %124 = vector.load %arg4[%c0_94, %c2_95, %c0_96, %c0_97] : memref<1x7x33x15xf32, #tpu.memory_space<vmem>>, vector<1x1x33x15xf32>
    %125 = vector.shape_cast %124 : vector<1x1x33x15xf32> to vector<33x15xf32>
    %126 = vector.shape_cast %123 : vector<33x15xf32> to vector<1x1x33x15xf32>
    tpu.vector_store %arg4[%c0_94, %c2_95, %c0_96, %c0_97], %126 {strides = array<i32>} : memref<1x7x33x15xf32, #tpu.memory_space<vmem>>, vector<1x1x33x15xf32>,
    %127 = arith.mulf %26, %107 : vector<33x15xf32>
    %128 = arith.mulf %27, %108 : vector<33x15xf32>
    %129 = arith.addf %127, %128 : vector<33x15xf32>
    %c0_98 = arith.constant 0 : index
    %c3_99 = arith.constant 3 : index
    %c0_100 = arith.constant 0 : index
    %c0_101 = arith.constant 0 : index
    %130 = vector.load %arg4[%c0_98, %c3_99, %c0_100, %c0_101] : memref<1x7x33x15xf32, #tpu.memory_space<vmem>>, vector<1x1x33x15xf32>
    %131 = vector.shape_cast %130 : vector<1x1x33x15xf32> to vector<33x15xf32>
    %132 = vector.shape_cast %129 : vector<33x15xf32> to vector<1x1x33x15xf32>
    tpu.vector_store %arg4[%c0_98, %c3_99, %c0_100, %c0_101], %132 {strides = array<i32>} : memref<1x7x33x15xf32, #tpu.memory_space<vmem>>, vector<1x1x33x15xf32>,
    %133 = arith.mulf %53, %80 : vector<33x15xf32>
    %134 = arith.mulf %54, %81 : vector<33x15xf32>
    %135 = arith.addf %133, %134 : vector<33x15xf32>
    %c0_102 = arith.constant 0 : index
    %c4 = arith.constant 4 : index
    %c0_103 = arith.constant 0 : index
    %c0_104 = arith.constant 0 : index
    %136 = vector.load %arg4[%c0_102, %c4, %c0_103, %c0_104] : memref<1x7x33x15xf32, #tpu.memory_space<vmem>>, vector<1x1x33x15xf32>
    %137 = vector.shape_cast %136 : vector<1x1x33x15xf32> to vector<33x15xf32>
    %138 = vector.shape_cast %135 : vector<33x15xf32> to vector<1x1x33x15xf32>
    tpu.vector_store %arg4[%c0_102, %c4, %c0_103, %c0_104], %138 {strides = array<i32>} : memref<1x7x33x15xf32, #tpu.memory_space<vmem>>, vector<1x1x33x15xf32>,
    %139 = arith.mulf %53, %107 : vector<33x15xf32>
    %140 = arith.mulf %54, %108 : vector<33x15xf32>
    %141 = arith.addf %139, %140 : vector<33x15xf32>
    %c0_105 = arith.constant 0 : index
    %c5 = arith.constant 5 : index
    %c0_106 = arith.constant 0 : index
    %c0_107 = arith.constant 0 : index
    %142 = vector.load %arg4[%c0_105, %c5, %c0_106, %c0_107] : memref<1x7x33x15xf32, #tpu.memory_space<vmem>>, vector<1x1x33x15xf32>
    %143 = vector.shape_cast %142 : vector<1x1x33x15xf32> to vector<33x15xf32>
    %144 = vector.shape_cast %141 : vector<33x15xf32> to vector<1x1x33x15xf32>
    tpu.vector_store %arg4[%c0_105, %c5, %c0_106, %c0_107], %144 {strides = array<i32>} : memref<1x7x33x15xf32, #tpu.memory_space<vmem>>, vector<1x1x33x15xf32>,
    %145 = arith.mulf %80, %107 : vector<33x15xf32>
    %146 = arith.mulf %81, %108 : vector<33x15xf32>
    %147 = arith.addf %145, %146 : vector<33x15xf32>
    %c0_108 = arith.constant 0 : index
    %c6 = arith.constant 6 : index
    %c0_109 = arith.constant 0 : index
    %c0_110 = arith.constant 0 : index
    %148 = vector.load %arg4[%c0_108, %c6, %c0_109, %c0_110] : memref<1x7x33x15xf32, #tpu.memory_space<vmem>>, vector<1x1x33x15xf32>
    %149 = vector.shape_cast %148 : vector<1x1x33x15xf32> to vector<33x15xf32>
    %150 = vector.shape_cast %147 : vector<33x15xf32> to vector<1x1x33x15xf32>
    tpu.vector_store %arg4[%c0_108, %c6, %c0_109, %c0_110], %150 {strides = array<i32>} : memref<1x7x33x15xf32, #tpu.memory_space<vmem>>, vector<1x1x33x15xf32>,
    return
  }
  func.func @transform_0(%arg0: i32, %arg1: i32) -> (i32, i32, i32, i32) {
    %c0_i32 = arith.constant 0 : i32
    %c0_i32_0 = arith.constant 0 : i32
    %c0_i32_1 = arith.constant 0 : i32
    return %arg0, %c0_i32, %c0_i32_0, %arg1 : i32, i32, i32, i32
  }
  func.func @transform_1(%arg0: i32, %arg1: i32) -> (i32, i32) {
    %c0_i32 = arith.constant 0 : i32
    %c0_i32_0 = arith.constant 0 : i32
    %c0_i32_1 = arith.constant 0 : i32
    return %c0_i32, %c0_i32_0 : i32, i32
  }
  func.func @transform_2(%arg0: i32, %arg1: i32) -> (i32, i32, i32, i32) {
    %c0_i32 = arith.constant 0 : i32
    %c0_i32_0 = arith.constant 0 : i32
    %c0_i32_1 = arith.constant 0 : i32
    return %arg0, %c0_i32, %c0_i32_0, %arg1 : i32, i32, i32, i32
  }
  func.func @transform_3(%arg0: i32, %arg1: i32) -> (i32, i32, i32, i32) {
    %c0_i32 = arith.constant 0 : i32
    %c0_i32_0 = arith.constant 0 : i32
    %c0_i32_1 = arith.constant 0 : i32
    return %arg0, %c0_i32, %c0_i32_0, %arg1 : i32, i32, i32, i32
  }
  func.func @transform_4(%arg0: i32, %arg1: i32) -> (i32, i32, i32, i32) {
    %c0_i32 = arith.constant 0 : i32
    %c0_i32_0 = arith.constant 0 : i32
    %c0_i32_1 = arith.constant 0 : i32
    return %arg0, %c0_i32, %c0_i32_0, %arg1 : i32, i32, i32, i32
  }
  func.func @transform_5(%arg0: i32, %arg1: i32) -> (i32, i32, i32, i32) {
    %c0_i32 = arith.constant 0 : i32
    %c0_i32_0 = arith.constant 0 : i32
    %c0_i32_1 = arith.constant 0 : i32
    return %arg0, %c0_i32, %c0_i32_0, %arg1 : i32, i32, i32, i32
  }
  func.func @transform_6(%arg0: i32, %arg1: i32) -> (i32, i32, i32, i32) {
    %c0_i32 = arith.constant 0 : i32
    %c0_i32_0 = arith.constant 0 : i32
    %c0_i32_1 = arith.constant 0 : i32
    return %arg0, %c0_i32, %c0_i32_0, %arg1 : i32, i32, i32, i32
  }
}

</mosaic_0001>

<bundles_post_ra>
// kernel: channel_directional_features.1
= control target key start
LH: loop header
LB: loop body
LE: loop exit
PB: predicated region body
PF: predicated region fallthrough
CT: control target
= control target key end

     0   :  { %s3274_s21 = smov 0   ;;  %s3276_s22 = smov 0   ;;  %s5779_s0 = inlined_call_operand.vmem [shape: f32[2,4,64,15], index: 0, kind: input, shape index: {}]   ;;  %s5780_s1 = inlined_call_operand.vmem [shape: f32[80,64], index: 1, kind: input, shape index: {}]   ;;  %s5781_s2 = inlined_call_operand.vmem [shape: f32[2,7,33,15], index: 2, kind: output, shape index: {0}]   ;;  %s5782_s3 = inlined_call_operand.vmem [shape: f32[2,4,33,15], index: 3, kind: output, shape index: {1}]   ;;  %s5783_s4 = inlined_call_operand.vmem [shape: f32[2,4,33,15], index: 4, kind: output, shape index: {2}]   ;;  %s5784_s5 = inlined_call_operand.vmem [shape: f32[2,4,33,15], index: 5, kind: output, shape index: {3}]   ;;  %s5785_s6 = inlined_call_operand.vmem [shape: f32[2,4,33,15], index: 6, kind: output, shape index: {4}]  }
   0x1   :  { %s3278_s23 = smov 0  }
   0x2 LB: > { %s29_s24 = sadd.s32 1, %s3231_s22  ;;  %p2630_p0 = scmp.ge.s32.totalorder %s3235_s23, 1  ;;  %s3235_s23 = sphi %s3278_s23, %s17_s23   ;;  %s3231_s22 = sphi %s3276_s22, %s6266_s22   ;;  %s3227_s21 = sphi %s3274_s21, %s6265_s21  }
   0x3   : > { %p31_p1 = scmp.ge.s32.totalorder %s29_s24, 2  ;;  %p248_p2 = scmp.lt.s32.totalorder %s3235_s23, 3 }
   0x5   : > { %s6268_s24 = smov (%p31_p1, %s29_s24), 0  ;;  %p249_p3 = pnand %p2630_p0, %p248_p2 }
   0x7   : > { %252 = sbr.rel (%p249_p3) target bundleno = 621 (0x26d), region = 28 }
   0xe   : > { %p316_p4 = scmp.lt.s32.totalorder %s3227_s21, 1  ;;  %v3295_v0 = vld [vmem:[%s5780_s1] sm:$0xff]  ;;  %vm382_vm0 = vcmask 523264   ;;  %v3334_v33 = vld [vmem:[%s5780_s1 + $0x8] sm:$0xff]  ;;  %v366_v36 = vld [vmem:[%s5780_s1 + $0x10] sm:$0xff]  ;;  %vm5858_vm1 = vcmask 121856  }
   0xf   : > { %2883 = vmatprep.mubr.msk.f32.mxu0 %vm382_vm0, %v3295_v0  ;;  %2914 = vmatprep.mubr.msk.f32.mxu1 %vm382_vm0, %v3295_v0  ;;  %v367_v41 = vld [vmem:[%s5780_s1 + $0x18] sm:$0xff]  ;;  %v368_v44 = vld [vmem:[%s5780_s1 + $0x20] sm:$0xff]  ;;  %v369_v49 = vld [vmem:[%s5780_s1 + $0x28] sm:$0xff]  ;;  %vm5838_vm4 = vcmask 114688  }
  0x10   : > { %s6270_s21 = smov (!%p316_p4, %s3227_s21), 1  ;;  %v370_v52 = vld [vmem:[%s5780_s1 + $0x30] sm:$0xff]  ;;  %v371_v55 = vld [vmem:[%s5780_s1 + $0x38] sm:$0xff]  ;;  %v372_v56 = vld [vmem:[%s5780_s1 + $0x40] sm:$0xff] }
  0x11   : > { %s2794_s27 = sshll.u32 %s6270_s21, 8  ;;  %v373_v57 = vld [vmem:[%s5780_s1 + $0x48] sm:$0xff]  ;;  %s3415_s29 = smul.u32 160, %s6270_s21 }
  0x12   : > { %s3307_s30 = scalar_lea.vmem %s5779_s0, %s2794_s27  ;;  %s3055_s12 = smul.u32 280, %s6270_s21 }
  0x13   : > { %v374_v1 = vld [vmem:[%s3307_s30] sm:$0xff]  ;;  %v375_v2 = vld [vmem:[%s3307_s30 + $0x8] sm:$0xff]  ;;  %v376_v6 = vld [vmem:[%s3307_s30 + $0x10] sm:$0xff]  ;;  %s3421_s8 = scalar_lea.vmem %s5784_s5, %s3415_s29  ;;  %s3461_s11 = scalar_lea.vmem %s5785_s6, %s3415_s29 }
  0x14   : > { %v2648_v3 = vld [vmem:[%s3307_s30 + $0x40] sm:$0xff]  ;;  %v2991_v4 = vpack.c.bf16 %v375_v2, %v374_v1  ;;  %v2649_v5 = vld [vmem:[%s3307_s30 + $0x48] sm:$0xff]  ;;  %v377_v7 = vld [vmem:[%s3307_s30 + $0x18] sm:$0xff]  ;;  %s3781_s15 = scalar_lea.vmem %s5782_s3, %s3415_s29  ;;  %s3802_s18 = scalar_lea.vmem %s5781_s2, %s3055_s12 }
  0x15   : > { %v3007_v8 = vpack.c.bf16 %v2649_v5, %v2648_v3  ;;  %v2995_v9 = vpack.c.bf16 %v377_v7, %v376_v6  ;;  %v2650_v10 = vld [vmem:[%s3307_s30 + $0x50] sm:$0xff]  ;;  %v2651_v11 = vld [vmem:[%s3307_s30 + $0x58] sm:$0xff]  ;;  %v378_v12 = vld [vmem:[%s3307_s30 + $0x20] sm:$0xff]  ;;  %v5793_v7 = vmov 0.0   ;;  %s4178_s20 = scalar_lea.vmem %s5783_s4, %s3415_s29 }
  0x16   : > { %2992 = vmatprep.subr.bf16.mxu0 %v2991_v4  ;;  %v3011_v13 = vpack.c.bf16 %v2651_v11, %v2650_v10  ;;  %v379_v14 = vld [vmem:[%s3307_s30 + $0x28] sm:$0xff]  ;;  %v2652_v15 = vld [vmem:[%s3307_s30 + $0x60] sm:$0xff]  ;;  %v380_v19 = vld [vmem:[%s3307_s30 + $0x30] sm:$0xff] }
  0x17   : > { %v2653_v16 = vld [vmem:[%s3307_s30 + $0x68] sm:$0xff]  ;;  %3008 = vmatprep.subr.bf16.mxu1 %v3007_v8  ;;  %2994 = vmatpush3.bf16.msra.mxu0 %v2991_v4  ;;  %v2999_v17 = vpack.c.bf16 %v379_v14, %v378_v12  ;;  %v381_v20 = vld [vmem:[%s3307_s30 + $0x38] sm:$0xff]  ;;  %v2654_v21 = vld [vmem:[%s3307_s30 + $0x70] sm:$0xff] }
  0x18   : > { %3010 = vmatpush3.bf16.msra.mxu1 %v3007_v8  ;;  %2996 = vmatprep.subr.bf16.mxu0 %v2995_v9  ;;  %v3015_v18 = vpack.c.bf16 %v2653_v16, %v2652_v15  ;;  %v2655_v22 = vld [vmem:[%s3307_s30 + $0x78] sm:$0xff]  ;;  %v3003_v23 = vpack.c.bf16 %v381_v20, %v380_v19  ;;  %v2686_v25 = vld [vmem:[%s3307_s30 + $0x80] sm:$0xff]  ;;  %v2687_v26 = vld [vmem:[%s3307_s30 + $0x88] sm:$0xff] }
  0x19   : > { %3012 = vmatprep.subr.bf16.mxu1 %v3011_v13  ;;  %v3019_v24 = vpack.c.bf16 %v2655_v22, %v2654_v21  ;;  %v2724_v27 = vld [vmem:[%s3307_s30 + $0xc0] sm:$0xff]  ;;  %v2725_v28 = vld [vmem:[%s3307_s30 + $0xc8] sm:$0xff]  ;;  %v3023_v29 = vpack.c.bf16 %v2687_v26, %v2686_v25  ;;  %v2688_v31 = vld [vmem:[%s3307_s30 + $0x90] sm:$0xff] }
  0x1a   : > { %v3039_v30 = vpack.c.bf16 %v2725_v28, %v2724_v27  ;;  %v2689_v32 = vld [vmem:[%s3307_s30 + $0x98] sm:$0xff]  ;;  %v2726_v34 = vld [vmem:[%s3307_s30 + $0xd0] sm:$0xff]  ;;  %v2690_v39 = vld [vmem:[%s3307_s30 + $0xa0] sm:$0xff] }
  0x1b   : > { %2998 = vmatpush3.bf16.msra.mxu0 %v2995_v9  ;;  %v2727_v35 = vld [vmem:[%s3307_s30 + $0xd8] sm:$0xff]  ;;  %v3027_v37 = vpack.c.bf16 %v2689_v32, %v2688_v31  ;;  %v2691_v40 = vld [vmem:[%s3307_s30 + $0xa8] sm:$0xff]  ;;  %v2728_v42 = vld [vmem:[%s3307_s30 + $0xe0] sm:$0xff]  ;;  %v5795_v9 = vmov 0.7853982  }
  0x1c   : > { %3014 = vmatpush3.bf16.msra.mxu1 %v3011_v13  ;;  %3000 = vmatprep.subr.bf16.mxu0 %v2999_v17  ;;  %v3043_v38 = vpack.c.bf16 %v2727_v35, %v2726_v34  ;;  %v2729_v43 = vld [vmem:[%s3307_s30 + $0xe8] sm:$0xff]  ;;  %v3031_v45 = vpack.c.bf16 %v2691_v40, %v2690_v39  ;;  %v2692_v47 = vld [vmem:[%s3307_s30 + $0xb0] sm:$0xff]  ;;  %v2693_v48 = vld [vmem:[%s3307_s30 + $0xb8] sm:$0xff] }
  0x1d   : > { %3016 = vmatprep.subr.bf16.mxu1 %v3015_v18  ;;  %v3047_v46 = vpack.c.bf16 %v2729_v43, %v2728_v42  ;;  %v2730_v50 = vld [vmem:[%s3307_s30 + $0xf0] sm:$0xff]  ;;  %v2731_v51 = vld [vmem:[%s3307_s30 + $0xf8] sm:$0xff]  ;;  %v3035_v53 = vpack.c.bf16 %v2693_v48, %v2692_v47 }
  0x1e   : > { %v3051_v54 = vpack.c.bf16 %v2731_v51, %v2730_v50 }
  0x1f   : > { %3002 = vmatpush3.bf16.msra.mxu0 %v2999_v17 }
  0x20   : > { %3018 = vmatpush3.bf16.msra.mxu1 %v3015_v18  ;;  %3004 = vmatprep.subr.bf16.mxu0 %v3003_v23 }
  0x21   : > { %3020 = vmatprep.subr.bf16.mxu1 %v3019_v24 }
  0x23   : > { %3006 = vmatpush3.bf16.msra.mxu0 %v3003_v23 }
  0x24   : > { %3022 = vmatpush3.bf16.msra.mxu1 %v3019_v24  ;;  %3024 = vmatprep.subr.bf16.mxu0 %v3023_v29 }
  0x25   : > { %3040 = vmatprep.subr.bf16.mxu1 %v3039_v30 }
  0x26   : > { %2884 = vmatmul.mubr.msk.f32.vlgmr.msra.gmra.mrb[0].mxu0 %vm382_vm0, %v3334_v33 }
  0x27   : > { %2915 = vmatmul.mubr.msk.f32.vlgmr.msra.gmra.mrb[0].mxu1 %vm382_vm0, %v3334_v33  ;;  %3026 = vmatpush3.bf16.msra.mxu0 %v3023_v29 }
  0x28   : > { %3042 = vmatpush3.bf16.msra.mxu1 %v3039_v30  ;;  %2886 = vmatprep.mubr.msk.f32.mxu0 %vm382_vm0, %v366_v36 }
  0x29   : > { %2917 = vmatprep.mubr.msk.f32.mxu1 %vm382_vm0, %v366_v36  ;;  %3028 = vmatprep.subr.bf16.mxu0 %v3027_v37 }
  0x2a   : > { %2887 = vmatmul.mubr.msk.f32.gmra.mrb[2].mxu0 %vm382_vm0, %v367_v41  ;;  %3044 = vmatprep.subr.bf16.mxu1 %v3043_v38 }
  0x2b   : > { %2918 = vmatmul.mubr.msk.f32.gmra.mrb[2].mxu1 %vm382_vm0, %v367_v41  ;;  %3030 = vmatpush3.bf16.msra.mxu0 %v3027_v37 }
  0x2c   : > { %3046 = vmatpush3.bf16.msra.mxu1 %v3043_v38  ;;  %2889 = vmatprep.mubr.msk.f32.mxu0 %vm382_vm0, %v368_v44 }
  0x2d   : > { %2920 = vmatprep.mubr.msk.f32.mxu1 %vm382_vm0, %v368_v44  ;;  %3032 = vmatprep.subr.bf16.mxu0 %v3031_v45 }
  0x2e   : > { %2890 = vmatmul.mubr.msk.f32.gmra.mrb[4].mxu0 %vm382_vm0, %v369_v49  ;;  %3048 = vmatprep.subr.bf16.mxu1 %v3047_v46 }
  0x2f   : > { %2921 = vmatmul.mubr.msk.f32.gmra.mrb[4].mxu1 %vm382_vm0, %v369_v49  ;;  %2892 = vmatprep.mubr.msk.f32.mxu0 %vm382_vm0, %v370_v52 }
  0x30   : > { %2923 = vmatprep.mubr.msk.f32.mxu1 %vm382_vm0, %v370_v52  ;;  %3034 = vmatpush3.bf16.msra.mxu0 %v3031_v45 }
  0x31   : > { %3050 = vmatpush3.bf16.msra.mxu1 %v3047_v46  ;;  %3036 = vmatprep.subr.bf16.mxu0 %v3035_v53 }
  0x32   : > { %2893 = vmatmul.mubr.msk.f32.gmra.mrb[6].mxu0 %vm382_vm0, %v371_v55  ;;  %3052 = vmatprep.subr.bf16.mxu1 %v3051_v54 }
  0x33   : > { %2924 = vmatmul.mubr.msk.f32.gmra.mrb[6].mxu1 %vm382_vm0, %v371_v55  ;;  %2895 = vmatprep.mubr.msk.f32.mxu0 %vm382_vm0, %v372_v56 }
  0x34   : > { %2926 = vmatprep.mubr.msk.f32.mxu1 %vm382_vm0, %v372_v56  ;;  %3038 = vmatpush3.bf16.msra.mxu0 %v3035_v53 }
  0x35   : > { %3054 = vmatpush3.bf16.msra.mxu1 %v3051_v54 }
  0x36   : > { %2896 = vmatmul.mubr.msk.f32.gmra.mrb[8].mxu0 %vm382_vm0, %v373_v57 }
  0x37   : > { %2927 = vmatmul.mubr.msk.f32.gmra.mrb[8].mxu1 %vm382_vm0, %v373_v57  ;;  %2945 = vmatprep.mubr.msk.f32.mxu0 %vm382_vm0, %v3295_v0 }
  0x38   : > { %2976 = vmatprep.mubr.msk.f32.mxu1 %vm382_vm0, %v3295_v0 }
  0x3a   : > { %2946 = vmatmul.mubr.msk.f32.vlgmr.msra.gmra.mrb[10].mxu0 %vm382_vm0, %v3334_v33 }
  0x3b   : > { %2977 = vmatmul.mubr.msk.f32.vlgmr.msra.gmra.mrb[10].mxu1 %vm382_vm0, %v3334_v33  ;;  %2948 = vmatprep.mubr.msk.f32.mxu0 %vm382_vm0, %v366_v36 }
  0x3c   : > { %2979 = vmatprep.mubr.msk.f32.mxu1 %vm382_vm0, %v366_v36 }
  0x3e   : > { %2949 = vmatmul.mubr.msk.f32.gmra.mrb[12].mxu0 %vm382_vm0, %v367_v41 }
  0x3f   : > { %2980 = vmatmul.mubr.msk.f32.gmra.mrb[12].mxu1 %vm382_vm0, %v367_v41  ;;  %2951 = vmatprep.mubr.msk.f32.mxu0 %vm382_vm0, %v368_v44 }
  0x40   : > { %2982 = vmatprep.mubr.msk.f32.mxu1 %vm382_vm0, %v368_v44 }
  0x42   : > { %2952 = vmatmul.mubr.msk.f32.gmra.mrb[14].mxu0 %vm382_vm0, %v369_v49 }
  0x43   : > { %2983 = vmatmul.mubr.msk.f32.gmra.mrb[14].mxu1 %vm382_vm0, %v369_v49  ;;  %2954 = vmatprep.mubr.msk.f32.mxu0 %vm382_vm0, %v370_v52 }
  0x44   : > { %2985 = vmatprep.mubr.msk.f32.mxu1 %vm382_vm0, %v370_v52 }
  0x46   : > { %2955 = vmatmul.mubr.msk.f32.gmra.mrb[16].mxu0 %vm382_vm0, %v371_v55 }
  0x47   : > { %2986 = vmatmul.mubr.msk.f32.gmra.mrb[16].mxu1 %vm382_vm0, %v371_v55  ;;  %2957 = vmatprep.mubr.msk.f32.mxu0 %vm382_vm0, %v372_v56 }
  0x48   : > { %2988 = vmatprep.mubr.msk.f32.mxu1 %vm382_vm0, %v372_v56 }
  0x4a   : > { %2958 = vmatmul.mubr.msk.f32.gmra.mrb[18].mxu0 %vm382_vm0, %v373_v57 }
  0x4b   : > { %2989 = vmatmul.mubr.msk.f32.gmra.mrb[18].mxu1 %vm382_vm0, %v373_v57 }
  0xf9   : > { %v3423_v58 = vpop.f32.mrb[0].mxu0 }
  0xfa   : > { %555 = vst.msk [vmem:[%s3421_s8 + $0x8] sm:$0xff] %vm5858_vm1, %v3423_v58  ;;  %v3428_v59 = vpop.f32.mrb[0].mxu1  ;;  %v3430_v60 = vpop.f32.mrb[1].mxu0  ;;  %vm5787_vm2 = vcmp.lt.f32.partialorder %v3423_v58, 0.0  ;;  %vm682_vm3 = vcmp.lt.s32.totalorder %v3423_v58, 0  ;;  %v3506_v11 = vmul.f32 %v3423_v58, %v3423_v58 }
  0xfb   : > { %2667 = vst.msk [vmem:[%s3421_s8 + $0x30] sm:$0xff] %vm5858_vm1, %v3428_v59  ;;  %554 = vst.msk [vmem:[%s3421_s8] sm:$0xff] %vm5858_vm1, %v3430_v60  ;;  %v3438_v61 = vpop.f32.mrb[1].mxu1  ;;  %vm5786_vm5 = vcmp.lt.f32.partialorder %v3428_v59, 0.0  ;;  %vm1134_vm6 = vcmp.lt.s32.totalorder %v3428_v59, 0  ;;  %vm5839_vm7 = vcmp.lt.f32.partialorder %v3430_v60, 0.0  ;;  %v3517_v14 = vmul.f32 %v3428_v59, %v3428_v59 }
  0xfc   : > { %2666 = vst.msk [vmem:[%s3421_s8 + $0x28] sm:$0xff] %vm5858_vm1, %v3438_v61  ;;  %v3488_v6 = vand.u32 2147483647, %v3423_v58  ;;  %v3491_v8 = vsel %vm682_vm3, 3.1415927, %v5793_v7  ;;  %vm635_vm8 = vcmp.lt.s32.totalorder %v3430_v60, 0  ;;  %v528_v18 = vmul.f32 %v3430_v60, %v3430_v60 }
  0xfd   : > { %v3443_v62 = vpop.f32.mrb[2].mxu0  ;;  %5906 = vst [vmem:[#allocation5_spill] sm:$0xff] %v3491_v8  ;;  %v3496_v10 = vsel %vm5787_vm2, 2.3561945, %v5795_v9  ;;  %v3509_v12 = vand.u32 2147483647, %v3428_v59  ;;  %vm639_vm9 = vcmp.ne.f32.partialorder %v3430_v60, %v3430_v60  ;;  %v979_v25 = vmul.f32 %v3438_v61, %v3438_v61 }
  0xfe   : > { %5903 = vst [vmem:[#allocation2_spill] sm:$0xff] %v3443_v62  ;;  %v3445_v63 = vpop.f32.mrb[2].mxu1  ;;  %557 = vst.msk [vmem:[%s3421_s8 + $0x18] sm:$0xff] %vm5858_vm1, %v3443_v62  ;;  %v3453_v0 = vpop.f32.mrb[3].mxu0  ;;  %v3522_v15 = vsel %vm1134_vm6, 3.1415927, %v5793_v7  ;;  %vm1091_vm0 = vcmp.ne.f32.partialorder %v3438_v61, %v3438_v61  ;;  %v3642_v44 = vmul.f32 %v3443_v62, %v3443_v62 }
  0xff   : > { %5904 = vst [vmem:[#allocation3_spill] sm:$0xff] %v3445_v63  ;;  %2669 = vst.msk [vmem:[%s3421_s8 + $0x40] sm:$0xff] %vm5858_vm1, %v3445_v63  ;;  %v3455_v1 = vpop.f32.mrb[3].mxu1  ;;  %v3527_v16 = vsel %vm5786_vm5, 2.3561945, %v5795_v9  ;;  %vm1087_vm13 = vcmp.lt.s32.totalorder %v3438_v61, 0  ;;  %v3697_v55 = vmul.f32 %v3445_v63, %v3445_v63  ;;  %v530_v56 = vmul.f32 %v3453_v0, %v3453_v0 }
 0x100   : > { %5905 = vst [vmem:[#allocation4_spill] sm:$0xff] %v3455_v1  ;;  %556 = vst.msk [vmem:[%s3421_s8 + $0x10] sm:$0xff] %vm5858_vm1, %v3453_v0  ;;  %v3530_v17 = vand.u32 2147483647, %v3430_v60  ;;  %v3549_v23 = vsel %vm635_vm8, 3.1415927, %v5793_v7 }
 0x101   : > { %2668 = vst.msk [vmem:[%s3421_s8 + $0x38] sm:$0xff] %vm5858_vm1, %v3455_v1  ;;  %v3471_v2 = vpop.f32.mrb[4].mxu0  ;;  %5907 = vst [vmem:[#allocation6_spill] sm:$0xff] %v3496_v10  ;;  %v3554_v24 = vsel %vm5839_vm7, 2.3561945, %v5795_v9  ;;  %vm5788_vm6 = vcmp.lt.f32.partialorder %v3438_v61, 0.0 }
 0x102   : > { %v3473_v3 = vpop.f32.mrb[4].mxu1  ;;  %560 = vst.msk [vmem:[%s3461_s11] sm:$0xff] %vm5858_vm1, %v3471_v2  ;;  %v3483_v4 = vpop.f32.mrb[5].mxu0  ;;  %5908 = vst [vmem:[#allocation7_spill] sm:$0xff] %v3522_v15  ;;  %v533_v19 = vmul.f32 %v3471_v2, %v3471_v2  ;;  %v3542_v20 = vand.u32 2147483647, %v3471_v2  ;;  %vm640_vm10 = vcmp.ne.f32.partialorder %v3471_v2, %v3471_v2 }
 0x103   : > { %2671 = vst.msk [vmem:[%s3461_s11 + $0x28] sm:$0xff] %vm5858_vm1, %v3473_v3  ;;  %v3485_v5 = vpop.f32.mrb[5].mxu1  ;;  %5909 = vst [vmem:[#allocation8_spill] sm:$0xff] %v3527_v16  ;;  %vm645_vm14 = vcmp.eq.s32.totalorder %v3530_v17, inf  ;;  %v984_v32 = vmul.f32 %v3473_v3, %v3473_v3  ;;  %v3601_v35 = vand.u32 2147483647, %v3438_v61  ;;  %vm1092_vm8 = vcmp.ne.f32.partialorder %v3473_v3, %v3473_v3 }
 0x104   : > { %559 = vst.msk [vmem:[%s3421_s8 + $0x20] sm:$0x1] %vm5838_vm4, %v3483_v4  ;;  %2670 = vst.msk [vmem:[%s3421_s8 + $0x48] sm:$0x1] %vm5838_vm4, %v3485_v5  ;;  %v3568_v27 = vadd.f32 %v533_v19, %v528_v18  ;;  %v608_v29 = vmax.f32 %v3530_v17, %v3542_v20  ;;  %vm646_vm15 = vcmp.eq.s32.totalorder %v3542_v20, inf  ;;  %vm1181_vm5 = vcmp.lt.s32.totalorder %v3455_v1, 0 }
 0x105   : > { %v3513_v13 = vpop.f32.mrb[6].mxu0  ;;  %vm3579_vm12 = vmor %vm639_vm9, %vm640_vm10  ;;  %v3620_v39 = vadd.f32 %v984_v32, %v979_v25  ;;  %v3623_v40 = vand.u32 2147483647, %v3473_v3  ;;  %v3631_v41 = vsel %vm1087_vm13, 3.1415927, %v5793_v7  ;;  %5919 = vst [vmem:[#allocation14_spill] sm:$0xff] %v3642_v44  ;;  %v3725_v32 = vmul.f32 %v3455_v1, %v3455_v1 }
 0x106   : > { %562 = vst.msk [vmem:[%s3461_s11 + $0x10] sm:$0xff] %vm5858_vm1, %v3513_v13  ;;  %v3544_v21 = vpop.f32.mrb[6].mxu1  ;;  %v3546_v22 = vpop.f32.mrb[7].mxu0  ;;  %v543_v36 = vadd.f32 1e-08, %v3568_v27  ;;  %3083 = vrsqrt.f32 %v3568_v27  ;;  %vm3607_vm3 = vmand %vm645_vm14, %vm646_vm15  ;;  %vm5802_vm9 = vcmp.lt.f32.partialorder %v3453_v0, 0.0  ;;  %v535_v49 = vmul.f32 %v3513_v13, %v3513_v13 }
 0x107   : > { %2673 = vst.msk [vmem:[%s3461_s11 + $0x38] sm:$0xff] %vm5858_vm1, %v3544_v21  ;;  %561 = vst.msk [vmem:[%s3461_s11 + $0x8] sm:$0xff] %vm5858_vm1, %v3546_v22  ;;  %v3566_v26 = vpop.f32.mrb[7].mxu1  ;;  %3085 = vrcp.f32 %v608_v29  ;;  %v3634_v42 = vand.u32 2147483647, %v3443_v62  ;;  %vm729_vm13 = vcmp.lt.s32.totalorder %v3453_v0, 0  ;;  %v1060_v50 = vmax.f32 %v3601_v35, %v3623_v40 }
 0x108   : > { %2672 = vst.msk [vmem:[%s3461_s11 + $0x30] sm:$0xff] %vm5858_vm1, %v3566_v26  ;;  %3087 = vrsqrt.f32 %v543_v36  ;;  %v994_v45 = vadd.f32 1e-08, %v3620_v39  ;;  %vm3649_vm10 = vmor %vm1091_vm0, %vm1092_vm8  ;;  %vm1097_vm15 = vcmp.eq.s32.totalorder %v3601_v35, inf  ;;  %vm1098_vm0 = vcmp.eq.s32.totalorder %v3623_v40, inf }
 0x109   : > { %v3586_v31 = vpop.f32.mrb[8].mxu0  ;;  %5917 = vst [vmem:[#allocation12_spill] sm:$0xff] %v3634_v42  ;;  %3089 = vlog2.f32 %v543_v36  ;;  %v3684_v52 = vsel %vm5788_vm6, 2.3561945, %v5795_v9  ;;  %vm5799_vm8 = vcmp.lt.f32.partialorder %v3455_v1, 0.0  ;;  %vm3688_vm2 = vmand %vm1097_vm15, %vm1098_vm0  ;;  %vm733_vm6 = vcmp.ne.f32.partialorder %v3453_v0, %v3453_v0 }
 0x10a   : > { %564 = vst.msk [vmem:[%s3461_s11 + $0x20] sm:$0x1] %vm5838_vm4, %v3586_v31  ;;  %v3596_v33 = vpop.f32.mrb[8].mxu1  ;;  %v3598_v34 = vpop.f32.mrb[9].mxu0  ;;  %3091 = vrsqrt.f32 %v3620_v39  ;;  %5928 = vst [vmem:[#allocation19_spill] sm:$0xff] %v3697_v55  ;;  %vm569_vm15 = vcmp.eq.f32.partialorder %v3568_v27, 0.0  ;;  %vm1185_vm14 = vcmp.ne.f32.partialorder %v3455_v1, %v3455_v1  ;;  %v986_v42 = vmul.f32 %v3544_v21, %v3544_v21 }
 0x10b   : > { %5912 = vst [vmem:[#allocation9_spill] sm:$0xff] %v3596_v33  ;;  %5913 = vst [vmem:[#allocation10_spill] sm:$0xff] %v3598_v34  ;;  %v3617_v38 = vpop.f32.mrb[9].mxu1  ;;  %3093 = vrsqrt.f32 %v994_v45  ;;  %v3702_v57 = vand.u32 2147483647, %v3453_v0  ;;  %vm1018_vm0 = vcmp.eq.f32.partialorder %v3620_v39, inf  ;;  %vm687_vm7 = vcmp.ne.f32.partialorder %v3546_v22, %v3546_v22 }
 0x10c   : > { %2675 = vst.msk [vmem:[%s3461_s11 + $0x48] sm:$0x1] %vm5838_vm4, %v3596_v33  ;;  %5916 = vst [vmem:[#allocation11_spill] sm:$0xff] %v3617_v38  ;;  %3095 = vrcp.f32 %v1060_v50  ;;  %v3716_v25 = vsel %vm729_vm13, 3.1415927, %v5793_v7  ;;  %vm567_vm13 = vcmp.eq.f32.partialorder %v3568_v27, inf }
 0x10d   : > { %563 = vst.msk [vmem:[%s3461_s11 + $0x18] sm:$0xff] %vm5858_vm1, %v3598_v34  ;;  %2674 = vst.msk [vmem:[%s3461_s11 + $0x40] sm:$0xff] %vm5858_vm1, %v3617_v38  ;;  %v3638_v43 = vpop.f32.mrb[10].mxu0  ;;  %v3721_v29 = vsel %vm5802_vm9, 2.3561945, %v5795_v9  ;;  %vm692_vm11 = vcmp.eq.s32.totalorder %v3488_v6, inf }
 0x10e   : > { %5918 = vst [vmem:[#allocation13_spill] sm:$0xff] %v3638_v43  ;;  %2705 = vst.msk [vmem:[%s3421_s8 + $0x58] sm:$0xff] %vm5858_vm1, %v3638_v43  ;;  %v3656_v47 = vpop.f32.mrb[10].mxu1  ;;  %v3658_v48 = vpop.f32.mrb[11].mxu0  ;;  %v3728_v36 = vand.u32 2147483647, %v3455_v1 }
 0x10f   : > { %5922 = vst [vmem:[#allocation15_spill] sm:$0xff] %v3656_v47  ;;  %5923 = vst [vmem:[#allocation16_spill] sm:$0xff] %v3658_v48  ;;  %v3672_v51 = vpop.f32.mrb[11].mxu1  ;;  %v3739_v45 = vsel %vm1181_vm5, 3.1415927, %v5793_v7  ;;  %vm734_vm5 = vcmp.ne.f32.partialorder %v3513_v13, %v3513_v13 }
 0x110   : > { %2743 = vst.msk [vmem:[%s3421_s8 + $0x80] sm:$0xff] %vm5858_vm1, %v3656_v47  ;;  %2704 = vst.msk [vmem:[%s3421_s8 + $0x50] sm:$0xff] %vm5858_vm1, %v3658_v48  ;;  %v3744_v50 = vsel %vm5799_vm8, 2.3561945, %v5795_v9  ;;  %v3754_v7 = vand.u32 2147483647, %v3513_v13 }
 0x111   : > { %5924 = vst [vmem:[#allocation17_spill] sm:$0xff] %v3672_v51  ;;  %2742 = vst.msk [vmem:[%s3421_s8 + $0x78] sm:$0xff] %vm5858_vm1, %v3672_v51  ;;  %v3692_v54 = vpop.f32.mrb[12].mxu0  ;;  %vm1020_vm8 = vcmp.eq.f32.partialorder %v3620_v39, 0.0  ;;  %v3764_v51 = vadd.f32 %v535_v49, %v530_v56  ;;  %v5938_v49 = vmin.f32 %v3530_v17, %v3542_v20  ;;  %v4221_v53 = vand.u32 2147483647, %v3485_v5 }
 0x112   : > { %5927 = vst [vmem:[#allocation18_spill] sm:$0xff] %v3692_v54  ;;  %2707 = vst.msk [vmem:[%s3421_s8 + $0x68] sm:$0xff] %vm5858_vm1, %v3692_v54  ;;  %v3709_v18 = vpop.f32.mrb[12].mxu1  ;;  %v3711_v19 = vpop.f32.mrb[13].mxu0  ;;  %v702_v43 = vmax.f32 %v3702_v57, %v3754_v7 }
 0x113   : > { %5929 = vst [vmem:[#allocation20_spill] sm:$0xff] %v3709_v18  ;;  %5930 = vst [vmem:[#allocation21_spill] sm:$0xff] %v3711_v19  ;;  %v3749_v28 = vpop.f32.mrb[13].mxu1  ;;  %3097 = vrsqrt.f32 %v3764_v51 }
 0x114   : > { %5931 = vst [vmem:[#allocation22_spill] sm:$0xff] %v3728_v36  ;;  %2745 = vst.msk [vmem:[%s3421_s8 + $0x90] sm:$0xff] %vm5858_vm1, %v3709_v18  ;;  %v3084_v18 = vpop.eup %3083 }
 0x115   : > { %2706 = vst.msk [vmem:[%s3421_s8 + $0x60] sm:$0xff] %vm5858_vm1, %v3711_v19  ;;  %5932 = vst [vmem:[#allocation23_spill] sm:$0xff] %v3739_v45  ;;  %v570_v19 = vand.u32 2147483648, %v3568_v27  ;;  %v3086_v9 = vpop.eup %3085  ;;  %v566_v54 = vmul.f32 %v3084_v18, %v3568_v27  ;;  %v3773_v47 = vpop.f32.mrb[14].mxu0  ;;  %v5958_v45 = vmin.f32 %v3702_v57, %v3754_v7 }
 0x116   : > { %5933 = vst [vmem:[#allocation24_spill] sm:$0xff] %v3744_v50  ;;  %5934 = vst [vmem:[#allocation25_spill] sm:$0xff] %v3749_v28  ;;  %v3786_v56 = vmul.f32 %v3086_v9, %v5938_v49 }
 0x117   : > { %2744 = vst.msk [vmem:[%s3421_s8 + $0x88] sm:$0xff] %vm5858_vm1, %v3749_v28  ;;  %vm3769_vm9 = vmor %vm733_vm6, %vm734_vm5  ;;  %v3088_v28 = vpop.eup %3087  ;;  %v568_v9 = vsel %vm567_vm13, %v3568_v27, %v566_v54  ;;  %vm739_vm13 = vcmp.eq.s32.totalorder %v3702_v57, inf  ;;  %vm686_vm6 = vcmp.ne.f32.partialorder %v3423_v58, %v3423_v58 }
 0x118   : > { %5937 = vst [vmem:[#allocation26_spill] sm:$0xff] %v3773_v47  ;;  %2709 = vst.msk [vmem:[%s3461_s11 + $0x50] sm:$0xff] %vm5858_vm1, %v3773_v47  ;;  %v3090_v16 = vpop.eup %3089  ;;  %v3808_v49 = vmul.f32 %v3088_v28, %v3471_v2  ;;  %v3811_v18 = vmul.f32 %v3088_v28, %v3430_v60  ;;  %v545_v47 = vadd.f32 1e-08, %v3764_v51  ;;  %v571_v55 = vsel %vm569_vm15, %v570_v19, %v568_v9 }
 0x119   : > { %v3092_v15 = vpop.eup %3091  ;;  %v3818_v38 = vmul.f32 %v3786_v56, %v3786_v56  ;;  %v2215_v63 = vmul.f32 0.6931472, %v3090_v16  ;;  %600 = vst.msk [vmem:[%s3781_s15] sm:$0xff] %vm5858_vm1, %v571_v55  ;;  %v1021_v28 = vand.u32 2147483648, %v3620_v39  ;;  %v5943_v55 = vmin.f32 %v3601_v35, %v3623_v40 }
 0x11a   : > { %5939 = vst [vmem:[#allocation27_spill] sm:$0xff] %v3808_v49  ;;  %5940 = vst [vmem:[#allocation28_spill] sm:$0xff] %v3811_v18  ;;  %v3094_v54 = vpop.eup %3093  ;;  %v1017_v10 = vmul.f32 %v3092_v15, %v3620_v39  ;;  %3099 = vrsqrt.f32 %v545_v47  ;;  %vm740_vm15 = vcmp.eq.s32.totalorder %v3754_v7, inf }
 0x11b   : > { %v3096_v27 = vpop.eup %3095  ;;  %v612_v19 = vmul.f32 0.002785687, %v3818_v38  ;;  %2224 = vst.msk [vmem:[%s3802_s18] sm:$0xff] %vm5858_vm1, %v2215_v63  ;;  %v3831_v16 = vmul.f32 %v3094_v54, %v3438_v61  ;;  %v3834_v9 = vmul.f32 %v3094_v54, %v3473_v3  ;;  %3101 = vrcp.f32 %v702_v43  ;;  %vm3852_vm5 = vmand %vm739_vm13, %vm740_vm15 }
 0x11c   : > { %v1019_v15 = vsel %vm1018_vm0, %v3620_v39, %v1017_v10  ;;  %v3843_v44 = vmul.f32 %v3096_v27, %v5943_v55  ;;  %v5944_v10 = vmov 0  ;;  %3103 = vlog2.f32 %v545_v47 }
 0x11d   : > { %5941 = vst [vmem:[#allocation29_spill] sm:$0xff] %v3831_v16  ;;  %5942 = vst [vmem:[#allocation30_spill] sm:$0xff] %v3834_v9  ;;  %v613_v63 = vadd.f32 -0.015866, %v612_v19  ;;  %v1022_v8 = vsel %vm1020_vm8, %v1021_v28, %v1019_v15  ;;  %v2229_v54 = vmul.f32 %v3831_v16, %v3811_v18  ;;  %v2234_v34 = vmul.f32 %v3834_v9, %v3808_v49  ;;  %v3915_v16 = vpop.f32.mrb[15].mxu0 }
 0x11e   : > { %v5945_v10 = vsel %vm3852_vm5, 4294967295, %v5944_v10  ;;  %2676 = vst.msk [vmem:[%s3781_s15 + $0x28] sm:$0xff] %vm5858_vm1, %v1022_v8  ;;  %v3860_v43 = vmul.f32 %v3843_v44, %v3843_v44  ;;  %v3863_v39 = vadd.f32 %v986_v42, %v3725_v32  ;;  %v3866_v28 = vand.u32 2147483647, %v3544_v21  ;;  %v3883_v32 = vpop.f32.mrb[14].mxu1  ;;  %5955 = vst [vmem:[#allocation36_spill] sm:$0xff] %v3915_v16 }
 0x11f   : > { %5946 = vst [vmem:[#allocation31_spill] sm:$0xff] %v5945_v10  ;;  %v614_v27 = vmul.f32 %v613_v63, %v3818_v38  ;;  %v2239_v15 = vadd.f32 %v2234_v34, %v2229_v54  ;;  %vm1186_vm8 = vcmp.ne.f32.partialorder %v3544_v21, %v3544_v21  ;;  %v5948_v42 = vmov 0  ;;  %5951 = vst [vmem:[#allocation34_spill] sm:$0xff] %v3883_v32 }
 0x120   : > { %5947 = vst [vmem:[#allocation32_spill] sm:$0xff] %v3866_v28  ;;  %v1064_v8 = vmul.f32 0.002785687, %v3860_v43  ;;  %v996_v47 = vadd.f32 1e-08, %v3863_v39  ;;  %3105 = vrsqrt.f32 %v3863_v39  ;;  %vm3879_vm0 = vmor %vm1185_vm14, %vm1186_vm8  ;;  %v3889_v63 = vmul.f32 %v3483_v4, %v3483_v4 }
 0x121   : > { %v5949_v42 = vsel %vm3879_vm0, 4294967295, %v5948_v42  ;;  %v615_v34 = vadd.f32 0.04247222, %v614_v27  ;;  %2762 = vst.msk [vmem:[%s3802_s18 + $0x28] sm:$0xff] %vm5858_vm1, %v2239_v15  ;;  %vm581_vm13 = vcmp.eq.f32.partialorder %v3764_v51, inf  ;;  %2747 = vst.msk [vmem:[%s3461_s11 + $0x78] sm:$0xff] %vm5858_vm1, %v3883_v32  ;;  %v1154_v19 = vmax.f32 %v3728_v36, %v3866_v28  ;;  %v3098_v27 = vpop.eup %3097 }
 0x122   : > { %5950 = vst [vmem:[#allocation33_spill] sm:$0xff] %v5949_v42  ;;  %v1065_v55 = vadd.f32 -0.015866, %v1064_v8  ;;  %3107 = vrsqrt.f32 %v996_v47  ;;  %v584_v9 = vand.u32 2147483648, %v3764_v51  ;;  %vm1191_vm15 = vcmp.eq.s32.totalorder %v3728_v36, inf }
 0x123   : > { %v616_v15 = vmul.f32 %v615_v34, %v3818_v38  ;;  %vm1192_vm8 = vcmp.eq.s32.totalorder %v3866_v28, inf  ;;  %v580_v47 = vmul.f32 %v3098_v27, %v3764_v51  ;;  %3109 = vrcp.f32 %v1154_v19  ;;  %2708 = vst.msk [vmem:[%s3421_s8 + $0x70] sm:$0x1] %vm5838_vm4, %v3915_v16  ;;  %v3944_v16 = vpop.f32.mrb[15].mxu1 }
 0x124   : > { %v3100_v54 = vpop.eup %3099  ;;  %v1066_v8 = vmul.f32 %v1065_v55, %v3860_v43  ;;  %vm3909_vm14 = vmand %vm1191_vm15, %vm1192_vm8  ;;  %v5952_v49 = vmov 0  ;;  %v534_v34 = vmul.f32 %v3546_v22, %v3546_v22  ;;  %v3924_v55 = vand.u32 2147483647, %v3546_v22  ;;  %5959 = vst [vmem:[#allocation39_spill] sm:$0xff] %v3944_v16 }
 0x125   : > { %v5953_v49 = vsel %vm3909_vm14, 4294967295, %v5952_v49  ;;  %v617_v18 = vadd.f32 -0.074975304, %v616_v15  ;;  %v3918_v32 = vmul.f32 %v3100_v54, %v3513_v13  ;;  %v3921_v50 = vmul.f32 %v3100_v54, %v3453_v0  ;;  %v3102_v19 = vpop.eup %3101  ;;  %2746 = vst.msk [vmem:[%s3421_s8 + $0x98] sm:$0x1] %vm5838_vm4, %v3944_v16 }
 0x126   : > { %5954 = vst [vmem:[#allocation35_spill] sm:$0xff] %v5953_v49  ;;  %v1067_v27 = vadd.f32 0.04247222, %v1066_v8  ;;  %v582_v15 = vsel %vm581_vm13, %v3764_v51, %v580_v47  ;;  %vm583_vm15 = vcmp.eq.f32.partialorder %v3764_v51, 0.0  ;;  %v3934_v49 = vadd.f32 %v534_v34, %v3506_v11  ;;  %v3104_v33 = vpop.eup %3103 }
 0x127   : > { %5956 = vst [vmem:[#allocation37_spill] sm:$0xff] %v3918_v32  ;;  %5957 = vst [vmem:[#allocation38_spill] sm:$0xff] %v3921_v50  ;;  %v618_v54 = vmul.f32 %v617_v18, %v3818_v38  ;;  %v585_v42 = vsel %vm583_vm15, %v584_v9, %v582_v15  ;;  %v3940_v62 = vmul.f32 %v3102_v19, %v5958_v45  ;;  %vm1032_vm13 = vcmp.eq.f32.partialorder %v3863_v39, inf }
 0x128   : > { %v1068_v47 = vmul.f32 %v1067_v27, %v3860_v43  ;;  %602 = vst.msk [vmem:[%s3781_s15 + $0x10] sm:$0xff] %vm5858_vm1, %v585_v42  ;;  %v544_v11 = vadd.f32 1e-08, %v3934_v49  ;;  %3111 = vrsqrt.f32 %v3934_v49  ;;  %v2219_v18 = vmul.f32 0.6931472, %v3104_v33  ;;  %vm3984_vm15 = vmor %vm686_vm6, %vm687_vm7 }
 0x129   : > { %v619_v51 = vadd.f32 0.1064488, %v618_v54  ;;  %v3957_v45 = vmul.f32 %v3940_v62, %v3940_v62  ;;  %vm1034_vm8 = vcmp.eq.f32.partialorder %v3863_v39, 0.0  ;;  %v1035_v34 = vand.u32 2147483648, %v3863_v39 }
 0x12a   : > { %v3106_v9 = vpop.eup %3105  ;;  %v1069_v42 = vadd.f32 -0.074975304, %v1068_v47  ;;  %3113 = vrsqrt.f32 %v544_v11  ;;  %v655_v19 = vmax.f32 %v3488_v6, %v3924_v55  ;;  %2226 = vst.msk [vmem:[%s3802_s18 + $0x10] sm:$0xff] %vm5858_vm1, %v2219_v18  ;;  %vm574_vm4 = vcmp.eq.f32.partialorder %v3934_v49, inf }
 0x12b   : > { %v620_v27 = vmul.f32 %v619_v51, %v3818_v38  ;;  %v706_v15 = vmul.f32 0.002785687, %v3957_v45  ;;  %v1031_v54 = vmul.f32 %v3106_v9, %v3863_v39  ;;  %vm576_vm6 = vcmp.eq.f32.partialorder %v3934_v49, 0.0 }
 0x12c   : > { %v3108_v33 = vpop.eup %3107  ;;  %v1070_v47 = vmul.f32 %v1069_v42, %v3860_v43  ;;  %3115 = vrcp.f32 %v655_v19  ;;  %v5961_v42 = vmov 0 }
 0x12d   : > { %v621_v51 = vadd.f32 -0.14207031, %v620_v27  ;;  %v707_v8 = vadd.f32 -0.015866, %v706_v15  ;;  %v1033_v18 = vsel %vm1032_vm13, %v3863_v39, %v1031_v54  ;;  %v3979_v9 = vmul.f32 %v3108_v33, %v3455_v1  ;;  %v3110_v19 = vpop.eup %3109  ;;  %v3994_v54 = vpop.f32.mrb[16].mxu0 }
 0x12e   : > { %v5962_v42 = vsel %vm3984_vm15, 4294967295, %v5961_v42  ;;  %v1071_v16 = vadd.f32 0.1064488, %v1070_v47  ;;  %v1036_v27 = vsel %vm1034_vm8, %v1035_v34, %v1033_v18  ;;  %v3991_v15 = vmul.f32 %v3108_v33, %v3544_v21  ;;  %5965 = vst [vmem:[#allocation43_spill] sm:$0xff] %v3994_v54  ;;  %2711 = vst.msk [vmem:[%s3461_s11 + $0x60] sm:$0xff] %vm5858_vm1, %v3994_v54 }
 0x12f   : > { %5960 = vst [vmem:[#allocation40_spill] sm:$0xff] %v3979_v9  ;;  %5963 = vst [vmem:[#allocation41_spill] sm:$0xff] %v5962_v42  ;;  %vm693_vm13 = vcmp.eq.s32.totalorder %v3924_v55, inf  ;;  %v622_v1 = vmul.f32 %v621_v51, %v3818_v38  ;;  %v708_v10 = vmul.f32 %v707_v8, %v3957_v45  ;;  %v5966_v42 = vmin.f32 %v3728_v36, %v3866_v28 }
 0x130   : > { %5964 = vst [vmem:[#allocation42_spill] sm:$0xff] %v3991_v15  ;;  %2678 = vst.msk [vmem:[%s3781_s15 + $0x38] sm:$0xff] %vm5858_vm1, %v1036_v27  ;;  %v2231_v39 = vmul.f32 %v3979_v9, %v3921_v50  ;;  %v5967_v34 = vmov 0  ;;  %v1072_v8 = vmul.f32 %v1071_v16, %v3860_v43  ;;  %v2236_v33 = vmul.f32 %v3991_v15, %v3918_v32 }
 0x131   : > { %v4003_v47 = vmul.f32 %v3110_v19, %v5966_v42  ;;  %vm4009_vm7 = vmand %vm692_vm11, %vm693_vm13  ;;  %3117 = vlog2.f32 %v544_v11  ;;  %v623_v51 = vadd.f32 0.19993454, %v622_v1  ;;  %v709_v18 = vadd.f32 0.04247222, %v708_v10 }
 0x132   : > { %v5968_v34 = vsel %vm4009_vm7, 4294967295, %v5967_v34  ;;  %v985_v19 = vmul.f32 %v3566_v26, %v3566_v26  ;;  %v3112_v27 = vpop.eup %3111  ;;  %v1073_v9 = vadd.f32 -0.14207031, %v1072_v8  ;;  %v2241_v50 = vadd.f32 %v2236_v33, %v2231_v39 }
 0x133   : > { %5969 = vst [vmem:[#allocation44_spill] sm:$0xff] %v5968_v34  ;;  %v4022_v42 = vmul.f32 %v4003_v47, %v4003_v47  ;;  %v577_v16 = vand.u32 2147483648, %v3934_v49  ;;  %v4028_v15 = vand.u32 2147483647, %v3566_v26  ;;  %v624_v11 = vmul.f32 %v623_v51, %v3818_v38 }
 0x134   : > { %v710_v1 = vmul.f32 %v709_v18, %v3957_v45  ;;  %v573_v32 = vmul.f32 %v3112_v27, %v3934_v49  ;;  %v3114_v54 = vpop.eup %3113  ;;  %v1074_v34 = vmul.f32 %v1073_v9, %v3860_v43  ;;  %2764 = vst.msk [vmem:[%s3802_s18 + $0x38] sm:$0xff] %vm5858_vm1, %v2241_v50  ;;  %v4038_v39 = vadd.f32 %v985_v19, %v3517_v14 }
 0x135   : > { %v1158_v10 = vmul.f32 0.002785687, %v4022_v42  ;;  %v1107_v33 = vmax.f32 %v3509_v12, %v4028_v15  ;;  %vm1138_vm11 = vcmp.ne.f32.partialorder %v3428_v59, %v3428_v59  ;;  %v625_v51 = vadd.f32 -0.33333147, %v624_v11 }
 0x136   : > { %v711_v18 = vadd.f32 -0.074975304, %v710_v1  ;;  %v575_v50 = vsel %vm574_vm4, %v3934_v49, %v573_v32  ;;  %v3116_v9 = vpop.eup %3115  ;;  %v1075_v14 = vadd.f32 0.19993454, %v1074_v34  ;;  %v4052_v8 = vmul.f32 %v3114_v54, %v3546_v22 }
 0x137   : > { %v1159_v27 = vadd.f32 -0.015866, %v1158_v10  ;;  %v578_v19 = vsel %vm576_vm6, %v577_v16, %v575_v50  ;;  %v4055_v36 = vmul.f32 %v3114_v54, %v3423_v58  ;;  %v626_v28 = vmul.f32 %v625_v51, %v3818_v38 }
 0x138   : > { %v712_v11 = vmul.f32 %v711_v18, %v3957_v45  ;;  %601 = vst.msk [vmem:[%s3781_s15 + $0x8] sm:$0xff] %vm5858_vm1, %v578_v19  ;;  %v5970_v32 = vmin.f32 %v3488_v6, %v3924_v55  ;;  %v1076_v49 = vmul.f32 %v1075_v14, %v3860_v43  ;;  %v4069_v16 = vand.u32 2147483647, %v3483_v4 }
 0x139   : > { %v1160_v1 = vmul.f32 %v1159_v27, %v4022_v42  ;;  %v995_v54 = vadd.f32 1e-08, %v4038_v39  ;;  %3119 = vrsqrt.f32 %v4038_v39  ;;  %v627_v38 = vmul.f32 %v626_v28, %v3786_v56 }
 0x13a   : > { %v4065_v34 = vmul.f32 %v3116_v9, %v5970_v32  ;;  %v713_v10 = vadd.f32 0.1064488, %v712_v11  ;;  %v1077_v50 = vadd.f32 -0.33333147, %v1076_v49  ;;  %v4083_v9 = vmul.f32 %v3485_v5, %v3485_v5 }
 0x13b   : > { %v1161_v51 = vadd.f32 0.04247222, %v1160_v1  ;;  %v3118_v27 = vpop.eup %3117  ;;  %3121 = vrsqrt.f32 %v995_v54  ;;  %v628_v28 = vadd.f32 %v627_v38, %v3786_v56  ;;  %v4089_v1 = vpop.f32.mrb[16].mxu1  ;;  %vm1139_vm4 = vcmp.ne.f32.partialorder %v3566_v26, %v3566_v26 }
 0x13c   : > { %v4076_v18 = vmul.f32 %v4065_v34, %v4065_v34  ;;  %v714_v14 = vmul.f32 %v713_v10, %v3957_v45  ;;  %5971 = vst [vmem:[#allocation45_spill] sm:$0xff] %v4089_v1  ;;  %v1078_v32 = vmul.f32 %v1077_v50, %v3860_v43  ;;  %v2217_v49 = vmul.f32 0.6931472, %v3118_v27  ;;  %2749 = vst.msk [vmem:[%s3461_s11 + $0x88] sm:$0xff] %vm5858_vm1, %v4089_v1 }
 0x13d   : > { %v1162_v19 = vmul.f32 %v1161_v51, %v4022_v42  ;;  %3123 = vrcp.f32 %v1107_v33  ;;  %v630_v56 = vsub.f32 1.5707964, %v628_v28  ;;  %vm1027_vm8 = vcmp.eq.f32.partialorder %v4038_v39, 0.0  ;;  %vm4107_vm13 = vmor %vm1138_vm11, %vm1139_vm4 }
 0x13e   : > { %v659_v11 = vmul.f32 0.002785687, %v4076_v18  ;;  %v715_v54 = vadd.f32 -0.14207031, %v714_v14  ;;  %v1079_v10 = vmul.f32 %v1078_v32, %v3843_v44  ;;  %2225 = vst.msk [vmem:[%s3802_s18 + $0x8] sm:$0xff] %vm5858_vm1, %v2217_v49  ;;  %vm1144_vm6 = vcmp.eq.s32.totalorder %v3509_v12, inf }
 0x13f   : > { %v1163_v38 = vadd.f32 -0.074975304, %v1162_v19  ;;  %vm1145_vm7 = vcmp.eq.s32.totalorder %v4028_v15, inf  ;;  %vm5974_vm15 = vcmp.gt.f32.partialorder %v3542_v20, %v3530_v17  ;;  %v1028_v14 = vand.u32 2147483648, %v4038_v39 }
 0x140   : > { %v660_v51 = vadd.f32 -0.015866, %v659_v11  ;;  %v631_v33 = vsel %vm5974_vm15, %v630_v56, %v628_v28  ;;  %v716_v27 = vmul.f32 %v715_v54, %v3957_v45  ;;  %vm4120_vm11 = vmand %vm1144_vm6, %vm1145_vm7  ;;  %v4124_v11 = vpop.f32.mrb[17].mxu0  ;;  %v1080_v49 = vadd.f32 %v1079_v10, %v3843_v44 }
 0x141   : > { %v1164_v50 = vmul.f32 %v1163_v38, %v4022_v42  ;;  %5977 = vst [vmem:[#allocation46_spill] sm:$0xff] %v4124_v11  ;;  %v633_v32 = vsub.f32 3.1415927, %v631_v33  ;;  %v537_v20 = vmul.f32 %v3586_v31, %v3586_v31  ;;  %vm5978_vm15 = vcmask 121856  }
 0x142   : > { %v661_v17 = vmul.f32 %v660_v51, %v4076_v18  ;;  %2710 = vst.msk [vmem:[%s3461_s11 + $0x58] sm:$0xff] %vm5978_vm15, %v4124_v11  ;;  %v717_v28 = vadd.f32 0.19993454, %v716_v27  ;;  %v4134_v54 = vand.u32 2147483647, %v3586_v31  ;;  %vm828_vm7 = vcmp.ne.f32.partialorder %v3586_v31, %v3586_v31 }
 0x143   : > { %v1165_v56 = vadd.f32 0.1064488, %v1164_v50  ;;  %v3120_v38 = vpop.eup %3119  ;;  %vm5979_vm4 = vcmp.lt.f32.partialorder %v3430_v60, 0.0  ;;  %v1082_v10 = vsub.f32 1.5707964, %v1080_v49  ;;  %v4141_v1 = vadd.f32 %v537_v20, %v3889_v63 }
 0x144   : > { %v634_v44 = vsel %vm5979_vm4, %v633_v32, %v631_v33  ;;  %v662_v51 = vadd.f32 0.04247222, %v661_v17  ;;  %vm5980_vm6 = vcmp.ne.f32.partialorder %v3483_v4, %v3483_v4  ;;  %v5981_v27 = vmov 0 }
 0x145   : > { %vm4146_vm15 = vmor %vm5980_vm6, %vm828_vm7  ;;  %vm5984_vm1 = vcmp.eq.f32.partialorder %v3471_v2, 0.0  ;;  %v718_v11 = vmul.f32 %v717_v28, %v3957_v45  ;;  %v1166_v60 = vmul.f32 %v1165_v56, %v4022_v42  ;;  %v1024_v33 = vmul.f32 %v3120_v38, %v4038_v39  ;;  %v3122_v63 = vpop.eup %3121 }
 0x146   : > { %v5982_v27 = vsel %vm4146_vm15, 4294967295, %v5981_v27  ;;  %v638_v50 = vsel %vm5984_vm1, %v3549_v23, %v634_v44  ;;  %vm5985_vm7 = vcmp.gt.f32.partialorder %v3623_v40, %v3601_v35  ;;  %v663_v20 = vmul.f32 %v662_v51, %v4076_v18 }
 0x147   : > { %5983 = vst [vmem:[#allocation47_spill] sm:$0xff] %v5982_v27  ;;  %v642_v32 = vsel %vm3579_vm12, nan, %v638_v50  ;;  %v1083_v17 = vsel %vm5985_vm7, %v1082_v10, %v1080_v49  ;;  %v4163_v27 = vadd.f32 1e-08, %v4141_v1  ;;  %v719_v56 = vadd.f32 -0.33333147, %v718_v11  ;;  %v3124_v44 = vpop.eup %3123 }
 0x148   : > { %v648_v23 = vsel %vm3607_vm3, %v3554_v24, %v642_v32  ;;  %v1085_v28 = vsub.f32 3.1415927, %v1083_v17  ;;  %v1167_v38 = vadd.f32 -0.14207031, %v1166_v60  ;;  %v664_v50 = vadd.f32 -0.074975304, %v663_v20 }
 0x149   : > { %v649_v30 = vand.u32 2147483647, %v648_v23  ;;  %vm5986_vm1 = vcmp.eq.f32.partialorder %v4038_v39, inf  ;;  %v4172_v40 = vmul.f32 %v3122_v63, %v3428_v59  ;;  %vm5987_vm12 = vcmp.lt.f32.partialorder %v3438_v61, 0.0 }
 0x14a   : > { %v1026_v35 = vsel %vm5986_vm1, %v4038_v39, %v1024_v33  ;;  %v1086_v24 = vsel %vm5987_vm12, %v1085_v28, %v1083_v17  ;;  %v720_v37 = vmul.f32 %v719_v56, %v3957_v45  ;;  %v1168_v11 = vmul.f32 %v1167_v38, %v4022_v42 }
 0x14b   : > { %v1029_v49 = vsel %vm1027_vm8, %v1028_v14, %v1026_v35  ;;  %v5988_v10 = vand.u32 2147483648, %v3471_v2  ;;  %vm5989_vm3 = vcmp.eq.f32.partialorder %v3473_v3, 0.0  ;;  %v665_v33 = vmul.f32 %v664_v50, %v4076_v18 }
 0x14c   : > { %v1090_v60 = vsel %vm5989_vm3, %v3631_v41, %v1086_v24  ;;  %vm5990_vm4 = vcmask 121856   ;;  %v5991_v61 = vmin.f32 %v3509_v12, %v4028_v15  ;;  %v721_v14 = vmul.f32 %v720_v37, %v3940_v62 }
 0x14d   : > { %v651_v51 = vor.u32 %v5988_v10, %v649_v30  ;;  %2677 = vst.msk [vmem:[%s3781_s15 + $0x30] sm:$0xff] %vm5990_vm4, %v1029_v49  ;;  %v1094_v39 = vsel %vm3649_vm10, nan, %v1090_v60  ;;  %v1169_v2 = vadd.f32 0.19993454, %v1168_v11  ;;  %v4203_v32 = vmul.f32 %v3122_v63, %v3566_v26  ;;  %vm5992_vm8 = vmmov %vm5990_vm4 }
 0x14e   : > { %v4197_v45 = vmul.f32 %v3124_v44, %v5991_v61  ;;  %v1100_v41 = vsel %vm3688_vm2, %v3684_v52, %v1094_v39  ;;  %v666_v17 = vadd.f32 0.1064488, %v665_v33  ;;  %v2230_v46 = vmul.f32 %v4172_v40, %v4055_v36  ;;  %vm5994_vm10 = vmmov %vm5990_vm4 }
 0x14f   : > { %840 = vst.msk [vmem:[%s4178_s20] sm:$0xff] %vm5992_vm8, %v651_v51  ;;  %v1101_v23 = vand.u32 2147483647, %v1100_v41  ;;  %v722_v28 = vadd.f32 %v721_v14, %v3940_v62  ;;  %v1170_v63 = vmul.f32 %v1169_v2, %v4022_v42  ;;  %v2235_v56 = vmul.f32 %v4203_v32, %v4052_v8  ;;  %vm5996_vm1 = vmmov %vm5990_vm4  ;;  %v4254_v2 = vpop.f32.mrb[17].mxu1 }
 0x150   : > { %v4212_v20 = vmul.f32 %v4197_v45, %v4197_v45  ;;  %v667_v52 = vmul.f32 %v666_v17, %v4076_v18  ;;  %3125 = vrsqrt.f32 %v4163_v27  ;;  %v5993_v44 = vand.u32 2147483648, %v3473_v3 }
 0x151   : > { %v724_v50 = vsub.f32 1.5707964, %v722_v28  ;;  %v1171_v62 = vadd.f32 -0.33333147, %v1170_v63  ;;  %v2240_v35 = vadd.f32 %v2235_v56, %v2230_v46  ;;  %vm1279_vm2 = vcmp.ne.f32.partialorder %v3485_v5, %v3485_v5  ;;  %v6002_v63 = vld [vmem:[#allocation9_spill] sm:$0xff] }
 0x152   : > { %v1111_v38 = vmul.f32 0.002785687, %v4212_v20  ;;  %v1103_v30 = vor.u32 %v5993_v44, %v1101_v23  ;;  %v668_v24 = vadd.f32 -0.14207031, %v667_v52  ;;  %3127 = vrsqrt.f32 %v4141_v1 }
 0x153   : > { %vm5995_vm6 = vcmp.gt.f32.partialorder %v3754_v7, %v3702_v57  ;;  %vm731_vm7 = vcmp.eq.f32.partialorder %v3513_v13, 0.0  ;;  %v1172_v3 = vmul.f32 %v1171_v62, %v4022_v42  ;;  %2763 = vst.msk [vmem:[%s3802_s18 + $0x30] sm:$0xff] %vm5996_vm1, %v2240_v35  ;;  %v795_v49 = vmin.f32 %v4069_v16, %v4134_v54 }
 0x154   : > { %v1112_v37 = vadd.f32 -0.015866, %v1111_v38  ;;  %2681 = vst.msk [vmem:[%s4178_s20 + $0x28] sm:$0xff] %vm5994_vm10, %v1103_v30  ;;  %v725_v11 = vsel %vm5995_vm6, %v724_v50, %v722_v28  ;;  %v669_v51 = vmul.f32 %v668_v24, %v4076_v18  ;;  %v796_v33 = vmax.f32 %v4069_v16, %v4134_v54  ;;  %vm5998_vm6 = vmmov %vm5996_vm1  ;;  %v6003_v30 = vld [vmem:[#allocation32_spill] sm:$0xff] }
 0x155   : > { %v727_v10 = vsub.f32 3.1415927, %v725_v11  ;;  %v744_v7 = vand.u32 2147483648, %v3513_v13  ;;  %v1173_v57 = vmul.f32 %v1172_v3, %v4003_v47  ;;  %v1196_v42 = vand.u32 2147483648, %v3544_v21  ;;  %2748 = vst.msk [vmem:[%s3461_s11 + $0x80] sm:$0xff] %vm5998_vm6, %v4254_v2 }
 0x156   : > { %v1113_v60 = vmul.f32 %v1112_v37, %v4212_v20  ;;  %vm5997_vm3 = vcmp.lt.f32.partialorder %v3453_v0, 0.0  ;;  %vm1183_vm4 = vcmp.eq.f32.partialorder %v3544_v21, 0.0  ;;  %v670_v39 = vadd.f32 0.19993454, %v669_v51 }
 0x157   : > { %v728_v61 = vsel %vm5997_vm3, %v727_v10, %v725_v11  ;;  %3129 = vrcp.f32 %v796_v33  ;;  %v1174_v17 = vadd.f32 %v1173_v57, %v4003_v47  ;;  %vm833_vm8 = vcmp.eq.s32.totalorder %v4069_v16, inf  ;;  %v6011_v57 = vld [vmem:[#allocation4_spill] sm:$0xff] }
 0x158   : > { %v1114_v14 = vadd.f32 0.04247222, %v1113_v60  ;;  %v732_v41 = vsel %vm731_vm7, %v3716_v25, %v728_v61  ;;  %vm834_vm10 = vcmp.eq.s32.totalorder %v4134_v54, inf  ;;  %v671_v46 = vmul.f32 %v670_v39, %v4076_v18 }
 0x159   : > { %v736_v0 = vsel %vm3769_vm9, nan, %v732_v41  ;;  %vm4269_vm1 = vmand %vm833_vm8, %vm834_vm10  ;;  %3131 = vlog2.f32 %v4163_v27  ;;  %v1176_v47 = vsub.f32 1.5707964, %v1174_v17  ;;  %vm595_vm7 = vcmp.eq.f32.partialorder %v4141_v1, inf  ;;  %v6004_v27 = vld [vmem:[#allocation22_spill] sm:$0xff]  ;;  %v6014_v41 = vld [vmem:[#allocation23_spill] sm:$0xff] }
 0x15a   : > { %v1115_v23 = vmul.f32 %v1114_v14, %v4212_v20  ;;  %v742_v25 = vsel %vm3852_vm5, %v3721_v29, %v736_v0  ;;  %v988_v48 = vmul.f32 %v6002_v63, %v6002_v63  ;;  %v3126_v56 = vpop.eup %3125  ;;  %v672_v38 = vadd.f32 -0.33333147, %v671_v46  ;;  %v6013_v14 = vld [vmem:[#allocation2_spill] sm:$0xff] }
 0x15b   : > { %v743_v52 = vand.u32 2147483647, %v742_v25  ;;  %vm1280_vm9 = vcmp.ne.f32.partialorder %v6002_v63, %v6002_v63  ;;  %vm6005_vm3 = vcmp.gt.f32.partialorder %v6003_v30, %v6004_v27  ;;  %v4286_v29 = vmul.f32 %v3126_v56, %v3586_v31 }
 0x15c   : > { %v1116_v44 = vadd.f32 -0.074975304, %v1115_v23  ;;  %v1177_v50 = vsel %vm6005_vm3, %v1176_v47, %v1174_v17  ;;  %v4289_v62 = vmul.f32 %v3126_v56, %v3483_v4  ;;  %v4292_v35 = vadd.f32 %v988_v48, %v4083_v9  ;;  %vm4297_vm5 = vmor %vm1279_vm2, %vm1280_vm9  ;;  %v3128_v37 = vpop.eup %3127  ;;  %v6016_v56 = vld [vmem:[#allocation24_spill] sm:$0xff] }
 0x15d   : > { %6006 = vst [vmem:[#allocation31_spill] sm:$0xff] %v4286_v29  ;;  %v745_v11 = vor.u32 %v744_v7, %v743_v52  ;;  %v1179_v3 = vsub.f32 3.1415927, %v1177_v50  ;;  %v673_v10 = vmul.f32 %v672_v38, %v4076_v18  ;;  %v594_v60 = vmul.f32 %v3128_v37, %v4141_v1  ;;  %vm6010_vm2 = vmmov %vm5998_vm6  ;;  %v6032_v52 = vld [vmem:[#allocation12_spill] sm:$0xff] }
 0x15e   : > { %6007 = vst [vmem:[#allocation9_spill] sm:$0xff] %v4289_v62  ;;  %v1117_v51 = vmul.f32 %v1116_v44, %v4212_v20  ;;  %v998_v33 = vadd.f32 1e-08, %v4292_v35  ;;  %3133 = vrsqrt.f32 %v4292_v35  ;;  %v4307_v9 = vand.u32 2147483647, %v6002_v63 }
 0x15f   : > { %842 = vst.msk [vmem:[%s4178_s20 + $0x10] sm:$0xff] %vm6010_vm2, %v745_v11  ;;  %vm6012_vm8 = vcmp.lt.f32.partialorder %v6011_v57, 0.0  ;;  %v674_v7 = vmul.f32 %v673_v10, %v4065_v34  ;;  %v598_v39 = vand.u32 2147483648, %v4141_v1  ;;  %vm780_vm10 = vcmp.ne.f32.partialorder %v6013_v14, %v6013_v14 }
 0x160   : > { %v1180_v61 = vsel %vm6012_vm8, %v1179_v3, %v1177_v50  ;;  %v1118_v18 = vadd.f32 0.1064488, %v1117_v51  ;;  %vm684_vm6 = vcmp.eq.f32.partialorder %v3546_v22, 0.0  ;;  %v596_v0 = vsel %vm595_vm7, %v4141_v1, %v594_v60 }
 0x161   : > { %v1184_v17 = vsel %vm1183_vm4, %v6014_v41, %v1180_v61  ;;  %vm597_vm9 = vcmp.eq.f32.partialorder %v4141_v1, 0.0  ;;  %3135 = vrsqrt.f32 %v998_v33  ;;  %v3130_v46 = vpop.eup %3129  ;;  %v675_v25 = vadd.f32 %v674_v7, %v4065_v34 }
 0x162   : > { %v1188_v13 = vsel %vm3879_vm0, nan, %v1184_v17  ;;  %v1119_v47 = vmul.f32 %v1118_v18, %v4212_v20  ;;  %v599_v48 = vsel %vm597_vm9, %v598_v39, %v596_v0  ;;  %vm6018_vm4 = vcmask 114688   ;;  %v6026_v17 = vld [vmem:[#allocation5_spill] sm:$0xff] }
 0x163   : > { %v1194_v38 = vsel %vm3909_vm14, %v6016_v56, %v1188_v13  ;;  %604 = vst.msk [vmem:[%s3781_s15 + $0x20] sm:$0x1] %vm6018_vm4, %v599_v48  ;;  %v4337_v1 = vmul.f32 %v3130_v46, %v795_v49  ;;  %v1247_v44 = vmin.f32 %v4221_v53, %v4307_v9  ;;  %v1248_v34 = vmax.f32 %v4221_v53, %v4307_v9  ;;  %v3132_v30 = vpop.eup %3131  ;;  %vm6020_vm3 = vmmov %vm6018_vm4  ;;  %v6027_v13 = vld [vmem:[#allocation14_spill] sm:$0xff]  ;;  %v6030_v48 = vld [vmem:[#allocation41_spill] sm:$0xff] }
 0x164   : > { %v1195_v27 = vand.u32 2147483647, %v1194_v38  ;;  %v677_v50 = vsub.f32 1.5707964, %v675_v25  ;;  %v1120_v37 = vadd.f32 -0.14207031, %v1119_v47  ;;  %vm6019_vm14 = vcmp.gt.f32.partialorder %v3924_v55, %v3488_v6 }
 0x165   : > { %v697_v11 = vand.u32 2147483648, %v3546_v22  ;;  %v4348_v49 = vmul.f32 %v4337_v1, %v4337_v1  ;;  %v2223_v3 = vmul.f32 0.6931472, %v3132_v30  ;;  %3137 = vrcp.f32 %v1248_v34  ;;  %v6024_v55 = vld [vmem:[#allocation10_spill] sm:$0xff] }
 0x166   : > { %v1197_v10 = vor.u32 %v1196_v42, %v1195_v27  ;;  %v678_v51 = vsel %vm6019_vm14, %v677_v50, %v675_v25  ;;  %v1121_v60 = vmul.f32 %v1120_v37, %v4212_v20  ;;  %vm1046_vm7 = vcmp.eq.f32.partialorder %v4292_v35, inf  ;;  %v6033_v30 = vld [vmem:[#allocation6_spill] sm:$0xff]  ;;  %v6034_v27 = vld [vmem:[#allocation44_spill] sm:$0xff] }
 0x167   : > { %v680_v33 = vsub.f32 3.1415927, %v678_v51  ;;  %v800_v57 = vmul.f32 0.002785687, %v4348_v49  ;;  %2228 = vst.msk [vmem:[%s3802_s18 + $0x20] sm:$0x1] %vm6020_vm3, %v2223_v3  ;;  %v536_v42 = vmul.f32 %v6024_v55, %v6024_v55  ;;  %vm781_vm3 = vcmp.ne.f32.partialorder %v6024_v55, %v6024_v55 }
 0x168   : > { %vm1285_vm2 = vcmp.eq.s32.totalorder %v4221_v53, inf  ;;  %vm1286_vm8 = vcmp.eq.s32.totalorder %v4307_v9, inf  ;;  %vm6021_vm9 = vcmask 121856   ;;  %v1122_v21 = vadd.f32 0.19993454, %v1121_v60  ;;  %v3134_v7 = vpop.eup %3133 }
 0x169   : > { %2683 = vst.msk [vmem:[%s4178_s20 + $0x38] sm:$0xff] %vm6021_vm9, %v1197_v10  ;;  %vm1048_vm4 = vcmp.eq.f32.partialorder %v4292_v35, 0.0  ;;  %vm4365_vm0 = vmand %vm1285_vm2, %vm1286_vm8  ;;  %v4372_v61 = vand.u32 2147483647, %v6024_v55  ;;  %vm6025_vm14 = vcmp.lt.f32.partialorder %v3423_v58, 0.0  ;;  %v1049_v41 = vand.u32 2147483648, %v4292_v35 }
 0x16a   : > { %v681_v18 = vsel %vm6025_vm14, %v680_v33, %v678_v51  ;;  %v801_v39 = vadd.f32 -0.015866, %v800_v57  ;;  %v1123_v46 = vmul.f32 %v1122_v21, %v4212_v20  ;;  %v1045_v23 = vmul.f32 %v3134_v7, %v4292_v35  ;;  %vm4390_vm2 = vmor %vm780_vm10, %vm781_vm3  ;;  %v6098_v58 = vld [vmem:[#allocation18_spill] sm:$0xff] }
 0x16b   : > { %v685_v0 = vsel %vm684_vm6, %v6026_v17, %v681_v18  ;;  %v4385_v25 = vadd.f32 %v536_v42, %v6027_v13  ;;  %v3136_v47 = vpop.eup %3135  ;;  %vm6031_vm8 = vnez %v6030_v48  ;;  %v748_v38 = vmin.f32 %v6032_v52, %v4372_v61 }
 0x16c   : > { %v689_v22 = vsel %vm6031_vm8, nan, %v685_v0  ;;  %v802_v56 = vmul.f32 %v801_v39, %v4348_v49  ;;  %v749_v34 = vmax.f32 %v6032_v52, %v4372_v61  ;;  %vm6035_vm6 = vnez %v6034_v27  ;;  %v6039_v39 = vld [vmem:[#allocation3_spill] sm:$0xff] }
 0x16d   : > { %v695_v50 = vsel %vm6035_vm6, %v6033_v30, %v689_v22  ;;  %v1124_v37 = vadd.f32 -0.33333147, %v1123_v46  ;;  %v1047_v3 = vsel %vm1046_vm7, %v4292_v35, %v1045_v23  ;;  %v4408_v10 = vmul.f32 %v3136_v47, %v3485_v5 }
 0x16e   : > { %v696_v51 = vand.u32 2147483647, %v695_v50  ;;  %v803_v60 = vadd.f32 0.04247222, %v802_v56  ;;  %v1050_v33 = vsel %vm1048_vm4, %v1049_v41, %v1047_v3  ;;  %v4413_v57 = vmul.f32 %v3136_v47, %v6002_v63 }
 0x16f   : > { %6036 = vst [vmem:[#allocation32_spill] sm:$0xff] %v4408_v10  ;;  %v1125_v21 = vmul.f32 %v1124_v37, %v4212_v20  ;;  %vm6038_vm10 = vcmask 114688   ;;  %v2233_v42 = vmul.f32 %v4408_v10, %v4289_v62  ;;  %v546_v7 = vadd.f32 1e-08, %v4385_v25  ;;  %v3138_v18 = vpop.eup %3137  ;;  %v6044_v37 = vld [vmem:[#allocation19_spill] sm:$0xff] }
 0x170   : > { %6037 = vst [vmem:[#allocation22_spill] sm:$0xff] %v4413_v57  ;;  %2680 = vst.msk [vmem:[%s3781_s15 + $0x48] sm:$0x1] %vm6038_vm10, %v1050_v33  ;;  %3139 = vrsqrt.f32 %v4385_v25  ;;  %v4423_v17 = vand.u32 2147483647, %v6039_v39  ;;  %v698_v35 = vor.u32 %v697_v11, %v696_v51  ;;  %v804_v41 = vmul.f32 %v803_v60, %v4348_v49  ;;  %v4472_v60 = vpop.f32.mrb[18].mxu0 }
 0x171   : > { %v2238_v0 = vmul.f32 %v4413_v57, %v4286_v29  ;;  %vm1232_vm7 = vcmp.ne.f32.partialorder %v6039_v39, %v6039_v39  ;;  %v1126_v20 = vmul.f32 %v1125_v21, %v4197_v45  ;;  %v4431_v46 = vmul.f32 %v3138_v18, %v1247_v44  ;;  %vm6040_vm6 = vmmov %vm6038_vm10 }
 0x172   : > { %3141 = vrsqrt.f32 %v546_v7  ;;  %841 = vst.msk [vmem:[%s4178_s20 + $0x8] sm:$0xff] %vm6021_vm9, %v698_v35  ;;  %v805_v23 = vadd.f32 -0.074975304, %v804_v41  ;;  %vm786_vm4 = vcmp.eq.s32.totalorder %v6032_v52, inf  ;;  %vm787_vm3 = vcmp.eq.s32.totalorder %v4372_v61, inf }
 0x173   : > { %v2243_v13 = vadd.f32 %v2238_v0, %v2233_v42  ;;  %3143 = vrcp.f32 %v749_v34  ;;  %v1127_v11 = vadd.f32 %v1126_v20, %v4197_v45  ;;  %v4439_v47 = vmul.f32 %v4431_v46, %v4431_v46  ;;  %vm4448_vm10 = vmand %vm786_vm4, %vm787_vm3  ;;  %v6043_v45 = vld [vmem:[#allocation11_spill] sm:$0xff]  ;;  %v4491_v20 = vpop.f32.mrb[18].mxu1 }
 0x174   : > { %vm1136_vm8 = vcmp.eq.f32.partialorder %v3566_v26, 0.0  ;;  %v806_v44 = vmul.f32 %v805_v23, %v4348_v49  ;;  %3145 = vlog2.f32 %v546_v7  ;;  %v987_v22 = vmul.f32 %v6043_v45, %v6043_v45  ;;  %6049 = vst [vmem:[#allocation4_spill] sm:$0xff] %v4491_v20 }
 0x175   : > { %2766 = vst.msk [vmem:[%s3802_s18 + $0x48] sm:$0x1] %vm6040_vm6, %v2243_v13  ;;  %v1129_v56 = vsub.f32 1.5707964, %v1127_v11  ;;  %v1252_v34 = vmul.f32 0.002785687, %v4439_v47  ;;  %vm1233_vm9 = vcmp.ne.f32.partialorder %v6043_v45, %v6043_v45  ;;  %vm6047_vm6 = vcmp.gt.f32.partialorder %v4028_v15, %v3509_v12 }
 0x176   : > { %v4456_v30 = vand.u32 2147483647, %v6043_v45  ;;  %v1149_v27 = vand.u32 2147483648, %v3566_v26  ;;  %v807_v50 = vadd.f32 0.1064488, %v806_v44  ;;  %vm588_vm4 = vcmp.eq.f32.partialorder %v4385_v25, inf  ;;  %vm4468_vm3 = vmor %vm1232_vm7, %vm1233_vm9 }
 0x177   : > { %v4463_v3 = vadd.f32 %v987_v22, %v6044_v37  ;;  %v1130_v33 = vsel %vm6047_vm6, %v1129_v56, %v1127_v11  ;;  %v1253_v21 = vadd.f32 -0.015866, %v1252_v34  ;;  %vm6048_vm14 = vcmask 114688   ;;  %v6052_v22 = vld [vmem:[#allocation7_spill] sm:$0xff]  ;;  %v6054_v26 = vld [vmem:[#allocation8_spill] sm:$0xff] }
 0x178   : > { %v1200_v42 = vmin.f32 %v4423_v17, %v4456_v30  ;;  %v1201_v7 = vmax.f32 %v4423_v17, %v4456_v30  ;;  %2713 = vst.msk [vmem:[%s3461_s11 + $0x70] sm:$0x1] %vm6048_vm14, %v4472_v60  ;;  %v1132_v18 = vsub.f32 3.1415927, %v1130_v33  ;;  %v808_v35 = vmul.f32 %v807_v50, %v4348_v49 }
 0x179   : > { %v997_v41 = vadd.f32 1e-08, %v4463_v3  ;;  %3147 = vrsqrt.f32 %v4463_v3  ;;  %v1254_v15 = vmul.f32 %v1253_v21, %v4439_v47  ;;  %vm590_vm7 = vcmp.eq.f32.partialorder %v4385_v25, 0.0 }
 0x17a   : > { %v3140_v12 = vpop.eup %3139  ;;  %v591_v0 = vand.u32 2147483648, %v4385_v25  ;;  %vm1238_vm9 = vcmp.eq.s32.totalorder %v4423_v17, inf  ;;  %vm6050_vm14 = vcmp.lt.f32.partialorder %v3428_v59, 0.0  ;;  %v809_v13 = vadd.f32 -0.14207031, %v808_v35 }
 0x17b   : > { %v1133_v23 = vsel %vm6050_vm14, %v1132_v18, %v1130_v33  ;;  %v587_v11 = vmul.f32 %v3140_v12, %v4385_v25  ;;  %3149 = vrsqrt.f32 %v997_v41  ;;  %vm6051_vm6 = vcmask 114688  }
 0x17c   : > { %2751 = vst.msk [vmem:[%s3461_s11 + $0x98] sm:$0x1] %vm6051_vm6, %v4491_v20  ;;  %v3142_v44 = vpop.eup %3141  ;;  %v1137_v56 = vsel %vm1136_vm8, %v6052_v22, %v1133_v23  ;;  %v1255_v34 = vadd.f32 0.04247222, %v1254_v15  ;;  %3151 = vrcp.f32 %v1201_v7  ;;  %v810_v37 = vmul.f32 %v809_v13, %v4348_v49 }
 0x17d   : > { %v3144_v59 = vpop.eup %3143  ;;  %v1141_v50 = vsel %vm4107_vm13, nan, %v1137_v56  ;;  %v589_v33 = vsel %vm588_vm4, %v4385_v25, %v587_v11  ;;  %v4511_v21 = vmul.f32 %v3142_v44, %v6024_v55  ;;  %vm6055_vm13 = vcmask 121856  }
 0x17e   : > { %v1147_v7 = vsel %vm4120_vm11, %v6054_v26, %v1141_v50  ;;  %v1256_v18 = vmul.f32 %v1255_v34, %v4439_v47  ;;  %v592_v35 = vsel %vm590_vm7, %v591_v0, %v589_v33  ;;  %v4522_v43 = vmul.f32 %v3144_v59, %v748_v38  ;;  %v3146_v41 = vpop.eup %3145  ;;  %vm6059_vm4 = vmmov %vm6055_vm13 }
 0x17f   : > { %6053 = vst [vmem:[#allocation2_spill] sm:$0xff] %v4511_v21  ;;  %v1148_v12 = vand.u32 2147483647, %v1147_v7  ;;  %v811_v15 = vadd.f32 0.19993454, %v810_v37  ;;  %603 = vst.msk [vmem:[%s3781_s15 + $0x18] sm:$0xff] %vm6055_vm13, %v592_v35  ;;  %v4527_v19 = vmul.f32 %v3142_v44, %v6013_v14 }
 0x180   : > { %vm1239_vm11 = vcmp.eq.s32.totalorder %v4456_v30, inf  ;;  %v1257_v23 = vadd.f32 -0.074975304, %v1256_v18  ;;  %v4532_v25 = vmul.f32 %v4522_v43, %v4522_v43  ;;  %v2221_v0 = vmul.f32 0.6931472, %v3146_v41  ;;  %vm6060_vm7 = vmmov %vm6059_vm4 }
 0x181   : > { %6056 = vst [vmem:[#allocation23_spill] sm:$0xff] %v4527_v19  ;;  %vm4536_vm8 = vmand %vm1238_vm9, %vm1239_vm11  ;;  %v1150_v13 = vor.u32 %v1149_v27, %v1148_v12  ;;  %v812_v11 = vmul.f32 %v811_v15, %v4348_v49  ;;  %vm1039_vm9 = vcmp.eq.f32.partialorder %v4463_v3, inf  ;;  %vm1041_vm14 = vcmp.eq.f32.partialorder %v4463_v3, 0.0 }
 0x182   : > { %v1258_v44 = vmul.f32 %v1257_v23, %v4439_v47  ;;  %v753_v22 = vmul.f32 0.002785687, %v4532_v25  ;;  %2227 = vst.msk [vmem:[%s3802_s18 + $0x18] sm:$0xff] %vm6059_vm4, %v2221_v0  ;;  %v1042_v26 = vand.u32 2147483648, %v4463_v3  ;;  %vm6063_vm6 = vmmov %vm6059_vm4  ;;  %vm776_vm13 = vcmp.lt.s32.totalorder %v6013_v14, 0 }
 0x183   : > { %v3148_v56 = vpop.eup %3147  ;;  %2682 = vst.msk [vmem:[%s4178_s20 + $0x30] sm:$0xff] %vm6060_vm7, %v1150_v13  ;;  %v813_v34 = vadd.f32 -0.33333147, %v812_v11  ;;  %vm773_vm11 = vcmp.lt.f32.partialorder %v6013_v14, 0.0  ;;  %vm823_vm4 = vcmp.lt.s32.totalorder %v3483_v4, 0  ;;  %vm6064_vm7 = vcmp.gt.f32.partialorder %v4134_v54, %v4069_v16 }
 0x184   : > { %v1259_v59 = vadd.f32 0.1064488, %v1258_v44  ;;  %v754_v50 = vadd.f32 -0.015866, %v753_v22  ;;  %v1038_v37 = vmul.f32 %v3148_v56, %v4463_v3 }
 0x185   : > { %v3150_v33 = vpop.eup %3149  ;;  %v814_v27 = vmul.f32 %v813_v34, %v4348_v49 }
 0x186   : > { %v3152_v7 = vpop.eup %3151  ;;  %v1260_v18 = vmul.f32 %v1259_v59, %v4439_v47  ;;  %v755_v35 = vmul.f32 %v754_v50, %v4532_v25  ;;  %v1040_v41 = vsel %vm1039_vm9, %v4463_v3, %v1038_v37  ;;  %v4556_v12 = vmul.f32 %v3150_v33, %v6039_v39  ;;  %vm6065_vm9 = vmmov %vm6063_vm6 }
 0x187   : > { %v815_v15 = vmul.f32 %v814_v27, %v4337_v1  ;;  %v1043_v23 = vsel %vm1041_vm14, %v1042_v26, %v1040_v41  ;;  %v4562_v49 = vmul.f32 %v3152_v7, %v1200_v42  ;;  %v4565_v0 = vmul.f32 %v3150_v33, %v6043_v45  ;;  %v4589_v7 = vpop.f32.mrb[19].mxu0  ;;  %vm6068_vm14 = vmmov %vm6063_vm6 }
 0x188   : > { %6061 = vst [vmem:[#allocation33_spill] sm:$0xff] %v4556_v12  ;;  %v1261_v13 = vadd.f32 -0.14207031, %v1260_v18  ;;  %v756_v11 = vadd.f32 0.04247222, %v755_v35  ;;  %2679 = vst.msk [vmem:[%s3781_s15 + $0x40] sm:$0xff] %vm6063_vm6, %v1043_v23  ;;  %v2232_v3 = vmul.f32 %v4556_v12, %v4527_v19 }
 0x189   : > { %6062 = vst [vmem:[#allocation24_spill] sm:$0xff] %v4565_v0  ;;  %v816_v44 = vadd.f32 %v815_v15, %v4337_v1  ;;  %v4574_v22 = vmul.f32 %v4562_v49, %v4562_v49  ;;  %v2237_v42 = vmul.f32 %v4565_v0, %v4511_v21  ;;  %6066 = vst [vmem:[#allocation35_spill] sm:$0xff] %v4589_v7  ;;  %v6067_v18 = vmov 0.0   ;;  %v6079_v21 = vld [vmem:[#allocation26_spill] sm:$0xff] }
 0x18a   : > { %v1262_v56 = vmul.f32 %v1261_v13, %v4439_v47  ;;  %v757_v34 = vmul.f32 %v756_v11, %v4532_v25  ;;  %v4592_v35 = vsel %vm776_vm13, 3.1415927, %v6067_v18  ;;  %2712 = vst.msk [vmem:[%s3461_s11 + $0x68] sm:$0xff] %vm6068_vm14, %v4589_v7  ;;  %v6069_v13 = vmov 0.7853982  }
 0x18b   : > { %v818_v59 = vsub.f32 1.5707964, %v816_v44  ;;  %v1205_v50 = vmul.f32 0.002785687, %v4574_v22  ;;  %v2242_v37 = vadd.f32 %v2237_v42, %v2232_v3  ;;  %v4602_v16 = vsel %vm773_vm11, 2.3561945, %v6069_v13 }
 0x18c   : > { %v1263_v1 = vadd.f32 0.19993454, %v1262_v56  ;;  %v758_v33 = vadd.f32 -0.074975304, %v757_v34  ;;  %vm820_vm6 = vcmp.lt.f32.partialorder %v3483_v4, 0.0  ;;  %vm825_vm13 = vcmp.eq.f32.partialorder %v3586_v31, 0.0 }
 0x18d   : > { %v819_v27 = vsel %vm6064_vm7, %v818_v59, %v816_v44  ;;  %v1206_v26 = vadd.f32 -0.015866, %v1205_v50  ;;  %2765 = vst.msk [vmem:[%s3802_s18 + $0x40] sm:$0xff] %vm6065_vm9, %v2242_v37  ;;  %v824_v54 = vsel %vm823_vm4, 3.1415927, %v6067_v18  ;;  %vm5871_vm7 = vcmp.lt.f32.partialorder %v6039_v39, 0.0 }
 0x18e   : > { %v821_v41 = vsub.f32 3.1415927, %v819_v27  ;;  %v1264_v15 = vmul.f32 %v1263_v1, %v4439_v47  ;;  %v759_v23 = vmul.f32 %v758_v33, %v4532_v25  ;;  %vm1228_vm9 = vcmp.lt.s32.totalorder %v6039_v39, 0 }
 0x18f   : > { %v1207_v11 = vmul.f32 %v1206_v26, %v4574_v22  ;;  %v832_v59 = vsel %vm820_vm6, 2.3561945, %v6069_v13  ;;  %vm1272_vm4 = vcmp.lt.f32.partialorder %v3485_v5, 0.0  ;;  %vm1275_vm14 = vcmp.lt.s32.totalorder %v3485_v5, 0 }
 0x190   : > { %v822_v3 = vsel %vm820_vm6, %v821_v41, %v819_v27  ;;  %v1265_v44 = vadd.f32 -0.33333147, %v1264_v15  ;;  %v760_v42 = vadd.f32 0.1064488, %v759_v23  ;;  %v838_v41 = vand.u32 2147483648, %v3586_v31 }
 0x191   : > { %v826_v56 = vsel %vm825_vm13, %v824_v54, %v822_v3  ;;  %v1208_v34 = vadd.f32 0.04247222, %v1207_v11  ;;  %v4628_v54 = vsel %vm5871_vm7, 2.3561945, %v6069_v13  ;;  %v1276_v28 = vsel %vm1275_vm14, 3.1415927, %v6067_v18 }
 0x192   : > { %v830_v4 = vsel %vm4146_vm15, nan, %v826_v56  ;;  %v1266_v37 = vmul.f32 %v1265_v44, %v4439_v47  ;;  %v761_v1 = vmul.f32 %v760_v42, %v4532_v25  ;;  %v4623_v47 = vsel %vm1228_vm9, 3.1415927, %v6067_v18 }
 0x193   : > { %v836_v33 = vsel %vm4269_vm1, %v832_v59, %v830_v4  ;;  %v1209_v27 = vmul.f32 %v1208_v34, %v4574_v22  ;;  %v1284_v31 = vsel %vm1272_vm4, 2.3561945, %v6069_v13  ;;  %vm1277_vm15 = vcmp.eq.f32.partialorder %v6002_v63, 0.0  ;;  %v6072_v4 = vld [vmem:[#allocation13_spill] sm:$0xff] }
 0x194   : > { %v837_v26 = vand.u32 2147483647, %v836_v33  ;;  %v1267_v15 = vmul.f32 %v1266_v37, %v4431_v46  ;;  %v762_v23 = vadd.f32 -0.14207031, %v761_v1  ;;  %v1290_v56 = vand.u32 2147483648, %v6002_v63  ;;  %v6073_v33 = vld [vmem:[#allocation15_spill] sm:$0xff] }
 0x195   : > { %v1210_v11 = vadd.f32 -0.074975304, %v1209_v27  ;;  %vm6071_vm1 = vcmask 114688   ;;  %vm5870_vm6 = vcmp.lt.f32.partialorder %v6072_v4, 0.0  ;;  %vm1587_vm13 = vcmp.lt.s32.totalorder %v6072_v4, 0 }
 0x196   : > { %v839_v3 = vor.u32 %v838_v41, %v837_v26  ;;  %v1268_v44 = vadd.f32 %v1267_v15, %v4431_v46  ;;  %v763_v42 = vmul.f32 %v762_v23, %v4532_v25  ;;  %vm2040_vm9 = vcmp.lt.s32.totalorder %v6073_v33, 0 }
 0x197   : > { %v1211_v34 = vmul.f32 %v1210_v11, %v4574_v22  ;;  %vm6074_vm14 = vcmp.gt.f32.partialorder %v4307_v9, %v4221_v53  ;;  %v4652_v41 = vmul.f32 %v6072_v4, %v6072_v4  ;;  %v4655_v15 = vand.u32 2147483647, %v6072_v4 }
 0x198   : > { %844 = vst.msk [vmem:[%s4178_s20 + $0x20] sm:$0x1] %vm6071_vm1, %v839_v3  ;;  %v1270_v59 = vsub.f32 1.5707964, %v1268_v44  ;;  %v764_v50 = vadd.f32 0.19993454, %v763_v42  ;;  %v1437_v12 = vmul.f32 %v6079_v21, %v6079_v21 }
 0x199   : > { %v1212_v37 = vadd.f32 0.1064488, %v1211_v34  ;;  %v4659_v3 = vsel %vm1587_vm13, 3.1415927, %v6067_v18  ;;  %v4664_v53 = vsel %vm5870_vm6, 2.3561945, %v6069_v13 }
 0x19a   : > { %v1271_v27 = vsel %vm6074_vm14, %v1270_v59, %v1268_v44  ;;  %v765_v26 = vmul.f32 %v764_v50, %v4532_v25  ;;  %6075 = vst [vmem:[#allocation10_spill] sm:$0xff] %v4659_v3  ;;  %6076 = vst [vmem:[#allocation5_spill] sm:$0xff] %v4664_v53  ;;  %v4668_v44 = vmul.f32 %v6073_v33, %v6073_v33  ;;  %v4671_v42 = vand.u32 2147483647, %v6073_v33 }
 0x19b   : > { %v1273_v23 = vsub.f32 3.1415927, %v1271_v27  ;;  %v1213_v11 = vmul.f32 %v1212_v37, %v4574_v22  ;;  %v4674_v34 = vsel %vm2040_vm9, 3.1415927, %v6067_v18  ;;  %v6078_v37 = vld [vmem:[#allocation16_spill] sm:$0xff]  ;;  %vm1545_vm9 = vcmp.ne.f32.partialorder %v6079_v21, %v6079_v21 }
 0x19c   : > { %v766_v9 = vadd.f32 -0.33333147, %v765_v26  ;;  %6077 = vst [vmem:[#allocation14_spill] sm:$0xff] %v4674_v34  ;;  %v1432_v1 = vmul.f32 %v6078_v37, %v6078_v37  ;;  %v4681_v46 = vand.u32 2147483647, %v6078_v37  ;;  %vm1544_vm13 = vcmp.ne.f32.partialorder %v6078_v37, %v6078_v37 }
 0x19d   : > { %v1274_v59 = vsel %vm1272_vm4, %v1273_v23, %v1271_v27  ;;  %v1214_v50 = vadd.f32 -0.14207031, %v1213_v11  ;;  %v4689_v34 = vand.u32 2147483647, %v6079_v21  ;;  %vm5888_vm4 = vcmp.lt.f32.partialorder %v6073_v33, 0.0  ;;  %v4712_v11 = vpop.f32.mrb[19].mxu1 }
 0x19e   : > { %v1278_v26 = vsel %vm1277_vm15, %v1276_v28, %v1274_v59  ;;  %v767_v0 = vmul.f32 %v766_v9, %v4532_v25  ;;  %vm1540_vm15 = vcmp.lt.s32.totalorder %v6078_v37, 0  ;;  %v4704_v25 = vadd.f32 %v1437_v12, %v1432_v1  ;;  %6082 = vst [vmem:[#allocation41_spill] sm:$0xff] %v4712_v11 }
 0x19f   : > { %v1282_v5 = vsel %vm4297_vm5, nan, %v1278_v26  ;;  %v1215_v27 = vmul.f32 %v1214_v50, %v4574_v22  ;;  %vm4708_vm5 = vmor %vm1544_vm13, %vm1545_vm9  ;;  %vm778_vm14 = vcmp.eq.f32.partialorder %v6024_v55, 0.0  ;;  %v1513_v6 = vmax.f32 %v4681_v46, %v4689_v34 }
 0x1a0   : > { %v1288_v63 = vsel %vm4365_vm0, %v1284_v31, %v1282_v5  ;;  %v768_v24 = vmul.f32 %v767_v0, %v4522_v43  ;;  %vm6083_vm6 = vcmask 121856   ;;  %v6084_v0 = vld [vmem:[#allocation17_spill] sm:$0xff]  ;;  %v1447_v1 = vadd.f32 1e-08, %v4704_v25  ;;  %vm6085_vm0 = vmmov %vm6071_vm1 }
 0x1a1   : > { %v1289_v9 = vand.u32 2147483647, %v1288_v63  ;;  %v1216_v59 = vadd.f32 0.19993454, %v1215_v27  ;;  %2750 = vst.msk [vmem:[%s3461_s11 + $0x90] sm:$0xff] %vm6083_vm6, %v4712_v11  ;;  %v1885_v31 = vmul.f32 %v6084_v0, %v6084_v0  ;;  %3153 = vrsqrt.f32 %v4704_v25  ;;  %v6088_v63 = vld [vmem:[#allocation34_spill] sm:$0xff] }
 0x1a2   : > { %v769_v12 = vadd.f32 %v768_v24, %v4522_v43  ;;  %v4729_v5 = vand.u32 2147483647, %v6084_v0  ;;  %3155 = vrsqrt.f32 %v1447_v1  ;;  %vm1550_vm6 = vcmp.eq.s32.totalorder %v4681_v46, inf }
 0x1a3   : > { %v1291_v50 = vor.u32 %v1290_v56, %v1289_v9  ;;  %v1217_v26 = vmul.f32 %v1216_v59, %v4574_v22  ;;  %vm1551_vm9 = vcmp.eq.s32.totalorder %v4689_v34, inf  ;;  %3157 = vrcp.f32 %v1513_v6 }
 0x1a4   : > { %v771_v27 = vsub.f32 1.5707964, %v769_v12  ;;  %vm4737_vm12 = vmand %vm1550_vm6, %vm1551_vm9  ;;  %v1890_v24 = vmul.f32 %v6088_v63, %v6088_v63  ;;  %vm6089_vm13 = vcmp.gt.f32.partialorder %v4372_v61, %v6032_v52  ;;  %vm1997_vm1 = vcmp.ne.f32.partialorder %v6084_v0, %v6084_v0 }
 0x1a5   : > { %2685 = vst.msk [vmem:[%s4178_s20 + $0x48] sm:$0x1] %vm6085_vm0, %v1291_v50  ;;  %v1218_v43 = vadd.f32 -0.33333147, %v1217_v26  ;;  %v4749_v59 = vand.u32 2147483647, %v6088_v63  ;;  %vm1998_vm0 = vcmp.ne.f32.partialorder %v6088_v63, %v6088_v63  ;;  %v6103_v53 = vmin.f32 %v4681_v46, %v4689_v34 }
 0x1a6   : > { %v772_v9 = vsel %vm6089_vm13, %v771_v27, %v769_v12  ;;  %v4754_v50 = vadd.f32 %v1890_v24, %v1885_v31  ;;  %vm4756_vm6 = vmor %vm1997_vm1, %vm1998_vm0  ;;  %vm2003_vm13 = vcmp.eq.s32.totalorder %v4729_v5, inf  ;;  %vm1230_vm0 = vcmp.eq.f32.partialorder %v6043_v45, 0.0 }
 0x1a7   : > { %v774_v6 = vsub.f32 3.1415927, %v772_v9  ;;  %v1219_v1 = vmul.f32 %v1218_v43, %v4574_v22  ;;  %v1966_v52 = vmax.f32 %v4729_v5, %v4749_v59  ;;  %vm2004_vm7 = vcmp.eq.s32.totalorder %v4749_v59, inf }
 0x1a8   : > { %v1900_v31 = vadd.f32 1e-08, %v4754_v50  ;;  %3159 = vrsqrt.f32 %v4754_v50  ;;  %vm4773_vm1 = vmand %vm2003_vm13, %vm2004_vm7  ;;  %v4784_v14 = vsel %vm5888_vm4, 2.3561945, %v6069_v13  ;;  %v4789_v24 = vsel %vm1540_vm15, 3.1415927, %v6067_v18 }
 0x1a9   : > { %v775_v22 = vsel %vm773_vm11, %v774_v6, %v772_v9  ;;  %v1220_v12 = vmul.f32 %v1219_v1, %v4562_v49  ;;  %6094 = vst [vmem:[#allocation12_spill] sm:$0xff] %v4784_v14  ;;  %vm6095_vm11 = vcmp.lt.f32.partialorder %v6078_v37, 0.0  ;;  %vm6096_vm7 = vcmp.lt.s32.totalorder %v6084_v0, 0  ;;  %v6100_v14 = vld [vmem:[#allocation21_spill] sm:$0xff] }
 0x1aa   : > { %v779_v43 = vsel %vm778_vm14, %v4592_v35, %v775_v22  ;;  %v4794_v9 = vsel %vm6095_vm11, 2.3561945, %v6069_v13  ;;  %v4802_v1 = vsel %vm6096_vm7, 3.1415927, %v6067_v18  ;;  %3161 = vrsqrt.f32 %v1900_v31 }
 0x1ab   : > { %v783_v35 = vsel %vm4390_vm2, nan, %v779_v43  ;;  %v1221_v6 = vadd.f32 %v1220_v12, %v4562_v49  ;;  %v3154_v22 = vpop.eup %3153  ;;  %vm6097_vm15 = vcmp.lt.f32.partialorder %v6084_v0, 0.0  ;;  %v4814_v43 = vmul.f32 %v6098_v58, %v6098_v58 }
 0x1ac   : > { %v789_v61 = vsel %vm4448_vm10, %v4602_v16, %v783_v35  ;;  %v4810_v28 = vsel %vm6097_vm15, 2.3561945, %v6069_v13  ;;  %3163 = vrcp.f32 %v1966_v52  ;;  %vm5889_vm2 = vcmp.lt.f32.partialorder %v6100_v14, 0.0  ;;  %v3156_v19 = vpop.eup %3155 }
 0x1ad   : > { %6099 = vst [vmem:[#allocation6_spill] sm:$0xff] %v4814_v43  ;;  %v790_v49 = vand.u32 2147483647, %v789_v61  ;;  %v1223_v12 = vsub.f32 1.5707964, %v1221_v6  ;;  %v1470_v31 = vmul.f32 %v3154_v22, %v4704_v25  ;;  %vm1634_vm10 = vcmp.lt.s32.totalorder %v6100_v14, 0  ;;  %v3158_v16 = vpop.eup %3157 }
 0x1ae   : > { %vm1471_vm14 = vcmp.eq.f32.partialorder %v4704_v25, inf  ;;  %vm1473_vm13 = vcmp.eq.f32.partialorder %v4704_v25, 0.0  ;;  %v1474_v48 = vand.u32 2147483648, %v4704_v25  ;;  %v6101_v52 = vand.u32 2147483648, %v6024_v55 }
 0x1af   : > { %vm6102_vm11 = vcmp.gt.f32.partialorder %v4456_v30, %v4423_v17  ;;  %v1472_v22 = vsel %vm1471_vm14, %v4704_v25, %v1470_v31  ;;  %v1751_v11 = vmul.f32 %v3156_v19, %v6078_v37  ;;  %v4832_v3 = vmul.f32 %v3158_v16, %v6103_v53  ;;  %v6107_v30 = vld [vmem:[#allocation28_spill] sm:$0xff] }
 0x1b0   : > { %v792_v61 = vor.u32 %v6101_v52, %v790_v49  ;;  %v1224_v35 = vsel %vm6102_vm11, %v1223_v12, %v1221_v6  ;;  %v1475_v7 = vsel %vm1473_vm13, %v1474_v48, %v1472_v22  ;;  %v1756_v58 = vmul.f32 %v3156_v19, %v6079_v21  ;;  %v6108_v6 = vld [vmem:[#allocation29_spill] sm:$0xff]  ;;  %v6110_v12 = vld [vmem:[#allocation27_spill] sm:$0xff]  ;;  %v6111_v48 = vld [vmem:[#allocation30_spill] sm:$0xff] }
 0x1b1   : > { %v1226_v43 = vsub.f32 3.1415927, %v1224_v35  ;;  %vm6104_vm7 = vcmask 121856   ;;  %v1434_v55 = vmul.f32 %v6100_v14, %v6100_v14  ;;  %v4840_v17 = vand.u32 2147483647, %v6100_v14 }
 0x1b2   : > { %843 = vst.msk [vmem:[%s4178_s20 + $0x18] sm:$0xff] %vm6104_vm7, %v792_v61  ;;  %vm6106_vm15 = vmmov %vm6104_vm7  ;;  %v2250_v25 = vmul.f32 %v1751_v11, %v6107_v30  ;;  %v2292_v49 = vmul.f32 %v1751_v11, %v6108_v6  ;;  %vm6109_vm14 = vcmp.lt.f32.partialorder %v6039_v39, 0.0  ;;  %v4850_v19 = vmul.f32 %v4832_v3, %v4832_v3  ;;  %v3160_v52 = vpop.eup %3159 }
 0x1b3   : > { %6105 = vst [vmem:[#allocation44_spill] sm:$0xff] %v4840_v17  ;;  %2714 = vst.msk [vmem:[%s3781_s15 + $0x50] sm:$0xff] %vm6106_vm15, %v1475_v7  ;;  %v1227_v53 = vsel %vm6109_vm14, %v1226_v43, %v1224_v35  ;;  %v2255_v31 = vmul.f32 %v1756_v58, %v6110_v12  ;;  %v2297_v16 = vmul.f32 %v1756_v58, %v6111_v48  ;;  %v4860_v61 = vsel %vm1634_vm10, 3.1415927, %v6067_v18 }
 0x1b4   : > { %v1231_v7 = vsel %vm1230_vm0, %v4623_v47, %v1227_v53  ;;  %6112 = vst [vmem:[#allocation3_spill] sm:$0xff] %v4860_v61  ;;  %v4865_v39 = vsel %vm5889_vm2, 2.3561945, %v6069_v13  ;;  %vm1924_vm13 = vcmp.eq.f32.partialorder %v4754_v50, inf  ;;  %v1517_v35 = vmul.f32 0.002785687, %v4850_v19  ;;  %v3162_v53 = vpop.eup %3161 }
 0x1b5   : > { %6113 = vst [vmem:[#allocation11_spill] sm:$0xff] %v4865_v39  ;;  %v1235_v43 = vsel %vm4468_vm3, nan, %v1231_v7  ;;  %v2260_v47 = vadd.f32 %v2255_v31, %v2250_v25  ;;  %v2302_v22 = vadd.f32 %v2297_v16, %v2292_v49  ;;  %v1923_v10 = vmul.f32 %v3160_v52, %v4754_v50  ;;  %vm6114_vm3 = vmmov %vm6104_vm7  ;;  %v6117_v31 = vld [vmem:[#allocation43_spill] sm:$0xff] }
 0x1b6   : > { %v1241_v57 = vsel %vm4536_vm8, %v4628_v54, %v1235_v43  ;;  %vm1926_vm0 = vcmp.eq.f32.partialorder %v4754_v50, 0.0  ;;  %v1927_v29 = vand.u32 2147483648, %v4754_v50  ;;  %v3164_v62 = vpop.eup %3163  ;;  %v1518_v51 = vadd.f32 -0.015866, %v1517_v35  ;;  %vm6115_vm10 = vmmov %vm6114_vm3 }
 0x1b7   : > { %v1242_v20 = vand.u32 2147483647, %v1241_v57  ;;  %2767 = vst.msk [vmem:[%s3802_s18 + $0x50] sm:$0xff] %vm6114_vm3, %v2260_v47  ;;  %v2204_v25 = vmul.f32 %v3162_v53, %v6084_v0  ;;  %v2209_v38 = vmul.f32 %v3162_v53, %v6088_v63  ;;  %vm1638_vm8 = vcmp.ne.f32.partialorder %v6100_v14, %v6100_v14  ;;  %vm6119_vm11 = vmmov %vm6114_vm3 }
 0x1b8   : > { %2777 = vst.msk [vmem:[%s3802_s18 + $0xa0] sm:$0xff] %vm6115_vm10, %v2302_v22  ;;  %v1925_v54 = vsel %vm1924_vm13, %v4754_v50, %v1923_v10  ;;  %v6116_v57 = vmin.f32 %v4729_v5, %v4749_v59  ;;  %v1439_v16 = vmul.f32 %v6117_v31, %v6117_v31  ;;  %v4896_v52 = vand.u32 2147483647, %v6117_v31  ;;  %vm6120_vm7 = vmmov %vm6114_vm3 }
 0x1b9   : > { %v6118_v7 = vand.u32 2147483648, %v6043_v45  ;;  %v1519_v35 = vmul.f32 %v1518_v51, %v4850_v19  ;;  %v1928_v47 = vsel %vm1926_vm0, %v1927_v29, %v1925_v54  ;;  %v2271_v10 = vmul.f32 %v2204_v25, %v6107_v30  ;;  %vm6123_vm14 = vmmov %vm6114_vm3 }
 0x1ba   : > { %v4891_v49 = vmul.f32 %v3164_v62, %v6116_v57  ;;  %2752 = vst.msk [vmem:[%s3781_s15 + $0x78] sm:$0xff] %vm6119_vm11, %v1928_v47  ;;  %v2276_v22 = vmul.f32 %v2209_v38, %v6110_v12  ;;  %v2313_v53 = vmul.f32 %v2204_v25, %v6108_v6  ;;  %v2318_v45 = vmul.f32 %v2209_v38, %v6111_v48  ;;  %vm6124_vm13 = vmmov %vm6114_vm3 }
 0x1bb   : > { %v1244_v43 = vor.u32 %v6118_v7, %v1242_v20  ;;  %v1520_v20 = vadd.f32 0.04247222, %v1519_v35  ;;  %v2334_v50 = vmul.f32 %v2204_v25, %v1751_v11  ;;  %v2339_v29 = vmul.f32 %v2209_v38, %v1756_v58  ;;  %v6121_v11 = vld [vmem:[#allocation25_spill] sm:$0xff]  ;;  %vm6125_vm0 = vmmov %vm6114_vm3 }
 0x1bc   : > { %v4908_v62 = vmul.f32 %v4891_v49, %v4891_v49  ;;  %v4915_v30 = vadd.f32 %v1439_v16, %v1434_v55  ;;  %v2281_v54 = vadd.f32 %v2276_v22, %v2271_v10  ;;  %v2323_v57 = vadd.f32 %v2318_v45, %v2313_v53  ;;  %v6133_v45 = vld [vmem:[#allocation45_spill] sm:$0xff] }
 0x1bd   : > { %2684 = vst.msk [vmem:[%s4178_s20 + $0x40] sm:$0xff] %vm6120_vm7, %v1244_v43  ;;  %v1521_v6 = vmul.f32 %v1520_v20, %v4850_v19  ;;  %v2344_v48 = vadd.f32 %v2339_v29, %v2334_v50  ;;  %v1887_v58 = vmul.f32 %v6121_v11, %v6121_v11  ;;  %v4926_v55 = vand.u32 2147483647, %v6121_v11 }
 0x1be   : > { %v1970_v51 = vmul.f32 0.002785687, %v4908_v62  ;;  %v1449_v7 = vadd.f32 1e-08, %v4915_v30  ;;  %3165 = vrsqrt.f32 %v4915_v30  ;;  %vm2087_vm15 = vcmp.lt.s32.totalorder %v6121_v11, 0  ;;  %2772 = vst.msk [vmem:[%s3802_s18 + $0x78] sm:$0xff] %vm6123_vm14, %v2281_v54 }
 0x1bf   : > { %6122 = vst [vmem:[#allocation19_spill] sm:$0xff] %v4926_v55  ;;  %2782 = vst.msk [vmem:[%s3802_s18 + $0xc8] sm:$0xff] %vm6124_vm13, %v2323_v57  ;;  %v1522_v38 = vadd.f32 -0.074975304, %v1521_v6  ;;  %v1607_v16 = vmax.f32 %v4840_v17, %v4896_v52  ;;  %vm5890_vm10 = vcmp.lt.f32.partialorder %v6121_v11, 0.0  ;;  %vm2091_vm11 = vcmp.ne.f32.partialorder %v6121_v11, %v6121_v11 }
 0x1c0   : > { %v1971_v25 = vadd.f32 -0.015866, %v1970_v51  ;;  %2787 = vst.msk [vmem:[%s3802_s18 + $0xf0] sm:$0xff] %vm6125_vm0, %v2344_v48  ;;  %3167 = vrsqrt.f32 %v1449_v7  ;;  %vm1639_vm7 = vcmp.ne.f32.partialorder %v6117_v31, %v6117_v31  ;;  %vm1591_vm14 = vcmp.ne.f32.partialorder %v6072_v4, %v6072_v4 }
 0x1c1   : > { %v1523_v35 = vmul.f32 %v1522_v38, %v4850_v19  ;;  %3169 = vrcp.f32 %v1607_v16  ;;  %vm4951_vm13 = vmor %vm1638_vm8, %vm1639_vm7  ;;  %v6126_v47 = vmov 0  ;;  %vm1644_vm0 = vcmp.eq.s32.totalorder %v4840_v17, inf }
 0x1c2   : > { %v1972_v43 = vmul.f32 %v1971_v25, %v4908_v62  ;;  %v6127_v47 = vsel %vm4951_vm13, 4294967295, %v6126_v47  ;;  %vm1645_vm4 = vcmp.eq.s32.totalorder %v4896_v52, inf  ;;  %v4960_v10 = vsel %vm2087_vm15, 3.1415927, %v6067_v18 }
 0x1c3   : > { %6128 = vst [vmem:[#allocation7_spill] sm:$0xff] %v6127_v47  ;;  %6129 = vst [vmem:[#allocation8_spill] sm:$0xff] %v4960_v10  ;;  %v6130_v53 = vmov 0  ;;  %v1892_v20 = vmul.f32 %v6133_v45, %v6133_v45  ;;  %v4969_v50 = vand.u32 2147483647, %v6133_v45  ;;  %vm2092_vm8 = vcmp.ne.f32.partialorder %v6133_v45, %v6133_v45 }
 0x1c4   : > { %v1973_v22 = vadd.f32 0.04247222, %v1972_v43  ;;  %vm4962_vm2 = vmand %vm1644_vm0, %vm1645_vm4  ;;  %v4974_v29 = vsel %vm5890_vm10, 2.3561945, %v6069_v13  ;;  %v1524_v51 = vadd.f32 0.1064488, %v1523_v35 }
 0x1c5   : > { %v6131_v53 = vsel %vm4962_vm2, 4294967295, %v6130_v53  ;;  %6134 = vst [vmem:[#allocation13_spill] sm:$0xff] %v4969_v50  ;;  %6135 = vst [vmem:[#allocation15_spill] sm:$0xff] %v4974_v29  ;;  %vm2097_vm4 = vcmp.eq.s32.totalorder %v4926_v55, inf  ;;  %v4980_v57 = vadd.f32 %v1892_v20, %v1887_v58  ;;  %v2060_v48 = vmax.f32 %v4926_v55, %v4969_v50  ;;  %v6139_v58 = vld [vmem:[#allocation46_spill] sm:$0xff] }
 0x1c6   : > { %6132 = vst [vmem:[#allocation47_spill] sm:$0xff] %v6131_v53  ;;  %v1974_v54 = vmul.f32 %v1973_v22, %v4908_v62  ;;  %vm4989_vm15 = vmor %vm2091_vm11, %vm2092_vm8  ;;  %v6136_v7 = vmov 0  ;;  %v1525_v25 = vmul.f32 %v1524_v51, %v4850_v19  ;;  %vm2098_vm0 = vcmp.eq.s32.totalorder %v4969_v50, inf }
 0x1c7   : > { %v6137_v7 = vsel %vm4989_vm15, 4294967295, %v6136_v7  ;;  %v1438_v38 = vmul.f32 %v6139_v58, %v6139_v58  ;;  %v1902_v35 = vadd.f32 1e-08, %v4980_v57  ;;  %3171 = vrsqrt.f32 %v4980_v57  ;;  %vm5002_vm11 = vmand %vm2097_vm4, %vm2098_vm0 }
 0x1c8   : > { %6138 = vst [vmem:[#allocation16_spill] sm:$0xff] %v6137_v7  ;;  %v1975_v43 = vadd.f32 -0.074975304, %v1974_v54  ;;  %v6140_v22 = vmov 0  ;;  %v3166_v20 = vpop.eup %3165  ;;  %v1526_v51 = vadd.f32 -0.14207031, %v1525_v25  ;;  %3173 = vrcp.f32 %v2060_v48 }
 0x1c9   : > { %v6141_v22 = vsel %vm5002_vm11, 4294967295, %v6140_v22  ;;  %vm1485_vm8 = vcmp.eq.f32.partialorder %v4915_v30, inf  ;;  %vm1487_vm10 = vcmp.eq.f32.partialorder %v4915_v30, 0.0  ;;  %v1484_v16 = vmul.f32 %v3166_v20, %v4915_v30  ;;  %v6148_v7 = vld [vmem:[#allocation38_spill] sm:$0xff] }
 0x1ca   : > { %6142 = vst [vmem:[#allocation26_spill] sm:$0xff] %v6141_v22  ;;  %v1976_v6 = vmul.f32 %v1975_v43, %v4908_v62  ;;  %3175 = vrsqrt.f32 %v1902_v35  ;;  %v5011_v54 = vadd.f32 %v1438_v38, %v4652_v41  ;;  %v3168_v12 = vpop.eup %3167  ;;  %v1527_v13 = vmul.f32 %v1526_v51, %v4850_v19 }
 0x1cb   : > { %v1488_v18 = vand.u32 2147483648, %v4915_v30  ;;  %v5016_v25 = vand.u32 2147483647, %v6139_v58  ;;  %vm1592_vm4 = vcmp.ne.f32.partialorder %v6139_v58, %v6139_v58  ;;  %v1486_v43 = vsel %vm1485_vm8, %v4915_v30, %v1484_v16  ;;  %v3170_v20 = vpop.eup %3169  ;;  %vm6146_vm8 = vmmov %vm6114_vm3 }
 0x1cc   : > { %v1977_v48 = vadd.f32 0.1064488, %v1976_v6  ;;  %v5022_v35 = vmul.f32 %v3168_v12, %v6100_v14  ;;  %v5025_v41 = vmul.f32 %v3168_v12, %v6117_v31  ;;  %vm5030_vm0 = vmor %vm1591_vm14, %vm1592_vm4  ;;  %v6143_v38 = vmov 0 }
 0x1cd   : > { %v6144_v38 = vsel %vm5030_vm0, 4294967295, %v6143_v38  ;;  %v1528_v51 = vadd.f32 0.19993454, %v1527_v13  ;;  %v1489_v6 = vsel %vm1487_vm10, %v1488_v18, %v1486_v43  ;;  %v1448_v16 = vadd.f32 1e-08, %v5011_v54  ;;  %v6149_v13 = vld [vmem:[#allocation37_spill] sm:$0xff]  ;;  %vm6152_vm4 = vmmov %vm6114_vm3 }
 0x1ce   : > { %6145 = vst [vmem:[#allocation17_spill] sm:$0xff] %v6144_v38  ;;  %3177 = vrsqrt.f32 %v5011_v54  ;;  %v1978_v22 = vmul.f32 %v1977_v48, %v4908_v62  ;;  %2716 = vst.msk [vmem:[%s3781_s15 + $0x60] sm:$0xff] %vm6146_vm8, %v1489_v6  ;;  %v6147_v12 = vmin.f32 %v4840_v17, %v4896_v52  ;;  %v2252_v38 = vmul.f32 %v5022_v35, %v6148_v7  ;;  %v6150_v43 = vld [vmem:[#allocation40_spill] sm:$0xff]  ;;  %v6151_v48 = vld [vmem:[#allocation42_spill] sm:$0xff] }
 0x1cf   : > { %v2257_v30 = vmul.f32 %v5025_v41, %v6149_v13  ;;  %v1529_v18 = vmul.f32 %v1528_v51, %v4850_v19  ;;  %v2294_v10 = vmul.f32 %v5022_v35, %v6150_v43  ;;  %v2299_v6 = vmul.f32 %v5025_v41, %v6151_v48  ;;  %vm6153_vm8 = vmmov %vm6114_vm3 }
 0x1d0   : > { %v5044_v29 = vmul.f32 %v3170_v20, %v6147_v12  ;;  %vm1938_vm10 = vcmp.eq.f32.partialorder %v4980_v57, inf  ;;  %v1979_v53 = vadd.f32 -0.14207031, %v1978_v22  ;;  %3179 = vrsqrt.f32 %v1448_v16  ;;  %vm6158_vm7 = vmmov %vm6153_vm8 }
 0x1d1   : > { %v2262_v12 = vadd.f32 %v2257_v30, %v2252_v38  ;;  %v1530_v39 = vadd.f32 -0.33333147, %v1529_v18  ;;  %v2304_v47 = vadd.f32 %v2299_v6, %v2294_v10  ;;  %vm1940_vm14 = vcmp.eq.f32.partialorder %v4980_v57, 0.0  ;;  %v3172_v61 = vpop.eup %3171 }
 0x1d2   : > { %v5058_v20 = vmul.f32 %v5044_v29, %v5044_v29  ;;  %v1941_v51 = vand.u32 2147483648, %v4980_v57  ;;  %v1980_v14 = vmul.f32 %v1979_v53, %v4908_v62  ;;  %v1560_v38 = vmax.f32 %v4655_v15, %v5016_v25  ;;  %v3174_v16 = vpop.eup %3173 }
 0x1d3   : > { %2769 = vst.msk [vmem:[%s3802_s18 + $0x60] sm:$0xff] %vm6152_vm4, %v2262_v12  ;;  %v1531_v10 = vmul.f32 %v1530_v39, %v4850_v19  ;;  %v1937_v30 = vmul.f32 %v3172_v61, %v4980_v57  ;;  %vm1597_vm3 = vcmp.eq.s32.totalorder %v4655_v15, inf  ;;  %v6154_v12 = vmin.f32 %v4926_v55, %v4969_v50 }
 0x1d4   : > { %v1611_v17 = vmul.f32 0.002785687, %v5058_v20  ;;  %2779 = vst.msk [vmem:[%s3802_s18 + $0xb0] sm:$0xff] %vm6153_vm8, %v2304_v47  ;;  %v3176_v53 = vpop.eup %3175  ;;  %v1981_v18 = vadd.f32 0.19993454, %v1980_v14  ;;  %vm1478_vm4 = vcmp.eq.f32.partialorder %v5011_v54, inf  ;;  %3181 = vrcp.f32 %v1560_v38 }
 0x1d5   : > { %v5080_v22 = vmul.f32 %v3174_v16, %v6154_v12  ;;  %v1532_v19 = vmul.f32 %v1531_v10, %v4832_v3  ;;  %v1939_v61 = vsel %vm1938_vm10, %v4980_v57, %v1937_v30  ;;  %v2206_v39 = vmul.f32 %v3176_v53, %v6121_v11  ;;  %vm6155_vm10 = vmmov %vm6153_vm8 }
 0x1d6   : > { %v1612_v6 = vadd.f32 -0.015866, %v1611_v17  ;;  %v2211_v14 = vmul.f32 %v3176_v53, %v6133_v45  ;;  %v1982_v17 = vmul.f32 %v1981_v18, %v4908_v62  ;;  %v1942_v16 = vsel %vm1940_vm14, %v1941_v51, %v1939_v61 }
 0x1d7   : > { %v5096_v38 = vmul.f32 %v5080_v22, %v5080_v22  ;;  %v1533_v30 = vadd.f32 %v1532_v19, %v4832_v3  ;;  %2754 = vst.msk [vmem:[%s3781_s15 + $0x88] sm:$0xff] %vm6155_vm10, %v1942_v16  ;;  %v2273_v53 = vmul.f32 %v2206_v39, %v6148_v7  ;;  %v2336_v50 = vmul.f32 %v2206_v39, %v5022_v35  ;;  %vm6157_vm10 = vmmov %vm6153_vm8 }
 0x1d8   : > { %v1613_v47 = vmul.f32 %v1612_v6, %v5058_v20  ;;  %v3178_v10 = vpop.eup %3177  ;;  %v2278_v18 = vmul.f32 %v2211_v14, %v6149_v13  ;;  %v2315_v6 = vmul.f32 %v2206_v39, %v6150_v43  ;;  %v1983_v57 = vadd.f32 -0.33333147, %v1982_v17 }
 0x1d9   : > { %v2064_v12 = vmul.f32 0.002785687, %v5096_v38  ;;  %v2320_v61 = vmul.f32 %v2211_v14, %v6151_v48  ;;  %v1535_v11 = vsub.f32 1.5707964, %v1533_v30  ;;  %v2341_v3 = vmul.f32 %v2211_v14, %v5025_v41 }
 0x1da   : > { %v1614_v51 = vadd.f32 0.04247222, %v1613_v47  ;;  %v2283_v55 = vadd.f32 %v2278_v18, %v2273_v53  ;;  %v3180_v19 = vpop.eup %3179  ;;  %v1984_v7 = vmul.f32 %v1983_v57, %v4908_v62  ;;  %vm6156_vm14 = vcmp.gt.f32.partialorder %v4689_v34, %v4681_v46 }
 0x1db   : > { %v2065_v43 = vadd.f32 -0.015866, %v2064_v12  ;;  %v2325_v17 = vadd.f32 %v2320_v61, %v2315_v6  ;;  %v1536_v47 = vsel %vm6156_vm14, %v1535_v11, %v1533_v30  ;;  %v2346_v48 = vadd.f32 %v2341_v3, %v2336_v50 }
 0x1dc   : > { %v1615_v13 = vmul.f32 %v1614_v51, %v5058_v20  ;;  %2774 = vst.msk [vmem:[%s3802_s18 + $0x88] sm:$0xff] %vm6157_vm10, %v2283_v55  ;;  %v1477_v35 = vmul.f32 %v3178_v10, %v5011_v54  ;;  %vm1598_vm9 = vcmp.eq.s32.totalorder %v5016_v25, inf  ;;  %v1538_v41 = vsub.f32 3.1415927, %v1536_v47  ;;  %vm6161_vm10 = vmmov %vm6158_vm7 }
 0x1dd   : > { %v1985_v39 = vmul.f32 %v1984_v7, %v4891_v49  ;;  %v2066_v14 = vmul.f32 %v2065_v43, %v5096_v38  ;;  %2784 = vst.msk [vmem:[%s3802_s18 + $0xd8] sm:$0xff] %vm6158_vm7, %v2325_v17  ;;  %vm5124_vm8 = vmand %vm1597_vm3, %vm1598_vm9  ;;  %vm1995_vm14 = vcmp.eq.f32.partialorder %v6088_v63, 0.0  ;;  %v1481_v11 = vand.u32 2147483648, %v5011_v54 }
 0x1de   : > { %v1616_v62 = vadd.f32 -0.074975304, %v1615_v13  ;;  %2789 = vst.msk [vmem:[%s3802_s18 + $0x100] sm:$0xff] %vm6161_vm10, %v2346_v48  ;;  %v1479_v34 = vsel %vm1478_vm4, %v5011_v54, %v1477_v35  ;;  %v5136_v55 = vmul.f32 %v3180_v19, %v6072_v4  ;;  %v5139_v50 = vmul.f32 %v3180_v19, %v6139_v58  ;;  %v3182_v16 = vpop.eup %3181  ;;  %vm6166_vm4 = vmmov %vm6161_vm10 }
 0x1df   : > { %vm6162_vm9 = vcmp.lt.f32.partialorder %v6078_v37, 0.0  ;;  %v1986_v30 = vadd.f32 %v1985_v39, %v4891_v49  ;;  %v2067_v18 = vadd.f32 0.04247222, %v2066_v14  ;;  %vm6163_vm3 = vcmp.eq.f32.partialorder %v6079_v21, 0.0 }
 0x1e0   : > { %v1539_v10 = vsel %vm6162_vm9, %v1538_v41, %v1536_v47  ;;  %v1617_v53 = vmul.f32 %v1616_v62, %v5058_v20  ;;  %vm6164_vm7 = vcmp.eq.f32.partialorder %v5011_v54, 0.0  ;;  %v6165_v51 = vmin.f32 %v4655_v15, %v5016_v25  ;;  %vm6170_vm9 = vmmov %vm6166_vm4 }
 0x1e1   : > { %v1543_v6 = vsel %vm6163_vm3, %v4789_v24, %v1539_v10  ;;  %v1482_v57 = vsel %vm6164_vm7, %v1481_v11, %v1479_v34  ;;  %v2251_v37 = vmul.f32 %v5136_v55, %v4055_v36  ;;  %v1988_v61 = vsub.f32 1.5707964, %v1986_v30  ;;  %vm6171_vm3 = vmmov %vm6166_vm4 }
 0x1e2   : > { %v5153_v12 = vmul.f32 %v3182_v16, %v6165_v51  ;;  %v1547_v49 = vsel %vm4708_vm5, nan, %v1543_v6  ;;  %v1618_v3 = vadd.f32 0.1064488, %v1617_v53  ;;  %v2068_v19 = vmul.f32 %v2067_v18, %v5096_v38  ;;  %2715 = vst.msk [vmem:[%s3781_s15 + $0x58] sm:$0xff] %vm6166_vm4, %v1482_v57  ;;  %vm6172_vm7 = vmmov %vm6171_vm3 }
 0x1e3   : > { %v1553_v24 = vsel %vm4737_vm12, %v4794_v9, %v1547_v49  ;;  %v2256_v7 = vmul.f32 %v5139_v50, %v4052_v8  ;;  %v2293_v23 = vmul.f32 %v5136_v55, %v4172_v40  ;;  %vm6167_vm5 = vcmp.gt.f32.partialorder %v4749_v59, %v4729_v5 }
 0x1e4   : > { %v5167_v54 = vmul.f32 %v5153_v12, %v5153_v12  ;;  %v1554_v13 = vand.u32 2147483647, %v1553_v24  ;;  %v1989_v43 = vsel %vm6167_vm5, %v1988_v61, %v1986_v30  ;;  %v1619_v17 = vmul.f32 %v1618_v3, %v5058_v20  ;;  %v6173_v3 = vld [vmem:[#allocation36_spill] sm:$0xff] }
 0x1e5   : > { %v2069_v56 = vadd.f32 -0.074975304, %v2068_v19  ;;  %v1991_v9 = vsub.f32 3.1415927, %v1989_v43  ;;  %v2261_v48 = vadd.f32 %v2256_v7, %v2251_v37  ;;  %v2298_v35 = vmul.f32 %v5139_v50, %v4203_v32 }
 0x1e6   : > { %v1564_v47 = vmul.f32 0.002785687, %v5167_v54  ;;  %v6168_v41 = vand.u32 2147483648, %v6079_v21  ;;  %v1620_v62 = vadd.f32 -0.14207031, %v1619_v17  ;;  %v1891_v5 = vmul.f32 %v4254_v2, %v4254_v2 }
 0x1e7   : > { %v2070_v14 = vmul.f32 %v2069_v56, %v5096_v38  ;;  %vm2044_vm12 = vcmp.ne.f32.partialorder %v6073_v33, %v6073_v33  ;;  %vm6169_vm10 = vcmp.lt.f32.partialorder %v6084_v0, 0.0  ;;  %2768 = vst.msk [vmem:[%s3802_s18 + $0x58] sm:$0xff] %vm6170_vm9, %v2261_v48  ;;  %v2303_v11 = vadd.f32 %v2298_v35, %v2293_v23 }
 0x1e8   : > { %v1556_v39 = vor.u32 %v6168_v41, %v1554_v13  ;;  %v1992_v59 = vsel %vm6169_vm10, %v1991_v9, %v1989_v43  ;;  %v1565_v34 = vadd.f32 -0.015866, %v1564_v47  ;;  %v5192_v21 = vand.u32 2147483647, %v4254_v2  ;;  %v6175_v43 = vld [vmem:[#allocation39_spill] sm:$0xff] }
 0x1e9   : > { %v1996_v16 = vsel %vm1995_vm14, %v4802_v1, %v1992_v59  ;;  %v1621_v10 = vmul.f32 %v1620_v62, %v5058_v20  ;;  %v2071_v30 = vadd.f32 0.1064488, %v2070_v14  ;;  %v5201_v53 = vadd.f32 %v1891_v5, %v4668_v44  ;;  %2778 = vst.msk [vmem:[%s3802_s18 + $0xa8] sm:$0xff] %vm6172_vm7, %v2303_v11  ;;  %vm6174_vm14 = vmmov %vm6171_vm3 }
 0x1ea   : > { %2719 = vst.msk [vmem:[%s4178_s20 + $0x50] sm:$0xff] %vm6171_vm3, %v1556_v39  ;;  %v2000_v0 = vsel %vm4756_vm6, nan, %v1996_v16  ;;  %v1566_v18 = vmul.f32 %v1565_v34, %v5167_v54  ;;  %v2012_v6 = vmin.f32 %v4671_v42, %v5192_v21  ;;  %v2013_v57 = vmax.f32 %v4671_v42, %v5192_v21 }
 0x1eb   : > { %v2006_v1 = vsel %vm4773_vm1, %v4810_v28, %v2000_v0  ;;  %v1622_v51 = vadd.f32 0.19993454, %v1621_v10  ;;  %v2072_v44 = vmul.f32 %v2071_v30, %v5096_v38  ;;  %v1901_v26 = vadd.f32 1e-08, %v5201_v53 }
 0x1ec   : > { %v2007_v37 = vand.u32 2147483647, %v2006_v1  ;;  %v2008_v49 = vand.u32 2147483648, %v6088_v63  ;;  %v1567_v61 = vadd.f32 0.04247222, %v1566_v18  ;;  %3183 = vrsqrt.f32 %v5201_v53 }
 0x1ed   : > { %v1436_v19 = vmul.f32 %v6173_v3, %v6173_v3  ;;  %v1623_v24 = vmul.f32 %v1622_v51, %v5058_v20  ;;  %v2073_v7 = vadd.f32 -0.14207031, %v2072_v44  ;;  %3185 = vrsqrt.f32 %v1901_v26 }
 0x1ee   : > { %v2009_v28 = vor.u32 %v2008_v49, %v2007_v37  ;;  %v5223_v27 = vand.u32 2147483647, %v6173_v3  ;;  %v1568_v23 = vmul.f32 %v1567_v61, %v5167_v54  ;;  %3187 = vrcp.f32 %v2013_v57 }
 0x1ef   : > { %vm1732_vm6 = vcmp.ne.f32.partialorder %v6173_v3, %v6173_v3  ;;  %v1624_v63 = vadd.f32 -0.33333147, %v1623_v24  ;;  %v2074_v13 = vmul.f32 %v2073_v7, %v5096_v38  ;;  %v5235_v17 = vmul.f32 %v6175_v43, %v6175_v43 }
 0x1f0   : > { %2757 = vst.msk [vmem:[%s4178_s20 + $0x78] sm:$0xff] %vm6174_vm14, %v2009_v28  ;;  %v1569_v56 = vadd.f32 -0.074975304, %v1568_v23  ;;  %vm2045_vm4 = vcmp.ne.f32.partialorder %v4254_v2, %v4254_v2  ;;  %vm2051_vm5 = vcmp.eq.s32.totalorder %v5192_v21, inf  ;;  %vm2050_vm9 = vcmp.eq.s32.totalorder %v4671_v42, inf  ;;  %v6182_v28 = vld [vmem:[#allocation44_spill] sm:$0xff] }
 0x1f1   : > { %v1625_v9 = vmul.f32 %v1624_v63, %v5058_v20  ;;  %v2075_v47 = vadd.f32 0.19993454, %v2074_v13  ;;  %vm5244_vm10 = vmor %vm2044_vm12, %vm2045_vm4  ;;  %v1441_v35 = vmul.f32 %v4472_v60, %v4472_v60  ;;  %v1649_v41 = vand.u32 2147483648, %v6117_v31 }
 0x1f2   : > { %v1570_v39 = vmul.f32 %v1569_v56, %v5167_v54  ;;  %vm5253_vm3 = vmand %vm2050_vm9, %vm2051_vm5  ;;  %v5258_v20 = vand.u32 2147483647, %v4472_v60  ;;  %vm1733_vm12 = vcmp.ne.f32.partialorder %v4472_v60, %v4472_v60  ;;  %v2102_v59 = vand.u32 2147483648, %v6133_v45 }
 0x1f3   : > { %v1626_v14 = vmul.f32 %v1625_v9, %v5044_v29  ;;  %v2076_v5 = vmul.f32 %v2075_v47, %v5096_v38  ;;  %v5265_v34 = vadd.f32 %v1441_v35, %v1436_v19  ;;  %vm5270_vm7 = vmor %vm1732_vm6, %vm1733_vm12  ;;  %vm1636_vm14 = vcmp.eq.f32.partialorder %v6117_v31, 0.0 }
 0x1f4   : > { %v1571_v16 = vadd.f32 0.1064488, %v1570_v39  ;;  %v1700_v10 = vmin.f32 %v5223_v27, %v5258_v20  ;;  %v1701_v30 = vmax.f32 %v5223_v27, %v5258_v20  ;;  %vm1931_vm6 = vcmp.eq.f32.partialorder %v5201_v53, inf }
 0x1f5   : > { %v1627_v0 = vadd.f32 %v1626_v14, %v5044_v29  ;;  %v2077_v18 = vadd.f32 -0.33333147, %v2076_v5  ;;  %v1451_v57 = vadd.f32 1e-08, %v5265_v34  ;;  %3189 = vrsqrt.f32 %v5265_v34 }
 0x1f6   : > { %v3184_v1 = vpop.eup %3183  ;;  %v1572_v51 = vmul.f32 %v1571_v16, %v5167_v54  ;;  %vm1933_vm5 = vcmp.eq.f32.partialorder %v5201_v53, 0.0  ;;  %v1934_v44 = vand.u32 2147483648, %v5201_v53  ;;  %vm1738_vm9 = vcmp.eq.s32.totalorder %v5223_v27, inf }
 0x1f7   : > { %v3186_v26 = vpop.eup %3185  ;;  %v1629_v37 = vsub.f32 1.5707964, %v1627_v0  ;;  %v2078_v49 = vmul.f32 %v2077_v18, %v5096_v38  ;;  %v1930_v29 = vmul.f32 %v3184_v1, %v5201_v53  ;;  %3191 = vrsqrt.f32 %v1451_v57 }
 0x1f8   : > { %v3188_v61 = vpop.eup %3187  ;;  %v1573_v19 = vadd.f32 -0.14207031, %v1572_v51  ;;  %v2205_v24 = vmul.f32 %v3186_v26, %v6073_v33  ;;  %v2210_v7 = vmul.f32 %v3186_v26, %v4254_v2  ;;  %3193 = vrcp.f32 %v1701_v30  ;;  %v6187_v30 = vld [vmem:[#allocation3_spill] sm:$0xff] }
 0x1f9   : > { %vm6183_vm12 = vcmp.gt.f32.partialorder %v4896_v52, %v6182_v28  ;;  %v2079_v63 = vmul.f32 %v2078_v49, %v5080_v22  ;;  %v1932_v38 = vsel %vm1931_vm6, %v5201_v53, %v1930_v29  ;;  %v5303_v13 = vmul.f32 %v3188_v61, %v2012_v6  ;;  %v6185_v53 = vld [vmem:[#allocation21_spill] sm:$0xff]  ;;  %v6192_v61 = vld [vmem:[#allocation19_spill] sm:$0xff] }
 0x1fa   : > { %v1630_v23 = vsel %vm6183_vm12, %v1629_v37, %v1627_v0  ;;  %vm2089_vm4 = vcmp.eq.f32.partialorder %v6133_v45, 0.0  ;;  %v1574_v9 = vmul.f32 %v1573_v19, %v5167_v54  ;;  %v1935_v52 = vsel %vm1933_vm5, %v1934_v44, %v1932_v38  ;;  %v6189_v37 = vld [vmem:[#allocation11_spill] sm:$0xff]  ;;  %v6191_v29 = vld [vmem:[#allocation13_spill] sm:$0xff] }
 0x1fb   : > { %v1632_v56 = vsub.f32 3.1415927, %v1630_v23  ;;  %v2272_v47 = vmul.f32 %v2205_v24, %v4055_v36  ;;  %vm1499_vm12 = vcmp.eq.f32.partialorder %v5265_v34, inf  ;;  %v2080_v35 = vadd.f32 %v2079_v63, %v5080_v22 }
 0x1fc   : > { %vm6184_vm6 = vcmask 121856   ;;  %v5316_v6 = vmul.f32 %v5303_v13, %v5303_v13  ;;  %v2277_v39 = vmul.f32 %v2210_v7, %v4052_v8  ;;  %v2314_v14 = vmul.f32 %v2205_v24, %v4172_v40 }
 0x1fd   : > { %2753 = vst.msk [vmem:[%s3781_s15 + $0x80] sm:$0xff] %vm6184_vm6, %v1935_v52  ;;  %vm6186_vm5 = vcmp.lt.f32.partialorder %v6185_v53, 0.0  ;;  %v1575_v36 = vadd.f32 0.19993454, %v1574_v9  ;;  %v2319_v16 = vmul.f32 %v2210_v7, %v4203_v32  ;;  %v2335_v22 = vmul.f32 %v2205_v24, %v5136_v55  ;;  %v6198_v53 = vld [vmem:[#allocation25_spill] sm:$0xff] }
 0x1fe   : > { %v1633_v5 = vsel %vm6186_vm5, %v1632_v56, %v1630_v23  ;;  %v2082_v18 = vsub.f32 1.5707964, %v2080_v35  ;;  %v2017_v8 = vmul.f32 0.002785687, %v5316_v6  ;;  %v2282_v40 = vadd.f32 %v2277_v39, %v2272_v47  ;;  %v6197_v47 = vld [vmem:[#allocation4_spill] sm:$0xff] }
 0x1ff   : > { %v1637_v0 = vsel %vm1636_vm14, %v6187_v30, %v1633_v5  ;;  %v1576_v51 = vmul.f32 %v1575_v36, %v5167_v54  ;;  %v2324_v44 = vadd.f32 %v2319_v16, %v2314_v14  ;;  %v2340_v26 = vmul.f32 %v2210_v7, %v5139_v50  ;;  %v3190_v32 = vpop.eup %3189 }
 0x200   : > { %v1641_v1 = vsel %vm4951_vm13, nan, %v1637_v0  ;;  %vm6193_vm14 = vcmp.gt.f32.partialorder %v6191_v29, %v6192_v61  ;;  %v2018_v24 = vadd.f32 -0.015866, %v2017_v8  ;;  %2773 = vst.msk [vmem:[%s3802_s18 + $0x80] sm:$0xff] %vm6184_vm6, %v2282_v40  ;;  %vm1739_vm5 = vcmp.eq.s32.totalorder %v5258_v20, inf  ;;  %vm6194_vm13 = vmmov %vm6184_vm6  ;;  %v6210_v61 = vld [vmem:[#allocation32_spill] sm:$0xff] }
 0x201   : > { %v1647_v49 = vsel %vm4962_vm2, %v6189_v37, %v1641_v1  ;;  %v2083_v19 = vsel %vm6193_vm14, %v2082_v18, %v2080_v35  ;;  %v1577_v63 = vadd.f32 -0.33333147, %v1576_v51  ;;  %2783 = vst.msk [vmem:[%s3802_s18 + $0xd0] sm:$0xff] %vm6194_vm13, %v2324_v44  ;;  %v2345_v50 = vadd.f32 %v2340_v26, %v2335_v22  ;;  %vm5346_vm1 = vmand %vm1738_vm9, %vm1739_vm5  ;;  %v3192_v38 = vpop.eup %3191  ;;  %v6201_v22 = vld [vmem:[#allocation8_spill] sm:$0xff]  ;;  %v6205_v1 = vld [vmem:[#allocation15_spill] sm:$0xff] }
 0x202   : > { %v1648_v28 = vand.u32 2147483647, %v1647_v49  ;;  %v2085_v23 = vsub.f32 3.1415927, %v2083_v19  ;;  %v2019_v56 = vmul.f32 %v2018_v24, %v5316_v6  ;;  %v1498_v9 = vmul.f32 %v3190_v32, %v5265_v34  ;;  %v3194_v39 = vpop.eup %3193  ;;  %vm6200_vm9 = vmmov %vm6184_vm6  ;;  %v6208_v32 = vld [vmem:[#allocation9_spill] sm:$0xff]  ;;  %v6209_v49 = vld [vmem:[#allocation31_spill] sm:$0xff] }
 0x203   : > { %v1502_v52 = vand.u32 2147483648, %v5265_v34  ;;  %v1894_v35 = vmul.f32 %v6197_v47, %v6197_v47  ;;  %vm6199_vm2 = vcmp.lt.f32.partialorder %v6198_v53, 0.0  ;;  %v1578_v36 = vmul.f32 %v1577_v63, %v5167_v54  ;;  %2788 = vst.msk [vmem:[%s3802_s18 + $0xf8] sm:$0xff] %vm6200_vm9, %v2345_v50  ;;  %vm6202_vm14 = vmmov %vm6184_vm6  ;;  %v6218_v54 = vld [vmem:[#allocation10_spill] sm:$0xff] }
 0x204   : > { %v1650_v14 = vor.u32 %v1649_v41, %v1648_v28  ;;  %v2086_v5 = vsel %vm6199_vm2, %v2085_v23, %v2083_v19  ;;  %v5363_v16 = vmul.f32 %v3192_v38, %v6173_v3  ;;  %v2020_v0 = vadd.f32 0.04247222, %v2019_v56  ;;  %v6211_v23 = vld [vmem:[#allocation22_spill] sm:$0xff] }
 0x205   : > { %v2090_v30 = vsel %vm2089_vm4, %v6201_v22, %v2086_v5  ;;  %v1500_v31 = vsel %vm1499_vm12, %v5265_v34, %v1498_v9  ;;  %v5374_v41 = vmul.f32 %v3194_v39, %v1700_v10  ;;  %v1579_v8 = vmul.f32 %v1578_v36, %v5153_v12  ;;  %v6212_v5 = vld [vmem:[#allocation18_spill] sm:$0xff] }
 0x206   : > { %2721 = vst.msk [vmem:[%s4178_s20 + $0x60] sm:$0xff] %vm6202_vm14, %v1650_v14  ;;  %v2094_v18 = vsel %vm4989_vm15, nan, %v2090_v30  ;;  %vm6204_vm6 = vcmp.eq.f32.partialorder %v5265_v34, 0.0  ;;  %v5384_v57 = vmul.f32 %v3192_v38, %v4472_v60  ;;  %v2021_v10 = vmul.f32 %v2020_v0, %v5316_v6  ;;  %vm6213_vm15 = vmmov %vm6200_vm9 }
 0x207   : > { %v1503_v40 = vsel %vm6204_vm6, %v1502_v52, %v1500_v31  ;;  %v2100_v44 = vsel %vm5002_vm11, %v6205_v1, %v2094_v18  ;;  %vm6207_vm4 = vcmask 114688   ;;  %v5394_v26 = vmul.f32 %v5374_v41, %v5374_v41 }
 0x208   : > { %2718 = vst.msk [vmem:[%s3781_s15 + $0x70] sm:$0x1] %vm6207_vm4, %v1503_v40  ;;  %v2254_v37 = vmul.f32 %v5363_v16, %v6208_v32  ;;  %v2101_v34 = vand.u32 2147483647, %v2100_v44  ;;  %v1580_v55 = vadd.f32 %v1579_v8, %v5153_v12  ;;  %v2259_v29 = vmul.f32 %v5384_v57, %v6209_v49  ;;  %vm6215_vm12 = vmmov %vm6207_vm4  ;;  %v6222_v44 = vld [vmem:[#allocation20_spill] sm:$0xff] }
 0x209   : > { %v2296_v19 = vmul.f32 %v5363_v16, %v6210_v61  ;;  %v2022_v24 = vadd.f32 -0.074975304, %v2021_v10  ;;  %v1705_v28 = vmul.f32 0.002785687, %v5394_v26  ;;  %v2301_v63 = vmul.f32 %v5384_v57, %v6211_v23  ;;  %vm6216_vm5 = vmmov %vm6207_vm4 }
 0x20a   : > { %v5407_v50 = vadd.f32 %v1894_v35, %v5235_v17  ;;  %v2103_v12 = vor.u32 %v2102_v59, %v2101_v34  ;;  %v1582_v38 = vsub.f32 1.5707964, %v1580_v55  ;;  %v2264_v56 = vadd.f32 %v2259_v29, %v2254_v37  ;;  %v6223_v37 = vld [vmem:[#allocation5_spill] sm:$0xff]  ;;  %v6226_v29 = vld [vmem:[#allocation35_spill] sm:$0xff] }
 0x20b   : > { %v5412_v9 = vand.u32 2147483647, %v6197_v47  ;;  %v2023_v52 = vmul.f32 %v2022_v24, %v5316_v6  ;;  %v1706_v39 = vadd.f32 -0.015866, %v1705_v28  ;;  %v2306_v14 = vadd.f32 %v2301_v63, %v2296_v19 }
 0x20c   : > { %v1904_v53 = vadd.f32 1e-08, %v5407_v50  ;;  %v5417_v36 = vand.u32 2147483647, %v6212_v5  ;;  %v5420_v17 = vand.u32 2147483647, %v6175_v43  ;;  %vm6214_vm11 = vcmp.gt.f32.partialorder %v5016_v25, %v4655_v15 }
 0x20d   : > { %2759 = vst.msk [vmem:[%s4178_s20 + $0x88] sm:$0xff] %vm6213_vm15, %v2103_v12  ;;  %v1583_v45 = vsel %vm6214_vm11, %v1582_v38, %v1580_v55  ;;  %3195 = vrsqrt.f32 %v5407_v50  ;;  %v2024_v35 = vadd.f32 0.1064488, %v2023_v52  ;;  %v1707_v22 = vmul.f32 %v1706_v39, %v5394_v26 }
 0x20e   : > { %2771 = vst.msk [vmem:[%s3802_s18 + $0x70] sm:$0x1] %vm6215_vm12, %v2264_v56  ;;  %v1585_v59 = vsub.f32 3.1415927, %v1583_v45  ;;  %3197 = vrsqrt.f32 %v1904_v53  ;;  %vm2185_vm13 = vcmp.ne.f32.partialorder %v6175_v43, %v6175_v43  ;;  %v2153_v30 = vmin.f32 %v5420_v17, %v5412_v9  ;;  %v6227_v56 = vld [vmem:[#allocation6_spill] sm:$0xff] }
 0x20f   : > { %2781 = vst.msk [vmem:[%s3802_s18 + $0xc0] sm:$0x1] %vm6216_vm5, %v2306_v14  ;;  %v2154_v15 = vmax.f32 %v5420_v17, %v5412_v9  ;;  %vm2175_vm2 = vcmp.gt.f32.partialorder %v5412_v9, %v5420_v17  ;;  %vm6217_vm9 = vcmp.lt.f32.partialorder %v6072_v4, 0.0  ;;  %vm1589_vm14 = vcmp.eq.f32.partialorder %v6139_v58, 0.0 }
 0x210   : > { %v1586_v25 = vsel %vm6217_vm9, %v1585_v59, %v1583_v45  ;;  %v2025_v0 = vmul.f32 %v2024_v35, %v5316_v6  ;;  %v1708_v31 = vadd.f32 0.04247222, %v1707_v22  ;;  %vm2186_vm6 = vcmp.ne.f32.partialorder %v6197_v47, %v6197_v47 }
 0x211   : > { %v1590_v18 = vsel %vm1589_vm14, %v6218_v54, %v1586_v25  ;;  %3199 = vrcp.f32 %v2154_v15  ;;  %vm2191_vm4 = vcmp.eq.s32.totalorder %v5420_v17, inf  ;;  %vm5455_vm15 = vmor %vm2185_vm13, %vm2186_vm6  ;;  %vm2192_vm11 = vcmp.eq.s32.totalorder %v5412_v9, inf }
 0x212   : > { %v1594_v40 = vsel %vm5030_vm0, nan, %v1590_v18  ;;  %v2026_v1 = vadd.f32 -0.14207031, %v2025_v0  ;;  %v1709_v4 = vmul.f32 %v1708_v31, %v5394_v26  ;;  %v5462_v10 = vmul.f32 %v6222_v44, %v6222_v44  ;;  %vm5467_vm0 = vmand %vm2191_vm4, %vm2192_vm11 }
 0x213   : > { %v1600_v34 = vsel %vm5124_vm8, %v6223_v37, %v1594_v40  ;;  %v1440_v19 = vmul.f32 %v6226_v29, %v6226_v29  ;;  %v5474_v24 = vand.u32 2147483647, %v6226_v29  ;;  %v1602_v63 = vand.u32 2147483648, %v6139_v58 }
 0x214   : > { %v1601_v28 = vand.u32 2147483647, %v1600_v34  ;;  %v2027_v12 = vmul.f32 %v2026_v1, %v5316_v6  ;;  %v1710_v38 = vadd.f32 -0.074975304, %v1709_v4  ;;  %v5488_v14 = vand.u32 2147483647, %v6222_v44 }
 0x215   : > { %v5479_v46 = vadd.f32 %v1440_v19, %v6227_v56  ;;  %v1653_v52 = vmin.f32 %v5417_v36, %v5474_v24  ;;  %v1654_v39 = vmax.f32 %v5417_v36, %v5474_v24  ;;  %vm1952_vm12 = vcmp.eq.f32.partialorder %v5407_v50, inf }
 0x216   : > { %v1603_v58 = vor.u32 %v1602_v63, %v1601_v28  ;;  %v2028_v53 = vadd.f32 0.19993454, %v2027_v12  ;;  %v1711_v45 = vmul.f32 %v1710_v38, %v5394_v26  ;;  %vm1954_vm5 = vcmp.eq.f32.partialorder %v5407_v50, 0.0 }
 0x217   : > { %v3196_v59 = vpop.eup %3195  ;;  %v1450_v35 = vadd.f32 1e-08, %v5479_v46  ;;  %3201 = vrsqrt.f32 %v5479_v46  ;;  %vm6228_vm13 = vcmask 121856   ;;  %v1955_v31 = vand.u32 2147483648, %v5407_v50 }
 0x218   : > { %v3198_v22 = vpop.eup %3197  ;;  %2720 = vst.msk [vmem:[%s4178_s20 + $0x58] sm:$0xff] %vm6228_vm13, %v1603_v58  ;;  %v2029_v15 = vmul.f32 %v2028_v53, %v5316_v6  ;;  %v1712_v25 = vadd.f32 0.1064488, %v1711_v45  ;;  %v1951_v0 = vmul.f32 %v3196_v59, %v5407_v50  ;;  %vm1685_vm9 = vcmp.ne.f32.partialorder %v6212_v5, %v6212_v5 }
 0x219   : > { %v2208_v54 = vmul.f32 %v3198_v22, %v6175_v43  ;;  %v2213_v18 = vmul.f32 %v3198_v22, %v6197_v47  ;;  %3203 = vrsqrt.f32 %v1450_v35  ;;  %vm6229_vm14 = vcmask 114688   ;;  %v6236_v35 = vld [vmem:[#allocation41_spill] sm:$0xff] }
 0x21a   : > { %v2030_v8 = vadd.f32 -0.33333147, %v2029_v15  ;;  %v1713_v40 = vmul.f32 %v1712_v25, %v5394_v26  ;;  %v1953_v1 = vsel %vm1952_vm12, %v5407_v50, %v1951_v0  ;;  %3205 = vrcp.f32 %v1654_v39  ;;  %vm6232_vm12 = vmmov %vm6229_vm14 }
 0x21b   : > { %v3200_v4 = vpop.eup %3199  ;;  %v1956_v37 = vsel %vm1954_vm5, %v1955_v31, %v1953_v1  ;;  %v2275_v34 = vmul.f32 %v2208_v54, %v6208_v32  ;;  %v2280_v19 = vmul.f32 %v2213_v18, %v6209_v49  ;;  %v2317_v28 = vmul.f32 %v2208_v54, %v6210_v61 }
 0x21c   : > { %v2031_v63 = vmul.f32 %v2030_v8, %v5316_v6  ;;  %v1714_v12 = vadd.f32 -0.14207031, %v1713_v40  ;;  %2756 = vst.msk [vmem:[%s3781_s15 + $0x98] sm:$0x1] %vm6229_vm14, %v1956_v37  ;;  %v5516_v38 = vmul.f32 %v3200_v4, %v2153_v30  ;;  %v2322_v56 = vmul.f32 %v2213_v18, %v6211_v23 }
 0x21d   : > { %v2285_v39 = vadd.f32 %v2280_v19, %v2275_v34  ;;  %v2338_v50 = vmul.f32 %v2208_v54, %v5363_v16  ;;  %v2343_v58 = vmul.f32 %v2213_v18, %v5384_v57  ;;  %vm1686_vm6 = vcmp.ne.f32.partialorder %v6226_v29, %v6226_v29 }
 0x21e   : > { %v2032_v32 = vmul.f32 %v2031_v63, %v5303_v13  ;;  %v1715_v6 = vmul.f32 %v1714_v12, %v5394_v26  ;;  %v5527_v49 = vmul.f32 %v5516_v38, %v5516_v38  ;;  %v2327_v61 = vadd.f32 %v2322_v56, %v2317_v28  ;;  %vm5532_vm4 = vmor %vm1685_vm9, %vm1686_vm6 }
 0x21f   : > { %vm2042_vm11 = vcmp.eq.f32.partialorder %v4254_v2, 0.0  ;;  %v2055_v57 = vand.u32 2147483648, %v4254_v2  ;;  %2776 = vst.msk [vmem:[%s3802_s18 + $0x98] sm:$0x1] %vm6232_vm12, %v2285_v39  ;;  %v2348_v23 = vadd.f32 %v2343_v58, %v2338_v50  ;;  %vm1691_vm5 = vcmp.eq.s32.totalorder %v5417_v36, inf  ;;  %vm6233_vm9 = vmmov %vm6232_vm12 }
 0x220   : > { %vm1692_vm13 = vcmp.eq.s32.totalorder %v5474_v24, inf  ;;  %v2033_v30 = vadd.f32 %v2032_v32, %v5303_v13  ;;  %v1716_v53 = vadd.f32 0.19993454, %v1715_v6  ;;  %v2158_v45 = vmul.f32 0.002785687, %v5527_v49  ;;  %vm6237_vm6 = vmmov %vm6233_vm9  ;;  %v6241_v32 = vld [vmem:[#allocation23_spill] sm:$0xff] }
 0x221   : > { %2786 = vst.msk [vmem:[%s3802_s18 + $0xe8] sm:$0x1] %vm6233_vm9, %v2327_v61  ;;  %vm5546_vm14 = vmand %vm1691_vm5, %vm1692_vm13  ;;  %v1893_v22 = vmul.f32 %v6236_v35, %v6236_v35  ;;  %v3202_v15 = vpop.eup %3201  ;;  %vm1492_vm12 = vcmp.eq.f32.partialorder %v5479_v46, inf  ;;  %vm1494_vm8 = vcmp.eq.f32.partialorder %v5479_v46, 0.0  ;;  %v1495_v13 = vand.u32 2147483648, %v5479_v46  ;;  %v6242_v61 = vld [vmem:[#allocation33_spill] sm:$0xff] }
 0x222   : > { %2791 = vst.msk [vmem:[%s3802_s18 + $0x110] sm:$0x1] %vm6237_vm6, %v2348_v23  ;;  %v5558_v25 = vand.u32 2147483647, %v6236_v35  ;;  %v2035_v0 = vsub.f32 1.5707964, %v2033_v30  ;;  %v1717_v31 = vmul.f32 %v1716_v53, %v5394_v26  ;;  %v1491_v18 = vmul.f32 %v3202_v15, %v5479_v46 }
 0x223   : > { %v2159_v54 = vadd.f32 -0.015866, %v2158_v45  ;;  %v3204_v8 = vpop.eup %3203  ;;  %v5563_v40 = vadd.f32 %v1893_v22, %v5462_v10  ;;  %vm6238_vm13 = vcmp.gt.f32.partialorder %v5192_v21, %v4671_v42  ;;  %vm6239_vm9 = vcmask 121856   ;;  %v6243_v23 = vld [vmem:[#allocation14_spill] sm:$0xff] }
 0x224   : > { %v2106_v1 = vmin.f32 %v5488_v14, %v5558_v25  ;;  %v2107_v4 = vmax.f32 %v5488_v14, %v5558_v25  ;;  %v3206_v37 = vpop.eup %3205  ;;  %v2036_v34 = vsel %vm6238_vm13, %v2035_v0, %v2033_v30  ;;  %v1718_v19 = vadd.f32 -0.33333147, %v1717_v31  ;;  %v6245_v0 = vld [vmem:[#allocation24_spill] sm:$0xff] }
 0x225   : > { %v2160_v28 = vmul.f32 %v2159_v54, %v5527_v49  ;;  %v1493_v10 = vsel %vm1492_vm12, %v5479_v46, %v1491_v18  ;;  %v2038_v63 = vsub.f32 3.1415927, %v2036_v34  ;;  %v5583_v56 = vmul.f32 %v3206_v37, %v1653_v52  ;;  %v6246_v54 = vld [vmem:[#allocation12_spill] sm:$0xff] }
 0x226   : > { %v1496_v12 = vsel %vm1494_vm8, %v1495_v13, %v1493_v10  ;;  %v5586_v39 = vmul.f32 %v3204_v8, %v6212_v5  ;;  %v1719_v42 = vmul.f32 %v1718_v19, %v5394_v26  ;;  %v5592_v50 = vmul.f32 %v3204_v8, %v6226_v29 }
 0x227   : > { %v2161_v21 = vadd.f32 0.04247222, %v2160_v28  ;;  %2717 = vst.msk [vmem:[%s3781_s15 + $0x68] sm:$0xff] %vm6239_vm9, %v1496_v12  ;;  %v1903_v58 = vadd.f32 1e-08, %v5563_v40  ;;  %vm6240_vm8 = vcmp.lt.f32.partialorder %v6073_v33, 0.0  ;;  %v5599_v52 = vmul.f32 %v5583_v56, %v5583_v56 }
 0x228   : > { %v2039_v46 = vsel %vm6240_vm8, %v2038_v63, %v2036_v34  ;;  %v2253_v6 = vmul.f32 %v5586_v39, %v6241_v32  ;;  %v2295_v26 = vmul.f32 %v5586_v39, %v6242_v61  ;;  %v1720_v53 = vmul.f32 %v1719_v42, %v5374_v41  ;;  %v6244_v33 = vld [vmem:[#allocation2_spill] sm:$0xff] }
 0x229   : > { %v2043_v30 = vsel %vm2042_vm11, %v6243_v23, %v2039_v46  ;;  %v2162_v45 = vmul.f32 %v2161_v21, %v5527_v49  ;;  %v2258_v22 = vmul.f32 %v5592_v50, %v6244_v33  ;;  %v1658_v13 = vmul.f32 0.002785687, %v5599_v52  ;;  %vm6247_vm11 = vmmov %vm6239_vm9 }
 0x22a   : > { %v2047_v15 = vsel %vm5244_vm10, nan, %v2043_v30  ;;  %v2300_v31 = vmul.f32 %v5592_v50, %v6245_v0  ;;  %3207 = vrsqrt.f32 %v1903_v58  ;;  %v1721_v8 = vadd.f32 %v1720_v53, %v5374_v41 }
 0x22b   : > { %v2053_v18 = vsel %vm5253_vm3, %v6246_v54, %v2047_v15  ;;  %v2163_v37 = vadd.f32 -0.074975304, %v2162_v45  ;;  %v2263_v34 = vadd.f32 %v2258_v22, %v2253_v6  ;;  %v1659_v28 = vadd.f32 -0.015866, %v1658_v13  ;;  %vm6248_vm3 = vmmov %vm6239_vm9 }
 0x22c   : > { %v2054_v19 = vand.u32 2147483647, %v2053_v18  ;;  %v2305_v48 = vadd.f32 %v2300_v31, %v2295_v26  ;;  %3209 = vrsqrt.f32 %v5563_v40  ;;  %vm1725_vm10 = vcmp.lt.f32.partialorder %v6173_v3, 0.0  ;;  %vm6250_vm8 = vmmov %vm6248_vm3 }
 0x22d   : > { %v1723_v10 = vsub.f32 1.5707964, %v1721_v8  ;;  %v2164_v63 = vmul.f32 %v2163_v37, %v5527_v49  ;;  %2770 = vst.msk [vmem:[%s3802_s18 + $0x68] sm:$0xff] %vm6247_vm11, %v2263_v34  ;;  %vm1728_vm6 = vcmp.lt.s32.totalorder %v6173_v3, 0  ;;  %v1660_v41 = vmul.f32 %v1659_v28, %v5599_v52 }
 0x22e   : > { %v2056_v62 = vor.u32 %v2055_v57, %v2054_v19  ;;  %2780 = vst.msk [vmem:[%s3802_s18 + $0xb8] sm:$0xff] %vm6248_vm3, %v2305_v48  ;;  %3211 = vrcp.f32 %v2107_v4  ;;  %vm6249_vm12 = vcmp.gt.f32.partialorder %v5258_v20, %v5223_v27  ;;  %vm2138_vm13 = vcmp.ne.f32.partialorder %v6222_v44, %v6222_v44 }
 0x22f   : > { %v1724_v12 = vsel %vm6249_vm12, %v1723_v10, %v1721_v8  ;;  %v2165_v42 = vadd.f32 0.1064488, %v2164_v63  ;;  %vm2139_vm9 = vcmp.ne.f32.partialorder %v6236_v35, %v6236_v35  ;;  %v1661_v57 = vadd.f32 0.04247222, %v1660_v41 }
 0x230   : > { %2758 = vst.msk [vmem:[%s4178_s20 + $0x80] sm:$0xff] %vm6250_vm8, %v2056_v62  ;;  %v1726_v2 = vsub.f32 3.1415927, %v1724_v12  ;;  %vm5641_vm11 = vmor %vm2138_vm13, %vm2139_vm9  ;;  %vm2144_vm3 = vcmp.eq.s32.totalorder %v5488_v14, inf  ;;  %vm2145_vm5 = vcmp.eq.s32.totalorder %v5558_v25, inf  ;;  %v6255_v4 = vmov 0.0  }
 0x231   : > { %v2166_v27 = vmul.f32 %v2165_v42, %v5527_v49  ;;  %vm5648_vm12 = vmand %vm2144_vm3, %vm2145_vm5  ;;  %v1729_v58 = vsel %vm1728_vm6, 3.1415927, %v6255_v4  ;;  %vm1730_vm13 = vcmp.eq.f32.partialorder %v4472_v60, 0.0  ;;  %v1662_v6 = vmul.f32 %v1661_v57, %v5599_v52 }
 0x232   : > { %v1727_v46 = vsel %vm1725_vm10, %v1726_v2, %v1724_v12  ;;  %v6256_v26 = vmov 0.7853982   ;;  %v1743_v15 = vand.u32 2147483648, %v4472_v60  ;;  %vm1945_vm5 = vcmp.eq.f32.partialorder %v5563_v40, inf  ;;  %vm6259_vm6 = vmmov %vm6250_vm8 }
 0x233   : > { %v1737_v23 = vsel %vm1725_vm10, 2.3561945, %v6256_v26  ;;  %v1731_v30 = vsel %vm1730_vm13, %v1729_v58, %v1727_v46  ;;  %v2167_v53 = vadd.f32 -0.14207031, %v2166_v27  ;;  %v1663_v13 = vadd.f32 -0.074975304, %v1662_v6  ;;  %vm6258_vm10 = vmmov %vm6250_vm8 }
 0x234   : > { %v3208_v45 = vpop.eup %3207  ;;  %v1735_v22 = vsel %vm5270_vm7, nan, %v1731_v30  ;;  %vm1947_vm7 = vcmp.eq.f32.partialorder %v5563_v40, 0.0  ;;  %v1948_v60 = vand.u32 2147483648, %v5563_v40  ;;  %vm6260_vm9 = vmmov %vm6259_vm6  ;;  %vm2181_vm3 = vcmp.lt.s32.totalorder %v6175_v43, 0 }
 0x235   : > { %v1741_v31 = vsel %vm5346_vm1, %v1737_v23, %v1735_v22  ;;  %v2168_v54 = vmul.f32 %v2167_v53, %v5527_v49  ;;  %v2207_v18 = vmul.f32 %v3208_v45, %v6222_v44  ;;  %v2212_v3 = vmul.f32 %v3208_v45, %v6236_v35  ;;  %vm6261_vm8 = vmmov %vm6259_vm6 }
 0x236   : > { %v3210_v8 = vpop.eup %3209  ;;  %v1742_v37 = vand.u32 2147483647, %v1741_v31  ;;  %v1664_v34 = vmul.f32 %v1663_v13, %v5599_v52  ;;  %vm6257_vm1 = vcmask 114688   ;;  %vm2178_vm13 = vcmp.lt.f32.partialorder %v6175_v43, 0.0 }
 0x237   : > { %v2169_v11 = vadd.f32 0.19993454, %v2168_v54  ;;  %v1944_v19 = vmul.f32 %v3210_v8, %v5563_v40  ;;  %v2274_v7 = vmul.f32 %v2207_v18, %v6241_v32  ;;  %v2279_v28 = vmul.f32 %v2212_v3, %v6244_v33 }
 0x238   : > { %v3212_v48 = vpop.eup %3211  ;;  %v1744_v10 = vor.u32 %v1743_v15, %v1742_v37  ;;  %v1665_v63 = vadd.f32 0.1064488, %v1664_v34  ;;  %v2316_v62 = vmul.f32 %v2207_v18, %v6242_v61  ;;  %v2321_v41 = vmul.f32 %v2212_v3, %v6245_v0 }
 0x239   : > { %v2170_v12 = vmul.f32 %v2169_v11, %v5527_v49  ;;  %v1946_v42 = vsel %vm1945_vm5, %v5563_v40, %v1944_v19  ;;  %v5686_v32 = vmul.f32 %v3212_v48, %v2106_v1  ;;  %v2284_v33 = vadd.f32 %v2279_v28, %v2274_v7 }
 0x23a   : > { %2723 = vst.msk [vmem:[%s4178_s20 + $0x70] sm:$0x1] %vm6257_vm1, %v1744_v10  ;;  %v1666_v2 = vmul.f32 %v1665_v63, %v5599_v52  ;;  %v1949_v61 = vsel %vm1947_vm7, %v1948_v60, %v1946_v42  ;;  %v2326_v0 = vadd.f32 %v2321_v41, %v2316_v62  ;;  %v2337_v57 = vmul.f32 %v2207_v18, %v5586_v39 }
 0x23b   : > { %v2171_v27 = vadd.f32 -0.33333147, %v2170_v12  ;;  %2755 = vst.msk [vmem:[%s3781_s15 + $0x90] sm:$0xff] %vm6258_vm10, %v1949_v61  ;;  %v5698_v58 = vmul.f32 %v5686_v32, %v5686_v32  ;;  %v2342_v1 = vmul.f32 %v2212_v3, %v5592_v50  ;;  %v2182_v37 = vsel %vm2181_vm3, 3.1415927, %v6255_v4  ;;  %vm6263_vm10 = vmmov %vm6259_vm6 }
 0x23c   : > { %2775 = vst.msk [vmem:[%s3802_s18 + $0x90] sm:$0xff] %vm6259_vm6, %v2284_v33  ;;  %v1667_v46 = vadd.f32 -0.14207031, %v1666_v2  ;;  %vm2183_vm5 = vcmp.eq.f32.partialorder %v6197_v47, 0.0  ;;  %v2190_v9 = vsel %vm2178_vm13, 2.3561945, %v6256_v26  ;;  %vm6262_vm7 = vcmp.gt.f32.partialorder %v5474_v24, %v5417_v36 }
 0x23d   : > { %2785 = vst.msk [vmem:[%s3802_s18 + $0xe0] sm:$0xff] %vm6260_vm9, %v2326_v0  ;;  %v2172_v40 = vmul.f32 %v2171_v27, %v5527_v49  ;;  %v2111_v6 = vmul.f32 0.002785687, %v5698_v58  ;;  %v2347_v23 = vadd.f32 %v2342_v1, %v2337_v57  ;;  %v2196_v48 = vand.u32 2147483648, %v6197_v47 }
 0x23e   : > { %v1668_v39 = vmul.f32 %v1667_v46, %v5599_v52  ;;  %v1696_v61 = vand.u32 2147483648, %v6226_v29  ;;  %vm2131_vm6 = vcmp.lt.f32.partialorder %v6222_v44, 0.0  ;;  %vm2136_vm9 = vcmp.eq.f32.partialorder %v6236_v35, 0.0 }
 0x23f   : > { %v2173_v30 = vmul.f32 %v2172_v40, %v5516_v38  ;;  %v2112_v53 = vadd.f32 -0.015866, %v2111_v6  ;;  %2790 = vst.msk [vmem:[%s3802_s18 + $0x108] sm:$0xff] %vm6261_vm8, %v2347_v23 }
 0x240   : > { %v1669_v45 = vadd.f32 0.19993454, %v1668_v39  ;;  %v2143_v39 = vsel %vm2131_vm6, 2.3561945, %v6256_v26 }
 0x241   : > { %v2174_v22 = vadd.f32 %v2173_v30, %v5516_v38  ;;  %v2113_v50 = vmul.f32 %v2112_v53, %v5698_v58 }
 0x242   : > { %v1670_v15 = vmul.f32 %v1669_v45, %v5599_v52 }
 0x243   : > { %v2176_v13 = vsub.f32 1.5707964, %v2174_v22  ;;  %v2114_v31 = vadd.f32 0.04247222, %v2113_v50 }
 0x244   : > { %v1671_v49 = vadd.f32 -0.33333147, %v1670_v15 }
 0x245   : > { %v2177_v54 = vsel %vm2175_vm2, %v2176_v13, %v2174_v22  ;;  %v2115_v18 = vmul.f32 %v2114_v31, %v5698_v58  ;;  %vm1681_vm2 = vcmp.lt.s32.totalorder %v6212_v5, 0 }
 0x246   : > { %v2179_v3 = vsub.f32 3.1415927, %v2177_v54  ;;  %v1672_v8 = vmul.f32 %v1671_v49, %v5599_v52  ;;  %v1682_v47 = vsel %vm1681_vm2, 3.1415927, %v6255_v4 }
 0x247   : > { %v2116_v38 = vadd.f32 -0.074975304, %v2115_v18 }
 0x248   : > { %v2180_v34 = vsel %vm2178_vm13, %v2179_v3, %v2177_v54  ;;  %v1673_v60 = vmul.f32 %v1672_v8, %v5583_v56 }
 0x249   : > { %v2184_v11 = vsel %vm2183_vm5, %v2182_v37, %v2180_v34  ;;  %v2117_v19 = vmul.f32 %v2116_v38, %v5698_v58 }
 0x24a   : > { %v2188_v17 = vsel %vm5455_vm15, nan, %v2184_v11  ;;  %v1674_v52 = vadd.f32 %v1673_v60, %v5583_v56  ;;  %vm1678_vm15 = vcmp.lt.f32.partialorder %v6212_v5, 0.0 }
 0x24b   : > { %v2194_v43 = vsel %vm5467_vm0, %v2190_v9, %v2188_v17  ;;  %v2118_v7 = vadd.f32 0.1064488, %v2117_v19  ;;  %vm1683_vm0 = vcmp.eq.f32.partialorder %v6226_v29, 0.0  ;;  %v1690_v33 = vsel %vm1678_vm15, 2.3561945, %v6256_v26 }
 0x24c   : > { %v2195_v28 = vand.u32 2147483647, %v2194_v43  ;;  %v1676_v10 = vsub.f32 1.5707964, %v1674_v52 }
 0x24d   : > { %v2119_v63 = vmul.f32 %v2118_v7, %v5698_v58 }
 0x24e   : > { %v2197_v62 = vor.u32 %v2196_v48, %v2195_v28  ;;  %v1677_v51 = vsel %vm6262_vm7, %v1676_v10, %v1674_v52 }
 0x24f   : > { %v1679_v41 = vsub.f32 3.1415927, %v1677_v51  ;;  %v2120_v12 = vadd.f32 -0.14207031, %v2119_v63 }
 0x250   : > { %2761 = vst.msk [vmem:[%s4178_s20 + $0x98] sm:$0x1] %vm6257_vm1, %v2197_v62 }
 0x251   : > { %v1680_v55 = vsel %vm1678_vm15, %v1679_v41, %v1677_v51  ;;  %v2121_v56 = vmul.f32 %v2120_v12, %v5698_v58 }
 0x252   : > { %v1684_v42 = vsel %vm1683_vm0, %v1682_v47, %v1680_v55 }
 0x253   : > { %v1688_v36 = vsel %vm5532_vm4, nan, %v1684_v42  ;;  %v2122_v24 = vadd.f32 0.19993454, %v2121_v56  ;;  %vm2134_vm4 = vcmp.lt.s32.totalorder %v6222_v44, 0 }
 0x254   : > { %v1694_v5 = vsel %vm5546_vm14, %v1690_v33, %v1688_v36  ;;  %vm6264_vm14 = vcmp.gt.f32.partialorder %v5558_v25, %v5488_v14  ;;  %v2135_v23 = vsel %vm2134_vm4, 3.1415927, %v6255_v4  ;;  %v2149_v14 = vand.u32 2147483648, %v6236_v35 }
 0x255   : > { %v1695_v2 = vand.u32 2147483647, %v1694_v5  ;;  %v2123_v0 = vmul.f32 %v2122_v24, %v5698_v58 }
 0x257   : > { %v1697_v57 = vor.u32 %v1696_v61, %v1695_v2  ;;  %v2124_v27 = vadd.f32 -0.33333147, %v2123_v0 }
 0x259   : > { %2722 = vst.msk [vmem:[%s4178_s20 + $0x68] sm:$0xff] %vm6263_vm10, %v1697_v57  ;;  %v2125_v1 = vmul.f32 %v2124_v27, %v5698_v58 }
 0x25b   : > { %v2126_v46 = vmul.f32 %v2125_v1, %v5686_v32 }
 0x25d   : > { %v2127_v16 = vadd.f32 %v2126_v46, %v5686_v32 }
 0x25f   : > { %v2129_v40 = vsub.f32 1.5707964, %v2127_v16 }
 0x261   : > { %v2130_v29 = vsel %vm6264_vm14, %v2129_v40, %v2127_v16 }
 0x262   : > { %v2132_v59 = vsub.f32 3.1415927, %v2130_v29 }
 0x264   : > { %v2133_v6 = vsel %vm2131_vm6, %v2132_v59, %v2130_v29 }
 0x265   : > { %v2137_v58 = vsel %vm2136_vm9, %v2135_v23, %v2133_v6 }
 0x266   : > { %v2141_v32 = vsel %vm5641_vm11, nan, %v2137_v58 }
 0x267   : > { %v2147_v30 = vsel %vm5648_vm12, %v2143_v39, %v2141_v32 }
 0x268   : > { %v2148_v53 = vand.u32 2147483647, %v2147_v30 }
 0x26a   : > { %v2150_v25 = vor.u32 %v2149_v14, %v2148_v53 }
 0x26c   : > { %2760 = vst.msk [vmem:[%s4178_s20 + $0x90] sm:$0xff] %vm6261_vm8, %v2150_v25 }
 0x26d PF: > { %s17_s23 = sadd.s32 1, %s3235_s23   ;;  %s6265_s21 = smov %s3231_s22 }
 0x26e   : > { %p14_p5 = scmp.ge.s32.totalorder %s17_s23, 4   ;;  %s6266_s22 = smov %s6268_s24 }
 0x270   :  { %16 = sbr.rel (!%p14_p5) target bundleno = 2 (0x2), region = 127 }

</bundles_post_ra>
